<compile_context>
chip_gen: v5e
topology: v5e:2x2
jax: 0.10.0
libtpu: 0.0.40
codegen_flags: <defaults>
</compile_context>

<pallas_src>
import functools

import jax
import jax.numpy as jnp
from jax.experimental import pallas as pl
from jax.experimental.pallas import tpu as pltpu

# ---------------- scaled-down synthetic BART config ----------------
VOCAB = 256
D_MODEL = 32
N_HEADS = 4
HEAD_DIM = D_MODEL // N_HEADS
FFN = 64
MAX_POS = 32          # learned positional table has MAX_POS + 2 rows (BART offset 2)
PAD_ID = 1
DEC_START_ID = 2
NEG_INF = -1e9
QKV_LANES = 128       # fused q/v/k projection padded to one full vreg lane width


# ============================= in-kernel helpers =============================

def _ln_f32(x, g, b, eps=1e-5):
    mu = jnp.mean(x, axis=-1, keepdims=True)
    xc = x - mu
    var = jnp.mean(xc * xc, axis=-1, keepdims=True)
    return xc * jax.lax.rsqrt(var + eps) * g + b


def _bf16_dot(x_f32, w_bf16):
    # bf16 MXU inputs, f32 accumulation.
    return jnp.dot(x_f32.astype(jnp.bfloat16), w_bf16,
                   preferred_element_type=jnp.float32)


def _mha(q_src, kv_src, bias):
    """Multi-head attention on packed (T, 128) f32 projections.

    q_src : per-head q at lanes [0, D)           (1/sqrt(head_dim) folded into Wq)
    kv_src: per-head v at lanes [D, 2D), k at lanes [2D, 3D)
    bias  : (Tq, Tk) f32 additive mask (padding / causal / batch-block)

    k is aligned to q's lanes with a single roll of 64 (self-inverse on the
    128-lane axis, so the result is independent of the rotate direction).
    Heads are selected with boolean lane masks (selects) — no sub-128 lane
    slices.  Returns (Tq, 128) f32 context with head outputs at lanes [D, 2D).
    """
    kv_bf = kv_src.astype(jnp.bfloat16)
    q_bf = kv_bf if q_src is kv_src else q_src.astype(jnp.bfloat16)
    k_al = pltpu.roll(kv_src, QKV_LANES // 2, 1).astype(jnp.bfloat16)
    lane = jax.lax.broadcasted_iota(jnp.int32, (1, QKV_LANES), 1)
    ctx = jnp.zeros((q_src.shape[0], QKV_LANES), jnp.float32)
    for h in range(N_HEADS):
        lo = h * HEAD_DIM
        kmask = (lane >= lo) & (lane < lo + HEAD_DIM)                       # k@[0,D)
        vmask = (lane >= D_MODEL + lo) & (lane < D_MODEL + lo + HEAD_DIM)   # v@[D,2D)
        kh = jnp.where(kmask, k_al, jnp.zeros_like(k_al))
        vh = jnp.where(vmask, kv_bf, jnp.zeros_like(kv_bf))
        # q is left unmasked: kh is zero outside head h's lanes, so all
        # cross-head / non-q lane products vanish in the contraction.
        s = jax.lax.dot_general(q_bf, kh, (((1,), (1,)), ((), ())),
                                preferred_element_type=jnp.float32)         # (Tq, Tk)
        s = s + bias
        m = jnp.max(s, axis=-1, keepdims=True)
        p = jnp.exp(s - m)
        p = p * pl.reciprocal(jnp.sum(p, axis=-1, keepdims=True), approx=True)
        # vh is zero outside head h's lane block -> accumulation places the
        # head's context directly at lanes [D + h*HEAD_DIM, ...).
        ctx = ctx + jnp.dot(p.astype(jnp.bfloat16), vh,
                            preferred_element_type=jnp.float32)
    return ctx


def _self_attn(x, bias, w_qkv, b_qkv, w_o, b_o, g, b):
    qkv = _bf16_dot(x, w_qkv) + b_qkv                    # (T, 128), one fused matmul
    ctx = _mha(qkv, qkv, bias)
    attn = _bf16_dot(ctx, w_o) + b_o                     # w_o rows live at [D, 2D)
    return _ln_f32(x + attn, g, b)


def _cross_attn(x, enc, bias, w_q, b_q, w_kv, b_kv, w_o, b_o, g, b):
    q = _bf16_dot(x, w_q) + b_q                          # q at lanes [0, D)
    kv = _bf16_dot(enc, w_kv) + b_kv                     # v at [D,2D), k at [2D,3D)
    ctx = _mha(q, kv, bias)
    attn = _bf16_dot(ctx, w_o) + b_o
    return _ln_f32(x + attn, g, b)


def _ffn(x, w1, b1, w2, b2, g, b):
    h = _bf16_dot(x, w1) + b1
    # TODO(synk): HF BART uses exact (erf) GELU; tanh approximation used here.
    h = jax.nn.gelu(h, approximate=True)
    h = _bf16_dot(h, w2) + b2
    return _ln_f32(x + h, g, b)


# ============================ the single fused kernel ============================

def _robart_kernel(
        h0_ref, d0_ref, mask_ref, bidr_ref, bidc_ref, labels_ref,
        e_eg, e_eb,
        e_wqkv, e_bqkv, e_wo, e_bo, e_g1, e_b1,
        e_f1w, e_f1b, e_f2w, e_f2b, e_g2, e_b2,
        d_eg, d_eb,
        s_wqkv, s_bqkv, s_wo, s_bo, s_g, s_b,
        c_wq, c_bq, c_wkv, c_bkv, c_wo, c_bo, c_g, c_b,
        f1w, f1b, f2w, f2b, f_g, f_b,
        emb_ref, lmb_ref,
        loss_ref, *, total_tokens):
    T = total_tokens

    # masks built in-kernel: batch-block (flattened batch), encoder padding, causal
    same_batch = bidc_ref[...] == bidr_ref[...]                   # (T,1)==(1,T)->(T,T)
    keep_key = mask_ref[...] > 0.5                                # (1, T) bool
    enc_bias = jnp.where(same_batch & keep_key, 0.0, NEG_INF)     # enc self + cross
    qi = jax.lax.broadcasted_iota(jnp.int32, (T, T), 0)
    ki = jax.lax.broadcasted_iota(jnp.int32, (T, T), 1)
    dec_bias = jnp.where(same_batch & (qi >= ki), 0.0, NEG_INF)   # causal within batch

    # ----- encoder (post-norm) -----  # TODO(synk): dropout (training mode) not modeled.
    x = _ln_f32(h0_ref[...], e_eg[...], e_eb[...])                # layernorm_embedding
    x = _self_attn(x, enc_bias, e_wqkv[...], e_bqkv[...], e_wo[...], e_bo[...],
                   e_g1[...], e_b1[...])
    enc = _ffn(x, e_f1w[...], e_f1b[...], e_f2w[...], e_f2b[...], e_g2[...], e_b2[...])

    # ----- decoder (post-norm, causal self-attn + cross-attn over encoder) -----
    y = _ln_f32(d0_ref[...], d_eg[...], d_eb[...])
    y = _self_attn(y, dec_bias, s_wqkv[...], s_bqkv[...], s_wo[...], s_bo[...],
                   s_g[...], s_b[...])
    y = _cross_attn(y, enc, enc_bias, c_wq[...], c_bq[...], c_wkv[...], c_bkv[...],
                    c_wo[...], c_bo[...], c_g[...], c_b[...])
    y = _ffn(y, f1w[...], f1b[...], f2w[...], f2b[...], f_g[...], f_b[...])

    # ----- tied LM head + token-level cross-entropy (VOCAB fits one block) -----
    logits = jax.lax.dot_general(
        y.astype(jnp.bfloat16), emb_ref[...], (((1,), (1,)), ((), ())),
        preferred_element_type=jnp.float32) + lmb_ref[...]        # (T, VOCAB)
    m = jnp.max(logits, axis=-1, keepdims=True)
    lse = m + jnp.log(jnp.sum(jnp.exp(logits - m), axis=-1, keepdims=True))
    labels = labels_ref[...]                                      # (T,1), -100 = ignore
    col = jax.lax.broadcasted_iota(jnp.int32, logits.shape, 1)
    tgt = jnp.sum(jnp.where(col == labels, logits, 0.0), axis=-1, keepdims=True)
    valid = (labels != -100).astype(jnp.float32)
    total = jnp.sum((lse - tgt) * valid, axis=0, keepdims=True)   # (1, 1)
    denom = jnp.maximum(jnp.sum(valid, axis=0, keepdims=True), 1.0)
    loss_ref[...] = total / denom


# ============================= model params / glue =============================

def init_params(key):
    ks = iter(jax.random.split(key, 32))
    scale = HEAD_DIM ** -0.5
    D = D_MODEL

    def nrm(shape):
        return 0.02 * jax.random.normal(next(ks), shape, jnp.float32)

    bf = lambda x: x.astype(jnp.bfloat16)
    ones = lambda s: jnp.ones(s, jnp.float32)
    zeros = lambda s: jnp.zeros(s, jnp.float32)

    # Packed layouts: q at lanes [0,D) (pre-scaled by 1/sqrt(head_dim)),
    # v at lanes [D,2D), k at lanes [2D,3D); out-projection rows at [D,2D).
    # NOTE: when loading a real checkpoint the q *bias* slots must carry the
    # same 1/sqrt(head_dim) scale as the q weights (biases are zero here).
    def pack_qkv(wq, wk, wv):
        out = jnp.zeros((D, QKV_LANES), jnp.float32)
        out = out.at[:, 0:D].set(wq * scale)
        out = out.at[:, D:2 * D].set(wv)
        out = out.at[:, 2 * D:3 * D].set(wk)
        return bf(out)

    def pack_q(wq):
        out = jnp.zeros((D, QKV_LANES), jnp.float32)
        return bf(out.at[:, 0:D].set(wq * scale))

    def pack_kv(wk, wv):
        out = jnp.zeros((D, QKV_LANES), jnp.float32)
        out = out.at[:, D:2 * D].set(wv)
        out = out.at[:, 2 * D:3 * D].set(wk)
        return bf(out)

    def pack_out(wo):
        out = jnp.zeros((QKV_LANES, D), jnp.float32)
        return bf(out.at[D:2 * D, :].set(wo))

    enc = {
        "w_qkv": pack_qkv(nrm((D, D)), nrm((D, D)), nrm((D, D))),
        "b_qkv": zeros((1, QKV_LANES)),
        "w_o": pack_out(nrm((D, D))), "b_o": zeros((1, D)),
        "ln1_g": ones((1, D)), "ln1_b": zeros((1, D)),
        "fc1_w": bf(nrm((D, FFN))), "fc1_b": zeros((1, FFN)),
        "fc2_w": bf(nrm((FFN, D))), "fc2_b": zeros((1, D)),
        "ln2_g": ones((1, D)), "ln2_b": zeros((1, D)),
    }
    dec = {
        "w_qkv": pack_qkv(nrm((D, D)), nrm((D, D)), nrm((D, D))),
        "b_qkv": zeros((1, QKV_LANES)),
        "w_o": pack_out(nrm((D, D))), "b_o": zeros((1, D)),
        "ln1_g": ones((1, D)), "ln1_b": zeros((1, D)),
        "c_w_q": pack_q(nrm((D, D))), "c_b_q": zeros((1, QKV_LANES)),
        "c_w_kv": pack_kv(nrm((D, D)), nrm((D, D))), "c_b_kv": zeros((1, QKV_LANES)),
        "c_w_o": pack_out(nrm((D, D))), "c_b_o": zeros((1, D)),
        "c_ln_g": ones((1, D)), "c_ln_b": zeros((1, D)),
        "fc1_w": bf(nrm((D, FFN))), "fc1_b": zeros((1, FFN)),
        "fc2_w": bf(nrm((FFN, D))), "fc2_b": zeros((1, D)),
        "ln2_g": ones((1, D)), "ln2_b": zeros((1, D)),
    }
    return {
        "emb": bf(nrm((VOCAB, D))),                     # tied embedding / LM head (bf16)
        "final_logits_bias": zeros((1, VOCAB)),
        "enc_pos": nrm((MAX_POS + 2, D)),
        "dec_pos": nrm((MAX_POS + 2, D)),
        "enc_emb_ln": {"g": ones((1, D)), "b": zeros((1, D))},
        "dec_emb_ln": {"g": ones((1, D)), "b": zeros((1, D))},
        "enc": enc, "dec": dec,
    }


def shift_tokens_right(labels):
    # HF BART: decoder_input_ids = shift(labels) with decoder_start token, -100 -> pad
    lab = jnp.where(labels == -100, PAD_ID, labels)
    start = jnp.full((labels.shape[0], 1), DEC_START_ID, labels.dtype)
    return jnp.concatenate([start, lab[:, :-1]], axis=1)


def robart_forward(p, input_ids, attention_mask, labels):
    """Returns scalar LM loss (mean CE over labels != -100); one fused Pallas call."""
    B, S = input_ids.shape
    T = B * S
    pos = jnp.arange(S) + 2                              # BART positional offset

    # embedding lookups stay in the wrapper (XLA gathers); everything else is fused.
    h0 = (p["emb"][input_ids].astype(jnp.float32)
          + p["enc_pos"][pos][None]).reshape(T, D_MODEL)
    dec_ids = shift_tokens_right(labels)
    d0 = (p["emb"][dec_ids].astype(jnp.float32)
          + p["dec_pos"][pos][None]).reshape(T, D_MODEL)

    mask_f = attention_mask.astype(jnp.float32).reshape(1, T)
    bid = jnp.repeat(jnp.arange(B, dtype=jnp.int32), S)
    bid_row = bid.reshape(1, T)
    bid_col = bid.reshape(T, 1)
    labels2 = labels.reshape(T, 1).astype(jnp.int32)

    e, d = p["enc"], p["dec"]
    inputs = (
        h0, d0, mask_f, bid_row, bid_col, labels2,
        p["enc_emb_ln"]["g"], p["enc_emb_ln"]["b"],
        e["w_qkv"], e["b_qkv"], e["w_o"], e["b_o"], e["ln1_g"], e["ln1_b"],
        e["fc1_w"], e["fc1_b"], e["fc2_w"], e["fc2_b"], e["ln2_g"], e["ln2_b"],
        p["dec_emb_ln"]["g"], p["dec_emb_ln"]["b"],
        d["w_qkv"], d["b_qkv"], d["w_o"], d["b_o"], d["ln1_g"], d["ln1_b"],
        d["c_w_q"], d["c_b_q"], d["c_w_kv"], d["c_b_kv"], d["c_w_o"], d["c_b_o"],
        d["c_ln_g"], d["c_ln_b"],
        d["fc1_w"], d["fc1_b"], d["fc2_w"], d["fc2_b"], d["ln2_g"], d["ln2_b"],
        p["emb"], p["final_logits_bias"],
    )
    # Grid-less call: every operand is a whole-array VMEM block; total residency
    # (weights + emb + activations) is well under any generation's VMEM budget.
    loss = pl.pallas_call(
        functools.partial(_robart_kernel, total_tokens=T),
        out_shape=jax.ShapeDtypeStruct((1, 1), jnp.float32),
    )(*inputs)
    return loss[0, 0]


# TODO(synk): tokenizer, pretrained-checkpoint loading, .generate(), and AdamW
# from the original module have no kernel equivalent and are not implemented.


if __name__ == "__main__":
    key = jax.random.PRNGKey(0)
    kp, ki, kl = jax.random.split(key, 3)
    params = init_params(kp)

    B, S = 2, 8
    input_ids = jax.random.randint(ki, (B, S), 0, VOCAB, dtype=jnp.int32)
    attention_mask = jnp.ones((B, S), jnp.int32).at[1, -1].set(0)   # one padded key
    labels = jax.random.randint(kl, (B, S), 0, VOCAB, dtype=jnp.int32)
    labels = labels.at[1, -1].set(-100)                             # exercise ignore_index

    loss = jax.jit(robart_forward)(params, input_ids, attention_mask, labels)
    loss = jax.block_until_ready(loss)
    assert loss.shape == () and bool(jnp.isfinite(loss))
    print("KERNEL_OK")
</pallas_src>

<mosaic_0001>
module attributes {stable_mosaic.version = 11 : i64} {
  func.func @_robart_kernel(%arg0: memref<16x32xf32, #tpu.memory_space<vmem>>, %arg1: memref<16x32xf32, #tpu.memory_space<vmem>>, %arg2: memref<1x16xf32, #tpu.memory_space<vmem>>, %arg3: memref<1x16xi32, #tpu.memory_space<vmem>>, %arg4: memref<16x1xi32, #tpu.memory_space<vmem>>, %arg5: memref<16x1xi32, #tpu.memory_space<vmem>>, %arg6: memref<1x32xf32, #tpu.memory_space<vmem>>, %arg7: memref<1x32xf32, #tpu.memory_space<vmem>>, %arg8: memref<32x128xbf16, #tpu.memory_space<vmem>>, %arg9: memref<1x128xf32, #tpu.memory_space<vmem>>, %arg10: memref<128x32xbf16, #tpu.memory_space<vmem>>, %arg11: memref<1x32xf32, #tpu.memory_space<vmem>>, %arg12: memref<1x32xf32, #tpu.memory_space<vmem>>, %arg13: memref<1x32xf32, #tpu.memory_space<vmem>>, %arg14: memref<32x64xbf16, #tpu.memory_space<vmem>>, %arg15: memref<1x64xf32, #tpu.memory_space<vmem>>, %arg16: memref<64x32xbf16, #tpu.memory_space<vmem>>, %arg17: memref<1x32xf32, #tpu.memory_space<vmem>>, %arg18: memref<1x32xf32, #tpu.memory_space<vmem>>, %arg19: memref<1x32xf32, #tpu.memory_space<vmem>>, %arg20: memref<1x32xf32, #tpu.memory_space<vmem>>, %arg21: memref<1x32xf32, #tpu.memory_space<vmem>>, %arg22: memref<32x128xbf16, #tpu.memory_space<vmem>>, %arg23: memref<1x128xf32, #tpu.memory_space<vmem>>, %arg24: memref<128x32xbf16, #tpu.memory_space<vmem>>, %arg25: memref<1x32xf32, #tpu.memory_space<vmem>>, %arg26: memref<1x32xf32, #tpu.memory_space<vmem>>, %arg27: memref<1x32xf32, #tpu.memory_space<vmem>>, %arg28: memref<32x128xbf16, #tpu.memory_space<vmem>>, %arg29: memref<1x128xf32, #tpu.memory_space<vmem>>, %arg30: memref<32x128xbf16, #tpu.memory_space<vmem>>, %arg31: memref<1x128xf32, #tpu.memory_space<vmem>>, %arg32: memref<128x32xbf16, #tpu.memory_space<vmem>>, %arg33: memref<1x32xf32, #tpu.memory_space<vmem>>, %arg34: memref<1x32xf32, #tpu.memory_space<vmem>>, %arg35: memref<1x32xf32, #tpu.memory_space<vmem>>, %arg36: memref<32x64xbf16, #tpu.memory_space<vmem>>, %arg37: memref<1x64xf32, #tpu.memory_space<vmem>>, %arg38: memref<64x32xbf16, #tpu.memory_space<vmem>>, %arg39: memref<1x32xf32, #tpu.memory_space<vmem>>, %arg40: memref<1x32xf32, #tpu.memory_space<vmem>>, %arg41: memref<1x32xf32, #tpu.memory_space<vmem>>, %arg42: memref<256x32xbf16, #tpu.memory_space<vmem>>, %arg43: memref<1x256xf32, #tpu.memory_space<vmem>>, %arg44: memref<1x1xf32, #tpu.memory_space<vmem>>) attributes {dimension_semantics = [], scalar_prefetch = 0 : i64, scratch_operands = 0 : i64, tpu.core_type = #tpu.core_type<tc>} {
    %c0 = arith.constant 0 : index
    %c0_0 = arith.constant 0 : index
    %0 = vector.load %arg4[%c0, %c0_0] : memref<16x1xi32, #tpu.memory_space<vmem>>, vector<16x1xi32>
    %c0_1 = arith.constant 0 : index
    %c0_2 = arith.constant 0 : index
    %1 = vector.load %arg3[%c0_1, %c0_2] : memref<1x16xi32, #tpu.memory_space<vmem>>, vector<1x16xi32>
    %2 = vector.broadcast %0 : vector<16x1xi32> to vector<16x16xi32>
    %3 = vector.broadcast %1 : vector<1x16xi32> to vector<16x16xi32>
    %4 = arith.cmpi eq, %2, %3 : vector<16x16xi32>
    %c0_3 = arith.constant 0 : index
    %c0_4 = arith.constant 0 : index
    %5 = vector.load %arg2[%c0_3, %c0_4] : memref<1x16xf32, #tpu.memory_space<vmem>>, vector<1x16xf32>
    %cst = arith.constant 5.000000e-01 : f32
    %6 = vector.broadcast %cst : f32 to vector<1x16xf32>
    %7 = arith.cmpf ogt, %5, %6 : vector<1x16xf32>
    %8 = vector.broadcast %7 : vector<1x16xi1> to vector<16x16xi1>
    %9 = arith.andi %4, %8 : vector<16x16xi1>
    %cst_5 = arith.constant 0.000000e+00 : f32
    %cst_6 = arith.constant -1.000000e+09 : f32
    %10 = vector.broadcast %cst_5 : f32 to vector<16x16xf32>
    %11 = vector.broadcast %cst_6 : f32 to vector<16x16xf32>
    %12 = arith.select %9, %10, %11 : vector<16x16xi1>, vector<16x16xf32>
    %13 = tpu.iota {dimensions = array<i32: 0>} : vector<16x16xi32>
    %14 = tpu.iota {dimensions = array<i32: 1>} : vector<16x16xi32>
    %15 = arith.cmpi sge, %13, %14 : vector<16x16xi32>
    %16 = arith.andi %4, %15 : vector<16x16xi1>
    %cst_7 = arith.constant 0.000000e+00 : f32
    %cst_8 = arith.constant -1.000000e+09 : f32
    %17 = vector.broadcast %cst_7 : f32 to vector<16x16xf32>
    %18 = vector.broadcast %cst_8 : f32 to vector<16x16xf32>
    %19 = arith.select %16, %17, %18 : vector<16x16xi1>, vector<16x16xf32>
    %c0_9 = arith.constant 0 : index
    %c0_10 = arith.constant 0 : index
    %20 = vector.load %arg0[%c0_9, %c0_10] : memref<16x32xf32, #tpu.memory_space<vmem>>, vector<16x32xf32>
    %c0_11 = arith.constant 0 : index
    %c0_12 = arith.constant 0 : index
    %21 = vector.load %arg6[%c0_11, %c0_12] : memref<1x32xf32, #tpu.memory_space<vmem>>, vector<1x32xf32>
    %c0_13 = arith.constant 0 : index
    %c0_14 = arith.constant 0 : index
    %22 = vector.load %arg7[%c0_13, %c0_14] : memref<1x32xf32, #tpu.memory_space<vmem>>, vector<1x32xf32>
    %cst_15 = arith.constant dense<0.000000e+00> : vector<16xf32>
    %23 = vector.multi_reduction <add>, %20, %cst_15 [1] : vector<16x32xf32> to vector<16xf32>
    %24 = vector.shape_cast %23 : vector<16xf32> to vector<16x1xf32>
    %cst_16 = arith.constant 3.200000e+01 : f32
    %25 = vector.broadcast %cst_16 : f32 to vector<16x1xf32>
    %26 = arith.divf %24, %25 : vector<16x1xf32>
    %27 = vector.broadcast %26 : vector<16x1xf32> to vector<16x32xf32>
    %28 = arith.subf %20, %27 : vector<16x32xf32>
    %29 = arith.mulf %28, %28 : vector<16x32xf32>
    %cst_17 = arith.constant dense<0.000000e+00> : vector<16xf32>
    %30 = vector.multi_reduction <add>, %29, %cst_17 [1] : vector<16x32xf32> to vector<16xf32>
    %31 = vector.shape_cast %30 : vector<16xf32> to vector<16x1xf32>
    %cst_18 = arith.constant 3.200000e+01 : f32
    %32 = vector.broadcast %cst_18 : f32 to vector<16x1xf32>
    %33 = arith.divf %31, %32 : vector<16x1xf32>
    %cst_19 = arith.constant 9.99999974E-6 : f32
    %34 = vector.broadcast %cst_19 : f32 to vector<16x1xf32>
    %35 = arith.addf %33, %34 : vector<16x1xf32>
    %36 = math.rsqrt %35 : vector<16x1xf32>
    %37 = vector.broadcast %36 : vector<16x1xf32> to vector<16x32xf32>
    %38 = arith.mulf %28, %37 : vector<16x32xf32>
    %39 = vector.broadcast %21 : vector<1x32xf32> to vector<16x32xf32>
    %40 = arith.mulf %38, %39 : vector<16x32xf32>
    %41 = vector.broadcast %22 : vector<1x32xf32> to vector<16x32xf32>
    %42 = arith.addf %40, %41 : vector<16x32xf32>
    %c0_20 = arith.constant 0 : index
    %c0_21 = arith.constant 0 : index
    %43 = vector.load %arg8[%c0_20, %c0_21] : memref<32x128xbf16, #tpu.memory_space<vmem>>, vector<32x128xbf16>
    %c0_22 = arith.constant 0 : index
    %c0_23 = arith.constant 0 : index
    %44 = vector.load %arg9[%c0_22, %c0_23] : memref<1x128xf32, #tpu.memory_space<vmem>>, vector<1x128xf32>
    %c0_24 = arith.constant 0 : index
    %c0_25 = arith.constant 0 : index
    %45 = vector.load %arg10[%c0_24, %c0_25] : memref<128x32xbf16, #tpu.memory_space<vmem>>, vector<128x32xbf16>
    %c0_26 = arith.constant 0 : index
    %c0_27 = arith.constant 0 : index
    %46 = vector.load %arg11[%c0_26, %c0_27] : memref<1x32xf32, #tpu.memory_space<vmem>>, vector<1x32xf32>
    %c0_28 = arith.constant 0 : index
    %c0_29 = arith.constant 0 : index
    %47 = vector.load %arg12[%c0_28, %c0_29] : memref<1x32xf32, #tpu.memory_space<vmem>>, vector<1x32xf32>
    %c0_30 = arith.constant 0 : index
    %c0_31 = arith.constant 0 : index
    %48 = vector.load %arg13[%c0_30, %c0_31] : memref<1x32xf32, #tpu.memory_space<vmem>>, vector<1x32xf32>
    %49 = arith.truncf %42 : vector<16x32xf32> to vector<16x32xbf16>
    %cst_32 = arith.constant dense<0.000000e+00> : vector<16x128xf32>
    %50 = tpu.matmul %49, %43, %cst_32 {dimension_numbers = #tpu.dot_dimension_numbers<[1], [0], [0], [1], [0, 0, 1, 1], [], []>} : vector<16x32xbf16>, vector<32x128xbf16>, vector<16x128xf32> -> vector<16x128xf32>
    %51 = vector.broadcast %44 : vector<1x128xf32> to vector<16x128xf32>
    %52 = arith.addf %50, %51 : vector<16x128xf32>
    %53 = arith.truncf %52 : vector<16x128xf32> to vector<16x128xbf16>
    %c64_i32 = arith.constant 64 : i32
    %54 = tpu.dynamic_rotate %52 by %c64_i32 dim 1 : vector<16x128xf32>, i32 -> vector<16x128xf32>
    %55 = arith.truncf %54 : vector<16x128xf32> to vector<16x128xbf16>
    %56 = tpu.iota {dimensions = array<i32: 1>} : vector<1x128xi32>
    %cst_33 = arith.constant 0.000000e+00 : f32
    %57 = vector.broadcast %cst_33 : f32 to vector<16x128xf32>
    %c0_i32 = arith.constant 0 : i32
    %58 = vector.broadcast %c0_i32 : i32 to vector<1x128xi32>
    %59 = arith.cmpi sge, %56, %58 : vector<1x128xi32>
    %c8_i32 = arith.constant 8 : i32
    %60 = vector.broadcast %c8_i32 : i32 to vector<1x128xi32>
    %61 = arith.cmpi slt, %56, %60 : vector<1x128xi32>
    %62 = arith.andi %59, %61 : vector<1x128xi1>
    %c32_i32 = arith.constant 32 : i32
    %63 = vector.broadcast %c32_i32 : i32 to vector<1x128xi32>
    %64 = arith.cmpi sge, %56, %63 : vector<1x128xi32>
    %c40_i32 = arith.constant 40 : i32
    %65 = vector.broadcast %c40_i32 : i32 to vector<1x128xi32>
    %66 = arith.cmpi slt, %56, %65 : vector<1x128xi32>
    %67 = arith.andi %64, %66 : vector<1x128xi1>
    %cst_34 = arith.constant 0.000000e+00 : bf16
    %68 = vector.broadcast %cst_34 : bf16 to vector<16x128xbf16>
    %69 = vector.shape_cast %62 : vector<1x128xi1> to vector<1x128xi1>
    %70 = vector.broadcast %69 : vector<1x128xi1> to vector<16x128xi1>
    %71 = arith.select %70, %55, %68 : vector<16x128xi1>, vector<16x128xbf16>
    %cst_35 = arith.constant 0.000000e+00 : bf16
    %72 = vector.broadcast %cst_35 : bf16 to vector<16x128xbf16>
    %73 = vector.shape_cast %67 : vector<1x128xi1> to vector<1x128xi1>
    %74 = vector.broadcast %73 : vector<1x128xi1> to vector<16x128xi1>
    %75 = arith.select %74, %53, %72 : vector<16x128xi1>, vector<16x128xbf16>
    %cst_36 = arith.constant dense<0.000000e+00> : vector<16x16xf32>
    %76 = tpu.matmul %53, %71, %cst_36 {dimension_numbers = #tpu.dot_dimension_numbers<[1], [1], [0], [0], [0, 0, 1, 0], [], []>} : vector<16x128xbf16>, vector<16x128xbf16>, vector<16x16xf32> -> vector<16x16xf32>
    %77 = arith.addf %76, %12 : vector<16x16xf32>
    %cst_37 = arith.constant dense<0xFF800000> : vector<16xf32>
    %78 = vector.multi_reduction <maximumf>, %77, %cst_37 [1] : vector<16x16xf32> to vector<16xf32>
    %79 = vector.shape_cast %78 : vector<16xf32> to vector<16x1xf32>
    %80 = vector.broadcast %79 : vector<16x1xf32> to vector<16x16xf32>
    %81 = arith.subf %77, %80 : vector<16x16xf32>
    %82 = math.exp %81 : vector<16x16xf32>
    %cst_38 = arith.constant dense<0.000000e+00> : vector<16xf32>
    %83 = vector.multi_reduction <add>, %82, %cst_38 [1] : vector<16x16xf32> to vector<16xf32>
    %84 = vector.shape_cast %83 : vector<16xf32> to vector<16x1xf32>
    %85 = tpu.reciprocal %84 {approx = true} : vector<16x1xf32> -> vector<16x1xf32>
    %86 = vector.broadcast %85 : vector<16x1xf32> to vector<16x16xf32>
    %87 = arith.mulf %82, %86 : vector<16x16xf32>
    %88 = arith.truncf %87 : vector<16x16xf32> to vector<16x16xbf16>
    %cst_39 = arith.constant dense<0.000000e+00> : vector<16x128xf32>
    %89 = tpu.matmul %88, %75, %cst_39 {dimension_numbers = #tpu.dot_dimension_numbers<[1], [0], [0], [1], [0, 0, 1, 1], [], []>} : vector<16x16xbf16>, vector<16x128xbf16>, vector<16x128xf32> -> vector<16x128xf32>
    %90 = arith.addf %57, %89 : vector<16x128xf32>
    %c8_i32_40 = arith.constant 8 : i32
    %91 = vector.broadcast %c8_i32_40 : i32 to vector<1x128xi32>
    %92 = arith.cmpi sge, %56, %91 : vector<1x128xi32>
    %c16_i32 = arith.constant 16 : i32
    %93 = vector.broadcast %c16_i32 : i32 to vector<1x128xi32>
    %94 = arith.cmpi slt, %56, %93 : vector<1x128xi32>
    %95 = arith.andi %92, %94 : vector<1x128xi1>
    %c40_i32_41 = arith.constant 40 : i32
    %96 = vector.broadcast %c40_i32_41 : i32 to vector<1x128xi32>
    %97 = arith.cmpi sge, %56, %96 : vector<1x128xi32>
    %c48_i32 = arith.constant 48 : i32
    %98 = vector.broadcast %c48_i32 : i32 to vector<1x128xi32>
    %99 = arith.cmpi slt, %56, %98 : vector<1x128xi32>
    %100 = arith.andi %97, %99 : vector<1x128xi1>
    %cst_42 = arith.constant 0.000000e+00 : bf16
    %101 = vector.broadcast %cst_42 : bf16 to vector<16x128xbf16>
    %102 = vector.shape_cast %95 : vector<1x128xi1> to vector<1x128xi1>
    %103 = vector.broadcast %102 : vector<1x128xi1> to vector<16x128xi1>
    %104 = arith.select %103, %55, %101 : vector<16x128xi1>, vector<16x128xbf16>
    %cst_43 = arith.constant 0.000000e+00 : bf16
    %105 = vector.broadcast %cst_43 : bf16 to vector<16x128xbf16>
    %106 = vector.shape_cast %100 : vector<1x128xi1> to vector<1x128xi1>
    %107 = vector.broadcast %106 : vector<1x128xi1> to vector<16x128xi1>
    %108 = arith.select %107, %53, %105 : vector<16x128xi1>, vector<16x128xbf16>
    %cst_44 = arith.constant dense<0.000000e+00> : vector<16x16xf32>
    %109 = tpu.matmul %53, %104, %cst_44 {dimension_numbers = #tpu.dot_dimension_numbers<[1], [1], [0], [0], [0, 0, 1, 0], [], []>} : vector<16x128xbf16>, vector<16x128xbf16>, vector<16x16xf32> -> vector<16x16xf32>
    %110 = arith.addf %109, %12 : vector<16x16xf32>
    %cst_45 = arith.constant dense<0xFF800000> : vector<16xf32>
    %111 = vector.multi_reduction <maximumf>, %110, %cst_45 [1] : vector<16x16xf32> to vector<16xf32>
    %112 = vector.shape_cast %111 : vector<16xf32> to vector<16x1xf32>
    %113 = vector.broadcast %112 : vector<16x1xf32> to vector<16x16xf32>
    %114 = arith.subf %110, %113 : vector<16x16xf32>
    %115 = math.exp %114 : vector<16x16xf32>
    %cst_46 = arith.constant dense<0.000000e+00> : vector<16xf32>
    %116 = vector.multi_reduction <add>, %115, %cst_46 [1] : vector<16x16xf32> to vector<16xf32>
    %117 = vector.shape_cast %116 : vector<16xf32> to vector<16x1xf32>
    %118 = tpu.reciprocal %117 {approx = true} : vector<16x1xf32> -> vector<16x1xf32>
    %119 = vector.broadcast %118 : vector<16x1xf32> to vector<16x16xf32>
    %120 = arith.mulf %115, %119 : vector<16x16xf32>
    %121 = arith.truncf %120 : vector<16x16xf32> to vector<16x16xbf16>
    %cst_47 = arith.constant dense<0.000000e+00> : vector<16x128xf32>
    %122 = tpu.matmul %121, %108, %cst_47 {dimension_numbers = #tpu.dot_dimension_numbers<[1], [0], [0], [1], [0, 0, 1, 1], [], []>} : vector<16x16xbf16>, vector<16x128xbf16>, vector<16x128xf32> -> vector<16x128xf32>
    %123 = arith.addf %90, %122 : vector<16x128xf32>
    %c16_i32_48 = arith.constant 16 : i32
    %124 = vector.broadcast %c16_i32_48 : i32 to vector<1x128xi32>
    %125 = arith.cmpi sge, %56, %124 : vector<1x128xi32>
    %c24_i32 = arith.constant 24 : i32
    %126 = vector.broadcast %c24_i32 : i32 to vector<1x128xi32>
    %127 = arith.cmpi slt, %56, %126 : vector<1x128xi32>
    %128 = arith.andi %125, %127 : vector<1x128xi1>
    %c48_i32_49 = arith.constant 48 : i32
    %129 = vector.broadcast %c48_i32_49 : i32 to vector<1x128xi32>
    %130 = arith.cmpi sge, %56, %129 : vector<1x128xi32>
    %c56_i32 = arith.constant 56 : i32
    %131 = vector.broadcast %c56_i32 : i32 to vector<1x128xi32>
    %132 = arith.cmpi slt, %56, %131 : vector<1x128xi32>
    %133 = arith.andi %130, %132 : vector<1x128xi1>
    %cst_50 = arith.constant 0.000000e+00 : bf16
    %134 = vector.broadcast %cst_50 : bf16 to vector<16x128xbf16>
    %135 = vector.shape_cast %128 : vector<1x128xi1> to vector<1x128xi1>
    %136 = vector.broadcast %135 : vector<1x128xi1> to vector<16x128xi1>
    %137 = arith.select %136, %55, %134 : vector<16x128xi1>, vector<16x128xbf16>
    %cst_51 = arith.constant 0.000000e+00 : bf16
    %138 = vector.broadcast %cst_51 : bf16 to vector<16x128xbf16>
    %139 = vector.shape_cast %133 : vector<1x128xi1> to vector<1x128xi1>
    %140 = vector.broadcast %139 : vector<1x128xi1> to vector<16x128xi1>
    %141 = arith.select %140, %53, %138 : vector<16x128xi1>, vector<16x128xbf16>
    %cst_52 = arith.constant dense<0.000000e+00> : vector<16x16xf32>
    %142 = tpu.matmul %53, %137, %cst_52 {dimension_numbers = #tpu.dot_dimension_numbers<[1], [1], [0], [0], [0, 0, 1, 0], [], []>} : vector<16x128xbf16>, vector<16x128xbf16>, vector<16x16xf32> -> vector<16x16xf32>
    %143 = arith.addf %142, %12 : vector<16x16xf32>
    %cst_53 = arith.constant dense<0xFF800000> : vector<16xf32>
    %144 = vector.multi_reduction <maximumf>, %143, %cst_53 [1] : vector<16x16xf32> to vector<16xf32>
    %145 = vector.shape_cast %144 : vector<16xf32> to vector<16x1xf32>
    %146 = vector.broadcast %145 : vector<16x1xf32> to vector<16x16xf32>
    %147 = arith.subf %143, %146 : vector<16x16xf32>
    %148 = math.exp %147 : vector<16x16xf32>
    %cst_54 = arith.constant dense<0.000000e+00> : vector<16xf32>
    %149 = vector.multi_reduction <add>, %148, %cst_54 [1] : vector<16x16xf32> to vector<16xf32>
    %150 = vector.shape_cast %149 : vector<16xf32> to vector<16x1xf32>
    %151 = tpu.reciprocal %150 {approx = true} : vector<16x1xf32> -> vector<16x1xf32>
    %152 = vector.broadcast %151 : vector<16x1xf32> to vector<16x16xf32>
    %153 = arith.mulf %148, %152 : vector<16x16xf32>
    %154 = arith.truncf %153 : vector<16x16xf32> to vector<16x16xbf16>
    %cst_55 = arith.constant dense<0.000000e+00> : vector<16x128xf32>
    %155 = tpu.matmul %154, %141, %cst_55 {dimension_numbers = #tpu.dot_dimension_numbers<[1], [0], [0], [1], [0, 0, 1, 1], [], []>} : vector<16x16xbf16>, vector<16x128xbf16>, vector<16x128xf32> -> vector<16x128xf32>
    %156 = arith.addf %123, %155 : vector<16x128xf32>
    %c24_i32_56 = arith.constant 24 : i32
    %157 = vector.broadcast %c24_i32_56 : i32 to vector<1x128xi32>
    %158 = arith.cmpi sge, %56, %157 : vector<1x128xi32>
    %c32_i32_57 = arith.constant 32 : i32
    %159 = vector.broadcast %c32_i32_57 : i32 to vector<1x128xi32>
    %160 = arith.cmpi slt, %56, %159 : vector<1x128xi32>
    %161 = arith.andi %158, %160 : vector<1x128xi1>
    %c56_i32_58 = arith.constant 56 : i32
    %162 = vector.broadcast %c56_i32_58 : i32 to vector<1x128xi32>
    %163 = arith.cmpi sge, %56, %162 : vector<1x128xi32>
    %c64_i32_59 = arith.constant 64 : i32
    %164 = vector.broadcast %c64_i32_59 : i32 to vector<1x128xi32>
    %165 = arith.cmpi slt, %56, %164 : vector<1x128xi32>
    %166 = arith.andi %163, %165 : vector<1x128xi1>
    %cst_60 = arith.constant 0.000000e+00 : bf16
    %167 = vector.broadcast %cst_60 : bf16 to vector<16x128xbf16>
    %168 = vector.shape_cast %161 : vector<1x128xi1> to vector<1x128xi1>
    %169 = vector.broadcast %168 : vector<1x128xi1> to vector<16x128xi1>
    %170 = arith.select %169, %55, %167 : vector<16x128xi1>, vector<16x128xbf16>
    %cst_61 = arith.constant 0.000000e+00 : bf16
    %171 = vector.broadcast %cst_61 : bf16 to vector<16x128xbf16>
    %172 = vector.shape_cast %166 : vector<1x128xi1> to vector<1x128xi1>
    %173 = vector.broadcast %172 : vector<1x128xi1> to vector<16x128xi1>
    %174 = arith.select %173, %53, %171 : vector<16x128xi1>, vector<16x128xbf16>
    %cst_62 = arith.constant dense<0.000000e+00> : vector<16x16xf32>
    %175 = tpu.matmul %53, %170, %cst_62 {dimension_numbers = #tpu.dot_dimension_numbers<[1], [1], [0], [0], [0, 0, 1, 0], [], []>} : vector<16x128xbf16>, vector<16x128xbf16>, vector<16x16xf32> -> vector<16x16xf32>
    %176 = arith.addf %175, %12 : vector<16x16xf32>
    %cst_63 = arith.constant dense<0xFF800000> : vector<16xf32>
    %177 = vector.multi_reduction <maximumf>, %176, %cst_63 [1] : vector<16x16xf32> to vector<16xf32>
    %178 = vector.shape_cast %177 : vector<16xf32> to vector<16x1xf32>
    %179 = vector.broadcast %178 : vector<16x1xf32> to vector<16x16xf32>
    %180 = arith.subf %176, %179 : vector<16x16xf32>
    %181 = math.exp %180 : vector<16x16xf32>
    %cst_64 = arith.constant dense<0.000000e+00> : vector<16xf32>
    %182 = vector.multi_reduction <add>, %181, %cst_64 [1] : vector<16x16xf32> to vector<16xf32>
    %183 = vector.shape_cast %182 : vector<16xf32> to vector<16x1xf32>
    %184 = tpu.reciprocal %183 {approx = true} : vector<16x1xf32> -> vector<16x1xf32>
    %185 = vector.broadcast %184 : vector<16x1xf32> to vector<16x16xf32>
    %186 = arith.mulf %181, %185 : vector<16x16xf32>
    %187 = arith.truncf %186 : vector<16x16xf32> to vector<16x16xbf16>
    %cst_65 = arith.constant dense<0.000000e+00> : vector<16x128xf32>
    %188 = tpu.matmul %187, %174, %cst_65 {dimension_numbers = #tpu.dot_dimension_numbers<[1], [0], [0], [1], [0, 0, 1, 1], [], []>} : vector<16x16xbf16>, vector<16x128xbf16>, vector<16x128xf32> -> vector<16x128xf32>
    %189 = arith.addf %156, %188 : vector<16x128xf32>
    %190 = arith.truncf %189 : vector<16x128xf32> to vector<16x128xbf16>
    %cst_66 = arith.constant dense<0.000000e+00> : vector<16x32xf32>
    %191 = tpu.matmul %190, %45, %cst_66 {dimension_numbers = #tpu.dot_dimension_numbers<[1], [0], [0], [1], [0, 0, 1, 1], [], []>} : vector<16x128xbf16>, vector<128x32xbf16>, vector<16x32xf32> -> vector<16x32xf32>
    %192 = vector.broadcast %46 : vector<1x32xf32> to vector<16x32xf32>
    %193 = arith.addf %191, %192 : vector<16x32xf32>
    %194 = arith.addf %42, %193 : vector<16x32xf32>
    %cst_67 = arith.constant dense<0.000000e+00> : vector<16xf32>
    %195 = vector.multi_reduction <add>, %194, %cst_67 [1] : vector<16x32xf32> to vector<16xf32>
    %196 = vector.shape_cast %195 : vector<16xf32> to vector<16x1xf32>
    %cst_68 = arith.constant 3.200000e+01 : f32
    %197 = vector.broadcast %cst_68 : f32 to vector<16x1xf32>
    %198 = arith.divf %196, %197 : vector<16x1xf32>
    %199 = vector.broadcast %198 : vector<16x1xf32> to vector<16x32xf32>
    %200 = arith.subf %194, %199 : vector<16x32xf32>
    %201 = arith.mulf %200, %200 : vector<16x32xf32>
    %cst_69 = arith.constant dense<0.000000e+00> : vector<16xf32>
    %202 = vector.multi_reduction <add>, %201, %cst_69 [1] : vector<16x32xf32> to vector<16xf32>
    %203 = vector.shape_cast %202 : vector<16xf32> to vector<16x1xf32>
    %cst_70 = arith.constant 3.200000e+01 : f32
    %204 = vector.broadcast %cst_70 : f32 to vector<16x1xf32>
    %205 = arith.divf %203, %204 : vector<16x1xf32>
    %cst_71 = arith.constant 9.99999974E-6 : f32
    %206 = vector.broadcast %cst_71 : f32 to vector<16x1xf32>
    %207 = arith.addf %205, %206 : vector<16x1xf32>
    %208 = math.rsqrt %207 : vector<16x1xf32>
    %209 = vector.broadcast %208 : vector<16x1xf32> to vector<16x32xf32>
    %210 = arith.mulf %200, %209 : vector<16x32xf32>
    %211 = vector.broadcast %47 : vector<1x32xf32> to vector<16x32xf32>
    %212 = arith.mulf %210, %211 : vector<16x32xf32>
    %213 = vector.broadcast %48 : vector<1x32xf32> to vector<16x32xf32>
    %214 = arith.addf %212, %213 : vector<16x32xf32>
    %c0_72 = arith.constant 0 : index
    %c0_73 = arith.constant 0 : index
    %215 = vector.load %arg14[%c0_72, %c0_73] : memref<32x64xbf16, #tpu.memory_space<vmem>>, vector<32x64xbf16>
    %c0_74 = arith.constant 0 : index
    %c0_75 = arith.constant 0 : index
    %216 = vector.load %arg15[%c0_74, %c0_75] : memref<1x64xf32, #tpu.memory_space<vmem>>, vector<1x64xf32>
    %c0_76 = arith.constant 0 : index
    %c0_77 = arith.constant 0 : index
    %217 = vector.load %arg16[%c0_76, %c0_77] : memref<64x32xbf16, #tpu.memory_space<vmem>>, vector<64x32xbf16>
    %c0_78 = arith.constant 0 : index
    %c0_79 = arith.constant 0 : index
    %218 = vector.load %arg17[%c0_78, %c0_79] : memref<1x32xf32, #tpu.memory_space<vmem>>, vector<1x32xf32>
    %c0_80 = arith.constant 0 : index
    %c0_81 = arith.constant 0 : index
    %219 = vector.load %arg18[%c0_80, %c0_81] : memref<1x32xf32, #tpu.memory_space<vmem>>, vector<1x32xf32>
    %c0_82 = arith.constant 0 : index
    %c0_83 = arith.constant 0 : index
    %220 = vector.load %arg19[%c0_82, %c0_83] : memref<1x32xf32, #tpu.memory_space<vmem>>, vector<1x32xf32>
    %221 = arith.truncf %214 : vector<16x32xf32> to vector<16x32xbf16>
    %cst_84 = arith.constant dense<0.000000e+00> : vector<16x64xf32>
    %222 = tpu.matmul %221, %215, %cst_84 {dimension_numbers = #tpu.dot_dimension_numbers<[1], [0], [0], [1], [0, 0, 1, 1], [], []>} : vector<16x32xbf16>, vector<32x64xbf16>, vector<16x64xf32> -> vector<16x64xf32>
    %223 = vector.broadcast %216 : vector<1x64xf32> to vector<16x64xf32>
    %224 = arith.addf %222, %223 : vector<16x64xf32>
    %225 = arith.mulf %224, %224 : vector<16x64xf32>
    %226 = arith.mulf %224, %225 : vector<16x64xf32>
    %cst_85 = arith.constant 4.471500e-02 : f32
    %227 = vector.broadcast %cst_85 : f32 to vector<16x64xf32>
    %228 = arith.mulf %227, %226 : vector<16x64xf32>
    %229 = arith.addf %224, %228 : vector<16x64xf32>
    %cst_86 = arith.constant 0.797884583 : f32
    %230 = vector.broadcast %cst_86 : f32 to vector<16x64xf32>
    %231 = arith.mulf %230, %229 : vector<16x64xf32>
    %232 = math.tanh %231 : vector<16x64xf32>
    %cst_87 = arith.constant 1.000000e+00 : f32
    %233 = vector.broadcast %cst_87 : f32 to vector<16x64xf32>
    %234 = arith.addf %233, %232 : vector<16x64xf32>
    %cst_88 = arith.constant 5.000000e-01 : f32
    %235 = vector.broadcast %cst_88 : f32 to vector<16x64xf32>
    %236 = arith.mulf %235, %234 : vector<16x64xf32>
    %237 = arith.mulf %224, %236 : vector<16x64xf32>
    %238 = arith.truncf %237 : vector<16x64xf32> to vector<16x64xbf16>
    %cst_89 = arith.constant dense<0.000000e+00> : vector<16x32xf32>
    %239 = tpu.matmul %238, %217, %cst_89 {dimension_numbers = #tpu.dot_dimension_numbers<[1], [0], [0], [1], [0, 0, 1, 1], [], []>} : vector<16x64xbf16>, vector<64x32xbf16>, vector<16x32xf32> -> vector<16x32xf32>
    %240 = vector.broadcast %218 : vector<1x32xf32> to vector<16x32xf32>
    %241 = arith.addf %239, %240 : vector<16x32xf32>
    %242 = arith.addf %214, %241 : vector<16x32xf32>
    %cst_90 = arith.constant dense<0.000000e+00> : vector<16xf32>
    %243 = vector.multi_reduction <add>, %242, %cst_90 [1] : vector<16x32xf32> to vector<16xf32>
    %244 = vector.shape_cast %243 : vector<16xf32> to vector<16x1xf32>
    %cst_91 = arith.constant 3.200000e+01 : f32
    %245 = vector.broadcast %cst_91 : f32 to vector<16x1xf32>
    %246 = arith.divf %244, %245 : vector<16x1xf32>
    %247 = vector.broadcast %246 : vector<16x1xf32> to vector<16x32xf32>
    %248 = arith.subf %242, %247 : vector<16x32xf32>
    %249 = arith.mulf %248, %248 : vector<16x32xf32>
    %cst_92 = arith.constant dense<0.000000e+00> : vector<16xf32>
    %250 = vector.multi_reduction <add>, %249, %cst_92 [1] : vector<16x32xf32> to vector<16xf32>
    %251 = vector.shape_cast %250 : vector<16xf32> to vector<16x1xf32>
    %cst_93 = arith.constant 3.200000e+01 : f32
    %252 = vector.broadcast %cst_93 : f32 to vector<16x1xf32>
    %253 = arith.divf %251, %252 : vector<16x1xf32>
    %cst_94 = arith.constant 9.99999974E-6 : f32
    %254 = vector.broadcast %cst_94 : f32 to vector<16x1xf32>
    %255 = arith.addf %253, %254 : vector<16x1xf32>
    %256 = math.rsqrt %255 : vector<16x1xf32>
    %257 = vector.broadcast %256 : vector<16x1xf32> to vector<16x32xf32>
    %258 = arith.mulf %248, %257 : vector<16x32xf32>
    %259 = vector.broadcast %219 : vector<1x32xf32> to vector<16x32xf32>
    %260 = arith.mulf %258, %259 : vector<16x32xf32>
    %261 = vector.broadcast %220 : vector<1x32xf32> to vector<16x32xf32>
    %262 = arith.addf %260, %261 : vector<16x32xf32>
    %c0_95 = arith.constant 0 : index
    %c0_96 = arith.constant 0 : index
    %263 = vector.load %arg1[%c0_95, %c0_96] : memref<16x32xf32, #tpu.memory_space<vmem>>, vector<16x32xf32>
    %c0_97 = arith.constant 0 : index
    %c0_98 = arith.constant 0 : index
    %264 = vector.load %arg20[%c0_97, %c0_98] : memref<1x32xf32, #tpu.memory_space<vmem>>, vector<1x32xf32>
    %c0_99 = arith.constant 0 : index
    %c0_100 = arith.constant 0 : index
    %265 = vector.load %arg21[%c0_99, %c0_100] : memref<1x32xf32, #tpu.memory_space<vmem>>, vector<1x32xf32>
    %cst_101 = arith.constant dense<0.000000e+00> : vector<16xf32>
    %266 = vector.multi_reduction <add>, %263, %cst_101 [1] : vector<16x32xf32> to vector<16xf32>
    %267 = vector.shape_cast %266 : vector<16xf32> to vector<16x1xf32>
    %cst_102 = arith.constant 3.200000e+01 : f32
    %268 = vector.broadcast %cst_102 : f32 to vector<16x1xf32>
    %269 = arith.divf %267, %268 : vector<16x1xf32>
    %270 = vector.broadcast %269 : vector<16x1xf32> to vector<16x32xf32>
    %271 = arith.subf %263, %270 : vector<16x32xf32>
    %272 = arith.mulf %271, %271 : vector<16x32xf32>
    %cst_103 = arith.constant dense<0.000000e+00> : vector<16xf32>
    %273 = vector.multi_reduction <add>, %272, %cst_103 [1] : vector<16x32xf32> to vector<16xf32>
    %274 = vector.shape_cast %273 : vector<16xf32> to vector<16x1xf32>
    %cst_104 = arith.constant 3.200000e+01 : f32
    %275 = vector.broadcast %cst_104 : f32 to vector<16x1xf32>
    %276 = arith.divf %274, %275 : vector<16x1xf32>
    %cst_105 = arith.constant 9.99999974E-6 : f32
    %277 = vector.broadcast %cst_105 : f32 to vector<16x1xf32>
    %278 = arith.addf %276, %277 : vector<16x1xf32>
    %279 = math.rsqrt %278 : vector<16x1xf32>
    %280 = vector.broadcast %279 : vector<16x1xf32> to vector<16x32xf32>
    %281 = arith.mulf %271, %280 : vector<16x32xf32>
    %282 = vector.broadcast %264 : vector<1x32xf32> to vector<16x32xf32>
    %283 = arith.mulf %281, %282 : vector<16x32xf32>
    %284 = vector.broadcast %265 : vector<1x32xf32> to vector<16x32xf32>
    %285 = arith.addf %283, %284 : vector<16x32xf32>
    %c0_106 = arith.constant 0 : index
    %c0_107 = arith.constant 0 : index
    %286 = vector.load %arg22[%c0_106, %c0_107] : memref<32x128xbf16, #tpu.memory_space<vmem>>, vector<32x128xbf16>
    %c0_108 = arith.constant 0 : index
    %c0_109 = arith.constant 0 : index
    %287 = vector.load %arg23[%c0_108, %c0_109] : memref<1x128xf32, #tpu.memory_space<vmem>>, vector<1x128xf32>
    %c0_110 = arith.constant 0 : index
    %c0_111 = arith.constant 0 : index
    %288 = vector.load %arg24[%c0_110, %c0_111] : memref<128x32xbf16, #tpu.memory_space<vmem>>, vector<128x32xbf16>
    %c0_112 = arith.constant 0 : index
    %c0_113 = arith.constant 0 : index
    %289 = vector.load %arg25[%c0_112, %c0_113] : memref<1x32xf32, #tpu.memory_space<vmem>>, vector<1x32xf32>
    %c0_114 = arith.constant 0 : index
    %c0_115 = arith.constant 0 : index
    %290 = vector.load %arg26[%c0_114, %c0_115] : memref<1x32xf32, #tpu.memory_space<vmem>>, vector<1x32xf32>
    %c0_116 = arith.constant 0 : index
    %c0_117 = arith.constant 0 : index
    %291 = vector.load %arg27[%c0_116, %c0_117] : memref<1x32xf32, #tpu.memory_space<vmem>>, vector<1x32xf32>
    %292 = arith.truncf %285 : vector<16x32xf32> to vector<16x32xbf16>
    %cst_118 = arith.constant dense<0.000000e+00> : vector<16x128xf32>
    %293 = tpu.matmul %292, %286, %cst_118 {dimension_numbers = #tpu.dot_dimension_numbers<[1], [0], [0], [1], [0, 0, 1, 1], [], []>} : vector<16x32xbf16>, vector<32x128xbf16>, vector<16x128xf32> -> vector<16x128xf32>
    %294 = vector.broadcast %287 : vector<1x128xf32> to vector<16x128xf32>
    %295 = arith.addf %293, %294 : vector<16x128xf32>
    %296 = arith.truncf %295 : vector<16x128xf32> to vector<16x128xbf16>
    %c64_i32_119 = arith.constant 64 : i32
    %297 = tpu.dynamic_rotate %295 by %c64_i32_119 dim 1 : vector<16x128xf32>, i32 -> vector<16x128xf32>
    %298 = arith.truncf %297 : vector<16x128xf32> to vector<16x128xbf16>
    %299 = tpu.iota {dimensions = array<i32: 1>} : vector<1x128xi32>
    %cst_120 = arith.constant 0.000000e+00 : f32
    %300 = vector.broadcast %cst_120 : f32 to vector<16x128xf32>
    %c0_i32_121 = arith.constant 0 : i32
    %301 = vector.broadcast %c0_i32_121 : i32 to vector<1x128xi32>
    %302 = arith.cmpi sge, %299, %301 : vector<1x128xi32>
    %c8_i32_122 = arith.constant 8 : i32
    %303 = vector.broadcast %c8_i32_122 : i32 to vector<1x128xi32>
    %304 = arith.cmpi slt, %299, %303 : vector<1x128xi32>
    %305 = arith.andi %302, %304 : vector<1x128xi1>
    %c32_i32_123 = arith.constant 32 : i32
    %306 = vector.broadcast %c32_i32_123 : i32 to vector<1x128xi32>
    %307 = arith.cmpi sge, %299, %306 : vector<1x128xi32>
    %c40_i32_124 = arith.constant 40 : i32
    %308 = vector.broadcast %c40_i32_124 : i32 to vector<1x128xi32>
    %309 = arith.cmpi slt, %299, %308 : vector<1x128xi32>
    %310 = arith.andi %307, %309 : vector<1x128xi1>
    %cst_125 = arith.constant 0.000000e+00 : bf16
    %311 = vector.broadcast %cst_125 : bf16 to vector<16x128xbf16>
    %312 = vector.shape_cast %305 : vector<1x128xi1> to vector<1x128xi1>
    %313 = vector.broadcast %312 : vector<1x128xi1> to vector<16x128xi1>
    %314 = arith.select %313, %298, %311 : vector<16x128xi1>, vector<16x128xbf16>
    %cst_126 = arith.constant 0.000000e+00 : bf16
    %315 = vector.broadcast %cst_126 : bf16 to vector<16x128xbf16>
    %316 = vector.shape_cast %310 : vector<1x128xi1> to vector<1x128xi1>
    %317 = vector.broadcast %316 : vector<1x128xi1> to vector<16x128xi1>
    %318 = arith.select %317, %296, %315 : vector<16x128xi1>, vector<16x128xbf16>
    %cst_127 = arith.constant dense<0.000000e+00> : vector<16x16xf32>
    %319 = tpu.matmul %296, %314, %cst_127 {dimension_numbers = #tpu.dot_dimension_numbers<[1], [1], [0], [0], [0, 0, 1, 0], [], []>} : vector<16x128xbf16>, vector<16x128xbf16>, vector<16x16xf32> -> vector<16x16xf32>
    %320 = arith.addf %319, %19 : vector<16x16xf32>
    %cst_128 = arith.constant dense<0xFF800000> : vector<16xf32>
    %321 = vector.multi_reduction <maximumf>, %320, %cst_128 [1] : vector<16x16xf32> to vector<16xf32>
    %322 = vector.shape_cast %321 : vector<16xf32> to vector<16x1xf32>
    %323 = vector.broadcast %322 : vector<16x1xf32> to vector<16x16xf32>
    %324 = arith.subf %320, %323 : vector<16x16xf32>
    %325 = math.exp %324 : vector<16x16xf32>
    %cst_129 = arith.constant dense<0.000000e+00> : vector<16xf32>
    %326 = vector.multi_reduction <add>, %325, %cst_129 [1] : vector<16x16xf32> to vector<16xf32>
    %327 = vector.shape_cast %326 : vector<16xf32> to vector<16x1xf32>
    %328 = tpu.reciprocal %327 {approx = true} : vector<16x1xf32> -> vector<16x1xf32>
    %329 = vector.broadcast %328 : vector<16x1xf32> to vector<16x16xf32>
    %330 = arith.mulf %325, %329 : vector<16x16xf32>
    %331 = arith.truncf %330 : vector<16x16xf32> to vector<16x16xbf16>
    %cst_130 = arith.constant dense<0.000000e+00> : vector<16x128xf32>
    %332 = tpu.matmul %331, %318, %cst_130 {dimension_numbers = #tpu.dot_dimension_numbers<[1], [0], [0], [1], [0, 0, 1, 1], [], []>} : vector<16x16xbf16>, vector<16x128xbf16>, vector<16x128xf32> -> vector<16x128xf32>
    %333 = arith.addf %300, %332 : vector<16x128xf32>
    %c8_i32_131 = arith.constant 8 : i32
    %334 = vector.broadcast %c8_i32_131 : i32 to vector<1x128xi32>
    %335 = arith.cmpi sge, %299, %334 : vector<1x128xi32>
    %c16_i32_132 = arith.constant 16 : i32
    %336 = vector.broadcast %c16_i32_132 : i32 to vector<1x128xi32>
    %337 = arith.cmpi slt, %299, %336 : vector<1x128xi32>
    %338 = arith.andi %335, %337 : vector<1x128xi1>
    %c40_i32_133 = arith.constant 40 : i32
    %339 = vector.broadcast %c40_i32_133 : i32 to vector<1x128xi32>
    %340 = arith.cmpi sge, %299, %339 : vector<1x128xi32>
    %c48_i32_134 = arith.constant 48 : i32
    %341 = vector.broadcast %c48_i32_134 : i32 to vector<1x128xi32>
    %342 = arith.cmpi slt, %299, %341 : vector<1x128xi32>
    %343 = arith.andi %340, %342 : vector<1x128xi1>
    %cst_135 = arith.constant 0.000000e+00 : bf16
    %344 = vector.broadcast %cst_135 : bf16 to vector<16x128xbf16>
    %345 = vector.shape_cast %338 : vector<1x128xi1> to vector<1x128xi1>
    %346 = vector.broadcast %345 : vector<1x128xi1> to vector<16x128xi1>
    %347 = arith.select %346, %298, %344 : vector<16x128xi1>, vector<16x128xbf16>
    %cst_136 = arith.constant 0.000000e+00 : bf16
    %348 = vector.broadcast %cst_136 : bf16 to vector<16x128xbf16>
    %349 = vector.shape_cast %343 : vector<1x128xi1> to vector<1x128xi1>
    %350 = vector.broadcast %349 : vector<1x128xi1> to vector<16x128xi1>
    %351 = arith.select %350, %296, %348 : vector<16x128xi1>, vector<16x128xbf16>
    %cst_137 = arith.constant dense<0.000000e+00> : vector<16x16xf32>
    %352 = tpu.matmul %296, %347, %cst_137 {dimension_numbers = #tpu.dot_dimension_numbers<[1], [1], [0], [0], [0, 0, 1, 0], [], []>} : vector<16x128xbf16>, vector<16x128xbf16>, vector<16x16xf32> -> vector<16x16xf32>
    %353 = arith.addf %352, %19 : vector<16x16xf32>
    %cst_138 = arith.constant dense<0xFF800000> : vector<16xf32>
    %354 = vector.multi_reduction <maximumf>, %353, %cst_138 [1] : vector<16x16xf32> to vector<16xf32>
    %355 = vector.shape_cast %354 : vector<16xf32> to vector<16x1xf32>
    %356 = vector.broadcast %355 : vector<16x1xf32> to vector<16x16xf32>
    %357 = arith.subf %353, %356 : vector<16x16xf32>
    %358 = math.exp %357 : vector<16x16xf32>
    %cst_139 = arith.constant dense<0.000000e+00> : vector<16xf32>
    %359 = vector.multi_reduction <add>, %358, %cst_139 [1] : vector<16x16xf32> to vector<16xf32>
    %360 = vector.shape_cast %359 : vector<16xf32> to vector<16x1xf32>
    %361 = tpu.reciprocal %360 {approx = true} : vector<16x1xf32> -> vector<16x1xf32>
    %362 = vector.broadcast %361 : vector<16x1xf32> to vector<16x16xf32>
    %363 = arith.mulf %358, %362 : vector<16x16xf32>
    %364 = arith.truncf %363 : vector<16x16xf32> to vector<16x16xbf16>
    %cst_140 = arith.constant dense<0.000000e+00> : vector<16x128xf32>
    %365 = tpu.matmul %364, %351, %cst_140 {dimension_numbers = #tpu.dot_dimension_numbers<[1], [0], [0], [1], [0, 0, 1, 1], [], []>} : vector<16x16xbf16>, vector<16x128xbf16>, vector<16x128xf32> -> vector<16x128xf32>
    %366 = arith.addf %333, %365 : vector<16x128xf32>
    %c16_i32_141 = arith.constant 16 : i32
    %367 = vector.broadcast %c16_i32_141 : i32 to vector<1x128xi32>
    %368 = arith.cmpi sge, %299, %367 : vector<1x128xi32>
    %c24_i32_142 = arith.constant 24 : i32
    %369 = vector.broadcast %c24_i32_142 : i32 to vector<1x128xi32>
    %370 = arith.cmpi slt, %299, %369 : vector<1x128xi32>
    %371 = arith.andi %368, %370 : vector<1x128xi1>
    %c48_i32_143 = arith.constant 48 : i32
    %372 = vector.broadcast %c48_i32_143 : i32 to vector<1x128xi32>
    %373 = arith.cmpi sge, %299, %372 : vector<1x128xi32>
    %c56_i32_144 = arith.constant 56 : i32
    %374 = vector.broadcast %c56_i32_144 : i32 to vector<1x128xi32>
    %375 = arith.cmpi slt, %299, %374 : vector<1x128xi32>
    %376 = arith.andi %373, %375 : vector<1x128xi1>
    %cst_145 = arith.constant 0.000000e+00 : bf16
    %377 = vector.broadcast %cst_145 : bf16 to vector<16x128xbf16>
    %378 = vector.shape_cast %371 : vector<1x128xi1> to vector<1x128xi1>
    %379 = vector.broadcast %378 : vector<1x128xi1> to vector<16x128xi1>
    %380 = arith.select %379, %298, %377 : vector<16x128xi1>, vector<16x128xbf16>
    %cst_146 = arith.constant 0.000000e+00 : bf16
    %381 = vector.broadcast %cst_146 : bf16 to vector<16x128xbf16>
    %382 = vector.shape_cast %376 : vector<1x128xi1> to vector<1x128xi1>
    %383 = vector.broadcast %382 : vector<1x128xi1> to vector<16x128xi1>
    %384 = arith.select %383, %296, %381 : vector<16x128xi1>, vector<16x128xbf16>
    %cst_147 = arith.constant dense<0.000000e+00> : vector<16x16xf32>
    %385 = tpu.matmul %296, %380, %cst_147 {dimension_numbers = #tpu.dot_dimension_numbers<[1], [1], [0], [0], [0, 0, 1, 0], [], []>} : vector<16x128xbf16>, vector<16x128xbf16>, vector<16x16xf32> -> vector<16x16xf32>
    %386 = arith.addf %385, %19 : vector<16x16xf32>
    %cst_148 = arith.constant dense<0xFF800000> : vector<16xf32>
    %387 = vector.multi_reduction <maximumf>, %386, %cst_148 [1] : vector<16x16xf32> to vector<16xf32>
    %388 = vector.shape_cast %387 : vector<16xf32> to vector<16x1xf32>
    %389 = vector.broadcast %388 : vector<16x1xf32> to vector<16x16xf32>
    %390 = arith.subf %386, %389 : vector<16x16xf32>
    %391 = math.exp %390 : vector<16x16xf32>
    %cst_149 = arith.constant dense<0.000000e+00> : vector<16xf32>
    %392 = vector.multi_reduction <add>, %391, %cst_149 [1] : vector<16x16xf32> to vector<16xf32>
    %393 = vector.shape_cast %392 : vector<16xf32> to vector<16x1xf32>
    %394 = tpu.reciprocal %393 {approx = true} : vector<16x1xf32> -> vector<16x1xf32>
    %395 = vector.broadcast %394 : vector<16x1xf32> to vector<16x16xf32>
    %396 = arith.mulf %391, %395 : vector<16x16xf32>
    %397 = arith.truncf %396 : vector<16x16xf32> to vector<16x16xbf16>
    %cst_150 = arith.constant dense<0.000000e+00> : vector<16x128xf32>
    %398 = tpu.matmul %397, %384, %cst_150 {dimension_numbers = #tpu.dot_dimension_numbers<[1], [0], [0], [1], [0, 0, 1, 1], [], []>} : vector<16x16xbf16>, vector<16x128xbf16>, vector<16x128xf32> -> vector<16x128xf32>
    %399 = arith.addf %366, %398 : vector<16x128xf32>
    %c24_i32_151 = arith.constant 24 : i32
    %400 = vector.broadcast %c24_i32_151 : i32 to vector<1x128xi32>
    %401 = arith.cmpi sge, %299, %400 : vector<1x128xi32>
    %c32_i32_152 = arith.constant 32 : i32
    %402 = vector.broadcast %c32_i32_152 : i32 to vector<1x128xi32>
    %403 = arith.cmpi slt, %299, %402 : vector<1x128xi32>
    %404 = arith.andi %401, %403 : vector<1x128xi1>
    %c56_i32_153 = arith.constant 56 : i32
    %405 = vector.broadcast %c56_i32_153 : i32 to vector<1x128xi32>
    %406 = arith.cmpi sge, %299, %405 : vector<1x128xi32>
    %c64_i32_154 = arith.constant 64 : i32
    %407 = vector.broadcast %c64_i32_154 : i32 to vector<1x128xi32>
    %408 = arith.cmpi slt, %299, %407 : vector<1x128xi32>
    %409 = arith.andi %406, %408 : vector<1x128xi1>
    %cst_155 = arith.constant 0.000000e+00 : bf16
    %410 = vector.broadcast %cst_155 : bf16 to vector<16x128xbf16>
    %411 = vector.shape_cast %404 : vector<1x128xi1> to vector<1x128xi1>
    %412 = vector.broadcast %411 : vector<1x128xi1> to vector<16x128xi1>
    %413 = arith.select %412, %298, %410 : vector<16x128xi1>, vector<16x128xbf16>
    %cst_156 = arith.constant 0.000000e+00 : bf16
    %414 = vector.broadcast %cst_156 : bf16 to vector<16x128xbf16>
    %415 = vector.shape_cast %409 : vector<1x128xi1> to vector<1x128xi1>
    %416 = vector.broadcast %415 : vector<1x128xi1> to vector<16x128xi1>
    %417 = arith.select %416, %296, %414 : vector<16x128xi1>, vector<16x128xbf16>
    %cst_157 = arith.constant dense<0.000000e+00> : vector<16x16xf32>
    %418 = tpu.matmul %296, %413, %cst_157 {dimension_numbers = #tpu.dot_dimension_numbers<[1], [1], [0], [0], [0, 0, 1, 0], [], []>} : vector<16x128xbf16>, vector<16x128xbf16>, vector<16x16xf32> -> vector<16x16xf32>
    %419 = arith.addf %418, %19 : vector<16x16xf32>
    %cst_158 = arith.constant dense<0xFF800000> : vector<16xf32>
    %420 = vector.multi_reduction <maximumf>, %419, %cst_158 [1] : vector<16x16xf32> to vector<16xf32>
    %421 = vector.shape_cast %420 : vector<16xf32> to vector<16x1xf32>
    %422 = vector.broadcast %421 : vector<16x1xf32> to vector<16x16xf32>
    %423 = arith.subf %419, %422 : vector<16x16xf32>
    %424 = math.exp %423 : vector<16x16xf32>
    %cst_159 = arith.constant dense<0.000000e+00> : vector<16xf32>
    %425 = vector.multi_reduction <add>, %424, %cst_159 [1] : vector<16x16xf32> to vector<16xf32>
    %426 = vector.shape_cast %425 : vector<16xf32> to vector<16x1xf32>
    %427 = tpu.reciprocal %426 {approx = true} : vector<16x1xf32> -> vector<16x1xf32>
    %428 = vector.broadcast %427 : vector<16x1xf32> to vector<16x16xf32>
    %429 = arith.mulf %424, %428 : vector<16x16xf32>
    %430 = arith.truncf %429 : vector<16x16xf32> to vector<16x16xbf16>
    %cst_160 = arith.constant dense<0.000000e+00> : vector<16x128xf32>
    %431 = tpu.matmul %430, %417, %cst_160 {dimension_numbers = #tpu.dot_dimension_numbers<[1], [0], [0], [1], [0, 0, 1, 1], [], []>} : vector<16x16xbf16>, vector<16x128xbf16>, vector<16x128xf32> -> vector<16x128xf32>
    %432 = arith.addf %399, %431 : vector<16x128xf32>
    %433 = arith.truncf %432 : vector<16x128xf32> to vector<16x128xbf16>
    %cst_161 = arith.constant dense<0.000000e+00> : vector<16x32xf32>
    %434 = tpu.matmul %433, %288, %cst_161 {dimension_numbers = #tpu.dot_dimension_numbers<[1], [0], [0], [1], [0, 0, 1, 1], [], []>} : vector<16x128xbf16>, vector<128x32xbf16>, vector<16x32xf32> -> vector<16x32xf32>
    %435 = vector.broadcast %289 : vector<1x32xf32> to vector<16x32xf32>
    %436 = arith.addf %434, %435 : vector<16x32xf32>
    %437 = arith.addf %285, %436 : vector<16x32xf32>
    %cst_162 = arith.constant dense<0.000000e+00> : vector<16xf32>
    %438 = vector.multi_reduction <add>, %437, %cst_162 [1] : vector<16x32xf32> to vector<16xf32>
    %439 = vector.shape_cast %438 : vector<16xf32> to vector<16x1xf32>
    %cst_163 = arith.constant 3.200000e+01 : f32
    %440 = vector.broadcast %cst_163 : f32 to vector<16x1xf32>
    %441 = arith.divf %439, %440 : vector<16x1xf32>
    %442 = vector.broadcast %441 : vector<16x1xf32> to vector<16x32xf32>
    %443 = arith.subf %437, %442 : vector<16x32xf32>
    %444 = arith.mulf %443, %443 : vector<16x32xf32>
    %cst_164 = arith.constant dense<0.000000e+00> : vector<16xf32>
    %445 = vector.multi_reduction <add>, %444, %cst_164 [1] : vector<16x32xf32> to vector<16xf32>
    %446 = vector.shape_cast %445 : vector<16xf32> to vector<16x1xf32>
    %cst_165 = arith.constant 3.200000e+01 : f32
    %447 = vector.broadcast %cst_165 : f32 to vector<16x1xf32>
    %448 = arith.divf %446, %447 : vector<16x1xf32>
    %cst_166 = arith.constant 9.99999974E-6 : f32
    %449 = vector.broadcast %cst_166 : f32 to vector<16x1xf32>
    %450 = arith.addf %448, %449 : vector<16x1xf32>
    %451 = math.rsqrt %450 : vector<16x1xf32>
    %452 = vector.broadcast %451 : vector<16x1xf32> to vector<16x32xf32>
    %453 = arith.mulf %443, %452 : vector<16x32xf32>
    %454 = vector.broadcast %290 : vector<1x32xf32> to vector<16x32xf32>
    %455 = arith.mulf %453, %454 : vector<16x32xf32>
    %456 = vector.broadcast %291 : vector<1x32xf32> to vector<16x32xf32>
    %457 = arith.addf %455, %456 : vector<16x32xf32>
    %c0_167 = arith.constant 0 : index
    %c0_168 = arith.constant 0 : index
    %458 = vector.load %arg28[%c0_167, %c0_168] : memref<32x128xbf16, #tpu.memory_space<vmem>>, vector<32x128xbf16>
    %c0_169 = arith.constant 0 : index
    %c0_170 = arith.constant 0 : index
    %459 = vector.load %arg29[%c0_169, %c0_170] : memref<1x128xf32, #tpu.memory_space<vmem>>, vector<1x128xf32>
    %c0_171 = arith.constant 0 : index
    %c0_172 = arith.constant 0 : index
    %460 = vector.load %arg30[%c0_171, %c0_172] : memref<32x128xbf16, #tpu.memory_space<vmem>>, vector<32x128xbf16>
    %c0_173 = arith.constant 0 : index
    %c0_174 = arith.constant 0 : index
    %461 = vector.load %arg31[%c0_173, %c0_174] : memref<1x128xf32, #tpu.memory_space<vmem>>, vector<1x128xf32>
    %c0_175 = arith.constant 0 : index
    %c0_176 = arith.constant 0 : index
    %462 = vector.load %arg32[%c0_175, %c0_176] : memref<128x32xbf16, #tpu.memory_space<vmem>>, vector<128x32xbf16>
    %c0_177 = arith.constant 0 : index
    %c0_178 = arith.constant 0 : index
    %463 = vector.load %arg33[%c0_177, %c0_178] : memref<1x32xf32, #tpu.memory_space<vmem>>, vector<1x32xf32>
    %c0_179 = arith.constant 0 : index
    %c0_180 = arith.constant 0 : index
    %464 = vector.load %arg34[%c0_179, %c0_180] : memref<1x32xf32, #tpu.memory_space<vmem>>, vector<1x32xf32>
    %c0_181 = arith.constant 0 : index
    %c0_182 = arith.constant 0 : index
    %465 = vector.load %arg35[%c0_181, %c0_182] : memref<1x32xf32, #tpu.memory_space<vmem>>, vector<1x32xf32>
    %466 = arith.truncf %457 : vector<16x32xf32> to vector<16x32xbf16>
    %cst_183 = arith.constant dense<0.000000e+00> : vector<16x128xf32>
    %467 = tpu.matmul %466, %458, %cst_183 {dimension_numbers = #tpu.dot_dimension_numbers<[1], [0], [0], [1], [0, 0, 1, 1], [], []>} : vector<16x32xbf16>, vector<32x128xbf16>, vector<16x128xf32> -> vector<16x128xf32>
    %468 = vector.broadcast %459 : vector<1x128xf32> to vector<16x128xf32>
    %469 = arith.addf %467, %468 : vector<16x128xf32>
    %470 = arith.truncf %262 : vector<16x32xf32> to vector<16x32xbf16>
    %cst_184 = arith.constant dense<0.000000e+00> : vector<16x128xf32>
    %471 = tpu.matmul %470, %460, %cst_184 {dimension_numbers = #tpu.dot_dimension_numbers<[1], [0], [0], [1], [0, 0, 1, 1], [], []>} : vector<16x32xbf16>, vector<32x128xbf16>, vector<16x128xf32> -> vector<16x128xf32>
    %472 = vector.broadcast %461 : vector<1x128xf32> to vector<16x128xf32>
    %473 = arith.addf %471, %472 : vector<16x128xf32>
    %474 = arith.truncf %473 : vector<16x128xf32> to vector<16x128xbf16>
    %475 = arith.truncf %469 : vector<16x128xf32> to vector<16x128xbf16>
    %c64_i32_185 = arith.constant 64 : i32
    %476 = tpu.dynamic_rotate %473 by %c64_i32_185 dim 1 : vector<16x128xf32>, i32 -> vector<16x128xf32>
    %477 = arith.truncf %476 : vector<16x128xf32> to vector<16x128xbf16>
    %478 = tpu.iota {dimensions = array<i32: 1>} : vector<1x128xi32>
    %cst_186 = arith.constant 0.000000e+00 : f32
    %479 = vector.broadcast %cst_186 : f32 to vector<16x128xf32>
    %c0_i32_187 = arith.constant 0 : i32
    %480 = vector.broadcast %c0_i32_187 : i32 to vector<1x128xi32>
    %481 = arith.cmpi sge, %478, %480 : vector<1x128xi32>
    %c8_i32_188 = arith.constant 8 : i32
    %482 = vector.broadcast %c8_i32_188 : i32 to vector<1x128xi32>
    %483 = arith.cmpi slt, %478, %482 : vector<1x128xi32>
    %484 = arith.andi %481, %483 : vector<1x128xi1>
    %c32_i32_189 = arith.constant 32 : i32
    %485 = vector.broadcast %c32_i32_189 : i32 to vector<1x128xi32>
    %486 = arith.cmpi sge, %478, %485 : vector<1x128xi32>
    %c40_i32_190 = arith.constant 40 : i32
    %487 = vector.broadcast %c40_i32_190 : i32 to vector<1x128xi32>
    %488 = arith.cmpi slt, %478, %487 : vector<1x128xi32>
    %489 = arith.andi %486, %488 : vector<1x128xi1>
    %cst_191 = arith.constant 0.000000e+00 : bf16
    %490 = vector.broadcast %cst_191 : bf16 to vector<16x128xbf16>
    %491 = vector.shape_cast %484 : vector<1x128xi1> to vector<1x128xi1>
    %492 = vector.broadcast %491 : vector<1x128xi1> to vector<16x128xi1>
    %493 = arith.select %492, %477, %490 : vector<16x128xi1>, vector<16x128xbf16>
    %cst_192 = arith.constant 0.000000e+00 : bf16
    %494 = vector.broadcast %cst_192 : bf16 to vector<16x128xbf16>
    %495 = vector.shape_cast %489 : vector<1x128xi1> to vector<1x128xi1>
    %496 = vector.broadcast %495 : vector<1x128xi1> to vector<16x128xi1>
    %497 = arith.select %496, %474, %494 : vector<16x128xi1>, vector<16x128xbf16>
    %cst_193 = arith.constant dense<0.000000e+00> : vector<16x16xf32>
    %498 = tpu.matmul %475, %493, %cst_193 {dimension_numbers = #tpu.dot_dimension_numbers<[1], [1], [0], [0], [0, 0, 1, 0], [], []>} : vector<16x128xbf16>, vector<16x128xbf16>, vector<16x16xf32> -> vector<16x16xf32>
    %499 = arith.addf %498, %12 : vector<16x16xf32>
    %cst_194 = arith.constant dense<0xFF800000> : vector<16xf32>
    %500 = vector.multi_reduction <maximumf>, %499, %cst_194 [1] : vector<16x16xf32> to vector<16xf32>
    %501 = vector.shape_cast %500 : vector<16xf32> to vector<16x1xf32>
    %502 = vector.broadcast %501 : vector<16x1xf32> to vector<16x16xf32>
    %503 = arith.subf %499, %502 : vector<16x16xf32>
    %504 = math.exp %503 : vector<16x16xf32>
    %cst_195 = arith.constant dense<0.000000e+00> : vector<16xf32>
    %505 = vector.multi_reduction <add>, %504, %cst_195 [1] : vector<16x16xf32> to vector<16xf32>
    %506 = vector.shape_cast %505 : vector<16xf32> to vector<16x1xf32>
    %507 = tpu.reciprocal %506 {approx = true} : vector<16x1xf32> -> vector<16x1xf32>
    %508 = vector.broadcast %507 : vector<16x1xf32> to vector<16x16xf32>
    %509 = arith.mulf %504, %508 : vector<16x16xf32>
    %510 = arith.truncf %509 : vector<16x16xf32> to vector<16x16xbf16>
    %cst_196 = arith.constant dense<0.000000e+00> : vector<16x128xf32>
    %511 = tpu.matmul %510, %497, %cst_196 {dimension_numbers = #tpu.dot_dimension_numbers<[1], [0], [0], [1], [0, 0, 1, 1], [], []>} : vector<16x16xbf16>, vector<16x128xbf16>, vector<16x128xf32> -> vector<16x128xf32>
    %512 = arith.addf %479, %511 : vector<16x128xf32>
    %c8_i32_197 = arith.constant 8 : i32
    %513 = vector.broadcast %c8_i32_197 : i32 to vector<1x128xi32>
    %514 = arith.cmpi sge, %478, %513 : vector<1x128xi32>
    %c16_i32_198 = arith.constant 16 : i32
    %515 = vector.broadcast %c16_i32_198 : i32 to vector<1x128xi32>
    %516 = arith.cmpi slt, %478, %515 : vector<1x128xi32>
    %517 = arith.andi %514, %516 : vector<1x128xi1>
    %c40_i32_199 = arith.constant 40 : i32
    %518 = vector.broadcast %c40_i32_199 : i32 to vector<1x128xi32>
    %519 = arith.cmpi sge, %478, %518 : vector<1x128xi32>
    %c48_i32_200 = arith.constant 48 : i32
    %520 = vector.broadcast %c48_i32_200 : i32 to vector<1x128xi32>
    %521 = arith.cmpi slt, %478, %520 : vector<1x128xi32>
    %522 = arith.andi %519, %521 : vector<1x128xi1>
    %cst_201 = arith.constant 0.000000e+00 : bf16
    %523 = vector.broadcast %cst_201 : bf16 to vector<16x128xbf16>
    %524 = vector.shape_cast %517 : vector<1x128xi1> to vector<1x128xi1>
    %525 = vector.broadcast %524 : vector<1x128xi1> to vector<16x128xi1>
    %526 = arith.select %525, %477, %523 : vector<16x128xi1>, vector<16x128xbf16>
    %cst_202 = arith.constant 0.000000e+00 : bf16
    %527 = vector.broadcast %cst_202 : bf16 to vector<16x128xbf16>
    %528 = vector.shape_cast %522 : vector<1x128xi1> to vector<1x128xi1>
    %529 = vector.broadcast %528 : vector<1x128xi1> to vector<16x128xi1>
    %530 = arith.select %529, %474, %527 : vector<16x128xi1>, vector<16x128xbf16>
    %cst_203 = arith.constant dense<0.000000e+00> : vector<16x16xf32>
    %531 = tpu.matmul %475, %526, %cst_203 {dimension_numbers = #tpu.dot_dimension_numbers<[1], [1], [0], [0], [0, 0, 1, 0], [], []>} : vector<16x128xbf16>, vector<16x128xbf16>, vector<16x16xf32> -> vector<16x16xf32>
    %532 = arith.addf %531, %12 : vector<16x16xf32>
    %cst_204 = arith.constant dense<0xFF800000> : vector<16xf32>
    %533 = vector.multi_reduction <maximumf>, %532, %cst_204 [1] : vector<16x16xf32> to vector<16xf32>
    %534 = vector.shape_cast %533 : vector<16xf32> to vector<16x1xf32>
    %535 = vector.broadcast %534 : vector<16x1xf32> to vector<16x16xf32>
    %536 = arith.subf %532, %535 : vector<16x16xf32>
    %537 = math.exp %536 : vector<16x16xf32>
    %cst_205 = arith.constant dense<0.000000e+00> : vector<16xf32>
    %538 = vector.multi_reduction <add>, %537, %cst_205 [1] : vector<16x16xf32> to vector<16xf32>
    %539 = vector.shape_cast %538 : vector<16xf32> to vector<16x1xf32>
    %540 = tpu.reciprocal %539 {approx = true} : vector<16x1xf32> -> vector<16x1xf32>
    %541 = vector.broadcast %540 : vector<16x1xf32> to vector<16x16xf32>
    %542 = arith.mulf %537, %541 : vector<16x16xf32>
    %543 = arith.truncf %542 : vector<16x16xf32> to vector<16x16xbf16>
    %cst_206 = arith.constant dense<0.000000e+00> : vector<16x128xf32>
    %544 = tpu.matmul %543, %530, %cst_206 {dimension_numbers = #tpu.dot_dimension_numbers<[1], [0], [0], [1], [0, 0, 1, 1], [], []>} : vector<16x16xbf16>, vector<16x128xbf16>, vector<16x128xf32> -> vector<16x128xf32>
    %545 = arith.addf %512, %544 : vector<16x128xf32>
    %c16_i32_207 = arith.constant 16 : i32
    %546 = vector.broadcast %c16_i32_207 : i32 to vector<1x128xi32>
    %547 = arith.cmpi sge, %478, %546 : vector<1x128xi32>
    %c24_i32_208 = arith.constant 24 : i32
    %548 = vector.broadcast %c24_i32_208 : i32 to vector<1x128xi32>
    %549 = arith.cmpi slt, %478, %548 : vector<1x128xi32>
    %550 = arith.andi %547, %549 : vector<1x128xi1>
    %c48_i32_209 = arith.constant 48 : i32
    %551 = vector.broadcast %c48_i32_209 : i32 to vector<1x128xi32>
    %552 = arith.cmpi sge, %478, %551 : vector<1x128xi32>
    %c56_i32_210 = arith.constant 56 : i32
    %553 = vector.broadcast %c56_i32_210 : i32 to vector<1x128xi32>
    %554 = arith.cmpi slt, %478, %553 : vector<1x128xi32>
    %555 = arith.andi %552, %554 : vector<1x128xi1>
    %cst_211 = arith.constant 0.000000e+00 : bf16
    %556 = vector.broadcast %cst_211 : bf16 to vector<16x128xbf16>
    %557 = vector.shape_cast %550 : vector<1x128xi1> to vector<1x128xi1>
    %558 = vector.broadcast %557 : vector<1x128xi1> to vector<16x128xi1>
    %559 = arith.select %558, %477, %556 : vector<16x128xi1>, vector<16x128xbf16>
    %cst_212 = arith.constant 0.000000e+00 : bf16
    %560 = vector.broadcast %cst_212 : bf16 to vector<16x128xbf16>
    %561 = vector.shape_cast %555 : vector<1x128xi1> to vector<1x128xi1>
    %562 = vector.broadcast %561 : vector<1x128xi1> to vector<16x128xi1>
    %563 = arith.select %562, %474, %560 : vector<16x128xi1>, vector<16x128xbf16>
    %cst_213 = arith.constant dense<0.000000e+00> : vector<16x16xf32>
    %564 = tpu.matmul %475, %559, %cst_213 {dimension_numbers = #tpu.dot_dimension_numbers<[1], [1], [0], [0], [0, 0, 1, 0], [], []>} : vector<16x128xbf16>, vector<16x128xbf16>, vector<16x16xf32> -> vector<16x16xf32>
    %565 = arith.addf %564, %12 : vector<16x16xf32>
    %cst_214 = arith.constant dense<0xFF800000> : vector<16xf32>
    %566 = vector.multi_reduction <maximumf>, %565, %cst_214 [1] : vector<16x16xf32> to vector<16xf32>
    %567 = vector.shape_cast %566 : vector<16xf32> to vector<16x1xf32>
    %568 = vector.broadcast %567 : vector<16x1xf32> to vector<16x16xf32>
    %569 = arith.subf %565, %568 : vector<16x16xf32>
    %570 = math.exp %569 : vector<16x16xf32>
    %cst_215 = arith.constant dense<0.000000e+00> : vector<16xf32>
    %571 = vector.multi_reduction <add>, %570, %cst_215 [1] : vector<16x16xf32> to vector<16xf32>
    %572 = vector.shape_cast %571 : vector<16xf32> to vector<16x1xf32>
    %573 = tpu.reciprocal %572 {approx = true} : vector<16x1xf32> -> vector<16x1xf32>
    %574 = vector.broadcast %573 : vector<16x1xf32> to vector<16x16xf32>
    %575 = arith.mulf %570, %574 : vector<16x16xf32>
    %576 = arith.truncf %575 : vector<16x16xf32> to vector<16x16xbf16>
    %cst_216 = arith.constant dense<0.000000e+00> : vector<16x128xf32>
    %577 = tpu.matmul %576, %563, %cst_216 {dimension_numbers = #tpu.dot_dimension_numbers<[1], [0], [0], [1], [0, 0, 1, 1], [], []>} : vector<16x16xbf16>, vector<16x128xbf16>, vector<16x128xf32> -> vector<16x128xf32>
    %578 = arith.addf %545, %577 : vector<16x128xf32>
    %c24_i32_217 = arith.constant 24 : i32
    %579 = vector.broadcast %c24_i32_217 : i32 to vector<1x128xi32>
    %580 = arith.cmpi sge, %478, %579 : vector<1x128xi32>
    %c32_i32_218 = arith.constant 32 : i32
    %581 = vector.broadcast %c32_i32_218 : i32 to vector<1x128xi32>
    %582 = arith.cmpi slt, %478, %581 : vector<1x128xi32>
    %583 = arith.andi %580, %582 : vector<1x128xi1>
    %c56_i32_219 = arith.constant 56 : i32
    %584 = vector.broadcast %c56_i32_219 : i32 to vector<1x128xi32>
    %585 = arith.cmpi sge, %478, %584 : vector<1x128xi32>
    %c64_i32_220 = arith.constant 64 : i32
    %586 = vector.broadcast %c64_i32_220 : i32 to vector<1x128xi32>
    %587 = arith.cmpi slt, %478, %586 : vector<1x128xi32>
    %588 = arith.andi %585, %587 : vector<1x128xi1>
    %cst_221 = arith.constant 0.000000e+00 : bf16
    %589 = vector.broadcast %cst_221 : bf16 to vector<16x128xbf16>
    %590 = vector.shape_cast %583 : vector<1x128xi1> to vector<1x128xi1>
    %591 = vector.broadcast %590 : vector<1x128xi1> to vector<16x128xi1>
    %592 = arith.select %591, %477, %589 : vector<16x128xi1>, vector<16x128xbf16>
    %cst_222 = arith.constant 0.000000e+00 : bf16
    %593 = vector.broadcast %cst_222 : bf16 to vector<16x128xbf16>
    %594 = vector.shape_cast %588 : vector<1x128xi1> to vector<1x128xi1>
    %595 = vector.broadcast %594 : vector<1x128xi1> to vector<16x128xi1>
    %596 = arith.select %595, %474, %593 : vector<16x128xi1>, vector<16x128xbf16>
    %cst_223 = arith.constant dense<0.000000e+00> : vector<16x16xf32>
    %597 = tpu.matmul %475, %592, %cst_223 {dimension_numbers = #tpu.dot_dimension_numbers<[1], [1], [0], [0], [0, 0, 1, 0], [], []>} : vector<16x128xbf16>, vector<16x128xbf16>, vector<16x16xf32> -> vector<16x16xf32>
    %598 = arith.addf %597, %12 : vector<16x16xf32>
    %cst_224 = arith.constant dense<0xFF800000> : vector<16xf32>
    %599 = vector.multi_reduction <maximumf>, %598, %cst_224 [1] : vector<16x16xf32> to vector<16xf32>
    %600 = vector.shape_cast %599 : vector<16xf32> to vector<16x1xf32>
    %601 = vector.broadcast %600 : vector<16x1xf32> to vector<16x16xf32>
    %602 = arith.subf %598, %601 : vector<16x16xf32>
    %603 = math.exp %602 : vector<16x16xf32>
    %cst_225 = arith.constant dense<0.000000e+00> : vector<16xf32>
    %604 = vector.multi_reduction <add>, %603, %cst_225 [1] : vector<16x16xf32> to vector<16xf32>
    %605 = vector.shape_cast %604 : vector<16xf32> to vector<16x1xf32>
    %606 = tpu.reciprocal %605 {approx = true} : vector<16x1xf32> -> vector<16x1xf32>
    %607 = vector.broadcast %606 : vector<16x1xf32> to vector<16x16xf32>
    %608 = arith.mulf %603, %607 : vector<16x16xf32>
    %609 = arith.truncf %608 : vector<16x16xf32> to vector<16x16xbf16>
    %cst_226 = arith.constant dense<0.000000e+00> : vector<16x128xf32>
    %610 = tpu.matmul %609, %596, %cst_226 {dimension_numbers = #tpu.dot_dimension_numbers<[1], [0], [0], [1], [0, 0, 1, 1], [], []>} : vector<16x16xbf16>, vector<16x128xbf16>, vector<16x128xf32> -> vector<16x128xf32>
    %611 = arith.addf %578, %610 : vector<16x128xf32>
    %612 = arith.truncf %611 : vector<16x128xf32> to vector<16x128xbf16>
    %cst_227 = arith.constant dense<0.000000e+00> : vector<16x32xf32>
    %613 = tpu.matmul %612, %462, %cst_227 {dimension_numbers = #tpu.dot_dimension_numbers<[1], [0], [0], [1], [0, 0, 1, 1], [], []>} : vector<16x128xbf16>, vector<128x32xbf16>, vector<16x32xf32> -> vector<16x32xf32>
    %614 = vector.broadcast %463 : vector<1x32xf32> to vector<16x32xf32>
    %615 = arith.addf %613, %614 : vector<16x32xf32>
    %616 = arith.addf %457, %615 : vector<16x32xf32>
    %cst_228 = arith.constant dense<0.000000e+00> : vector<16xf32>
    %617 = vector.multi_reduction <add>, %616, %cst_228 [1] : vector<16x32xf32> to vector<16xf32>
    %618 = vector.shape_cast %617 : vector<16xf32> to vector<16x1xf32>
    %cst_229 = arith.constant 3.200000e+01 : f32
    %619 = vector.broadcast %cst_229 : f32 to vector<16x1xf32>
    %620 = arith.divf %618, %619 : vector<16x1xf32>
    %621 = vector.broadcast %620 : vector<16x1xf32> to vector<16x32xf32>
    %622 = arith.subf %616, %621 : vector<16x32xf32>
    %623 = arith.mulf %622, %622 : vector<16x32xf32>
    %cst_230 = arith.constant dense<0.000000e+00> : vector<16xf32>
    %624 = vector.multi_reduction <add>, %623, %cst_230 [1] : vector<16x32xf32> to vector<16xf32>
    %625 = vector.shape_cast %624 : vector<16xf32> to vector<16x1xf32>
    %cst_231 = arith.constant 3.200000e+01 : f32
    %626 = vector.broadcast %cst_231 : f32 to vector<16x1xf32>
    %627 = arith.divf %625, %626 : vector<16x1xf32>
    %cst_232 = arith.constant 9.99999974E-6 : f32
    %628 = vector.broadcast %cst_232 : f32 to vector<16x1xf32>
    %629 = arith.addf %627, %628 : vector<16x1xf32>
    %630 = math.rsqrt %629 : vector<16x1xf32>
    %631 = vector.broadcast %630 : vector<16x1xf32> to vector<16x32xf32>
    %632 = arith.mulf %622, %631 : vector<16x32xf32>
    %633 = vector.broadcast %464 : vector<1x32xf32> to vector<16x32xf32>
    %634 = arith.mulf %632, %633 : vector<16x32xf32>
    %635 = vector.broadcast %465 : vector<1x32xf32> to vector<16x32xf32>
    %636 = arith.addf %634, %635 : vector<16x32xf32>
    %c0_233 = arith.constant 0 : index
    %c0_234 = arith.constant 0 : index
    %637 = vector.load %arg36[%c0_233, %c0_234] : memref<32x64xbf16, #tpu.memory_space<vmem>>, vector<32x64xbf16>
    %c0_235 = arith.constant 0 : index
    %c0_236 = arith.constant 0 : index
    %638 = vector.load %arg37[%c0_235, %c0_236] : memref<1x64xf32, #tpu.memory_space<vmem>>, vector<1x64xf32>
    %c0_237 = arith.constant 0 : index
    %c0_238 = arith.constant 0 : index
    %639 = vector.load %arg38[%c0_237, %c0_238] : memref<64x32xbf16, #tpu.memory_space<vmem>>, vector<64x32xbf16>
    %c0_239 = arith.constant 0 : index
    %c0_240 = arith.constant 0 : index
    %640 = vector.load %arg39[%c0_239, %c0_240] : memref<1x32xf32, #tpu.memory_space<vmem>>, vector<1x32xf32>
    %c0_241 = arith.constant 0 : index
    %c0_242 = arith.constant 0 : index
    %641 = vector.load %arg40[%c0_241, %c0_242] : memref<1x32xf32, #tpu.memory_space<vmem>>, vector<1x32xf32>
    %c0_243 = arith.constant 0 : index
    %c0_244 = arith.constant 0 : index
    %642 = vector.load %arg41[%c0_243, %c0_244] : memref<1x32xf32, #tpu.memory_space<vmem>>, vector<1x32xf32>
    %643 = arith.truncf %636 : vector<16x32xf32> to vector<16x32xbf16>
    %cst_245 = arith.constant dense<0.000000e+00> : vector<16x64xf32>
    %644 = tpu.matmul %643, %637, %cst_245 {dimension_numbers = #tpu.dot_dimension_numbers<[1], [0], [0], [1], [0, 0, 1, 1], [], []>} : vector<16x32xbf16>, vector<32x64xbf16>, vector<16x64xf32> -> vector<16x64xf32>
    %645 = vector.broadcast %638 : vector<1x64xf32> to vector<16x64xf32>
    %646 = arith.addf %644, %645 : vector<16x64xf32>
    %647 = arith.mulf %646, %646 : vector<16x64xf32>
    %648 = arith.mulf %646, %647 : vector<16x64xf32>
    %cst_246 = arith.constant 4.471500e-02 : f32
    %649 = vector.broadcast %cst_246 : f32 to vector<16x64xf32>
    %650 = arith.mulf %649, %648 : vector<16x64xf32>
    %651 = arith.addf %646, %650 : vector<16x64xf32>
    %cst_247 = arith.constant 0.797884583 : f32
    %652 = vector.broadcast %cst_247 : f32 to vector<16x64xf32>
    %653 = arith.mulf %652, %651 : vector<16x64xf32>
    %654 = math.tanh %653 : vector<16x64xf32>
    %cst_248 = arith.constant 1.000000e+00 : f32
    %655 = vector.broadcast %cst_248 : f32 to vector<16x64xf32>
    %656 = arith.addf %655, %654 : vector<16x64xf32>
    %cst_249 = arith.constant 5.000000e-01 : f32
    %657 = vector.broadcast %cst_249 : f32 to vector<16x64xf32>
    %658 = arith.mulf %657, %656 : vector<16x64xf32>
    %659 = arith.mulf %646, %658 : vector<16x64xf32>
    %660 = arith.truncf %659 : vector<16x64xf32> to vector<16x64xbf16>
    %cst_250 = arith.constant dense<0.000000e+00> : vector<16x32xf32>
    %661 = tpu.matmul %660, %639, %cst_250 {dimension_numbers = #tpu.dot_dimension_numbers<[1], [0], [0], [1], [0, 0, 1, 1], [], []>} : vector<16x64xbf16>, vector<64x32xbf16>, vector<16x32xf32> -> vector<16x32xf32>
    %662 = vector.broadcast %640 : vector<1x32xf32> to vector<16x32xf32>
    %663 = arith.addf %661, %662 : vector<16x32xf32>
    %664 = arith.addf %636, %663 : vector<16x32xf32>
    %cst_251 = arith.constant dense<0.000000e+00> : vector<16xf32>
    %665 = vector.multi_reduction <add>, %664, %cst_251 [1] : vector<16x32xf32> to vector<16xf32>
    %666 = vector.shape_cast %665 : vector<16xf32> to vector<16x1xf32>
    %cst_252 = arith.constant 3.200000e+01 : f32
    %667 = vector.broadcast %cst_252 : f32 to vector<16x1xf32>
    %668 = arith.divf %666, %667 : vector<16x1xf32>
    %669 = vector.broadcast %668 : vector<16x1xf32> to vector<16x32xf32>
    %670 = arith.subf %664, %669 : vector<16x32xf32>
    %671 = arith.mulf %670, %670 : vector<16x32xf32>
    %cst_253 = arith.constant dense<0.000000e+00> : vector<16xf32>
    %672 = vector.multi_reduction <add>, %671, %cst_253 [1] : vector<16x32xf32> to vector<16xf32>
    %673 = vector.shape_cast %672 : vector<16xf32> to vector<16x1xf32>
    %cst_254 = arith.constant 3.200000e+01 : f32
    %674 = vector.broadcast %cst_254 : f32 to vector<16x1xf32>
    %675 = arith.divf %673, %674 : vector<16x1xf32>
    %cst_255 = arith.constant 9.99999974E-6 : f32
    %676 = vector.broadcast %cst_255 : f32 to vector<16x1xf32>
    %677 = arith.addf %675, %676 : vector<16x1xf32>
    %678 = math.rsqrt %677 : vector<16x1xf32>
    %679 = vector.broadcast %678 : vector<16x1xf32> to vector<16x32xf32>
    %680 = arith.mulf %670, %679 : vector<16x32xf32>
    %681 = vector.broadcast %641 : vector<1x32xf32> to vector<16x32xf32>
    %682 = arith.mulf %680, %681 : vector<16x32xf32>
    %683 = vector.broadcast %642 : vector<1x32xf32> to vector<16x32xf32>
    %684 = arith.addf %682, %683 : vector<16x32xf32>
    %685 = arith.truncf %684 : vector<16x32xf32> to vector<16x32xbf16>
    %c0_256 = arith.constant 0 : index
    %c0_257 = arith.constant 0 : index
    %686 = vector.load %arg42[%c0_256, %c0_257] : memref<256x32xbf16, #tpu.memory_space<vmem>>, vector<256x32xbf16>
    %cst_258 = arith.constant dense<0.000000e+00> : vector<16x256xf32>
    %687 = tpu.matmul %685, %686, %cst_258 {dimension_numbers = #tpu.dot_dimension_numbers<[1], [1], [0], [0], [0, 0, 1, 0], [], []>} : vector<16x32xbf16>, vector<256x32xbf16>, vector<16x256xf32> -> vector<16x256xf32>
    %c0_259 = arith.constant 0 : index
    %c0_260 = arith.constant 0 : index
    %688 = vector.load %arg43[%c0_259, %c0_260] : memref<1x256xf32, #tpu.memory_space<vmem>>, vector<1x256xf32>
    %689 = vector.broadcast %688 : vector<1x256xf32> to vector<16x256xf32>
    %690 = arith.addf %687, %689 : vector<16x256xf32>
    %cst_261 = arith.constant dense<0xFF800000> : vector<16xf32>
    %691 = vector.multi_reduction <maximumf>, %690, %cst_261 [1] : vector<16x256xf32> to vector<16xf32>
    %692 = vector.shape_cast %691 : vector<16xf32> to vector<16x1xf32>
    %693 = vector.broadcast %692 : vector<16x1xf32> to vector<16x256xf32>
    %694 = arith.subf %690, %693 : vector<16x256xf32>
    %695 = math.exp %694 : vector<16x256xf32>
    %cst_262 = arith.constant dense<0.000000e+00> : vector<16xf32>
    %696 = vector.multi_reduction <add>, %695, %cst_262 [1] : vector<16x256xf32> to vector<16xf32>
    %697 = vector.shape_cast %696 : vector<16xf32> to vector<16x1xf32>
    %698 = math.log %697 : vector<16x1xf32>
    %699 = arith.addf %692, %698 : vector<16x1xf32>
    %c0_263 = arith.constant 0 : index
    %c0_264 = arith.constant 0 : index
    %700 = vector.load %arg5[%c0_263, %c0_264] : memref<16x1xi32, #tpu.memory_space<vmem>>, vector<16x1xi32>
    %701 = tpu.iota {dimensions = array<i32: 1>} : vector<16x256xi32>
    %702 = vector.broadcast %700 : vector<16x1xi32> to vector<16x256xi32>
    %703 = arith.cmpi eq, %701, %702 : vector<16x256xi32>
    %cst_265 = arith.constant 0.000000e+00 : f32
    %704 = vector.broadcast %cst_265 : f32 to vector<16x256xf32>
    %705 = arith.select %703, %690, %704 : vector<16x256xi1>, vector<16x256xf32>
    %cst_266 = arith.constant dense<0.000000e+00> : vector<16xf32>
    %706 = vector.multi_reduction <add>, %705, %cst_266 [1] : vector<16x256xf32> to vector<16xf32>
    %707 = vector.shape_cast %706 : vector<16xf32> to vector<16x1xf32>
    %c-100_i32 = arith.constant -100 : i32
    %708 = vector.broadcast %c-100_i32 : i32 to vector<16x1xi32>
    %709 = arith.cmpi ne, %700, %708 : vector<16x1xi32>
    %710 = arith.extui %709 : vector<16x1xi1> to vector<16x1xi32>
    %711 = arith.sitofp %710 : vector<16x1xi32> to vector<16x1xf32>
    %712 = arith.subf %699, %707 : vector<16x1xf32>
    %713 = arith.mulf %712, %711 : vector<16x1xf32>
    %cst_267 = arith.constant dense<0.000000e+00> : vector<1xf32>
    %714 = vector.multi_reduction <add>, %713, %cst_267 [0] : vector<16x1xf32> to vector<1xf32>
    %715 = vector.shape_cast %714 : vector<1xf32> to vector<1x1xf32>
    %cst_268 = arith.constant dense<0.000000e+00> : vector<1xf32>
    %716 = vector.multi_reduction <add>, %711, %cst_268 [0] : vector<16x1xf32> to vector<1xf32>
    %717 = vector.shape_cast %716 : vector<1xf32> to vector<1x1xf32>
    %cst_269 = arith.constant 1.000000e+00 : f32
    %718 = vector.broadcast %cst_269 : f32 to vector<1x1xf32>
    %719 = arith.maximumf %717, %718 : vector<1x1xf32>
    %720 = arith.divf %715, %719 : vector<1x1xf32>
    %c0_270 = arith.constant 0 : index
    %c0_271 = arith.constant 0 : index
    %721 = vector.load %arg44[%c0_270, %c0_271] : memref<1x1xf32, #tpu.memory_space<vmem>>, vector<1x1xf32>
    tpu.vector_store %arg44[%c0_270, %c0_271], %720 {strides = array<i32>} : memref<1x1xf32, #tpu.memory_space<vmem>>, vector<1x1xf32>,
    return
  }
}

</mosaic_0001>

<bundles_post_ra>
// kernel: robart_forward.1
= control target key start
LH: loop header
LB: loop body
LE: loop exit
PB: predicated region body
PF: predicated region fallthrough
CT: control target
= control target key end

     0   :  { %s3140_s6 = smov 1   ;;  %s3141_s10 = smov 2   ;;  %s4019_s0 = inlined_call_operand.smem [shape: u32[45], index: -1, kind: input, shape index: {}] }
   0x1   :  { %s3198_s5 = sld [smem:[%s4019_s0]]   ;;  %s3142_s14 = smov 3  }
   0x2   :  { %s3203_s9 = sld [smem:[%s4019_s0 + %s3140_s6]]   ;;  %s3143_s18 = smov 4  }
   0x3   :  { %s3208_s13 = sld [smem:[%s4019_s0 + %s3141_s10]]   ;;  %s3144_s22 = smov 5  }
   0x4   :  { %s3213_s17 = sld [smem:[%s4019_s0 + %s3142_s14]]   ;;  %s3145_s26 = smov 6  }
   0x5   :  { %s3218_s21 = sld [smem:[%s4019_s0 + %s3143_s18]]   ;;  %s3146_s30 = smov 7  }
   0x6   :  { %s3223_s25 = sld [smem:[%s4019_s0 + %s3144_s22]]   ;;  %s3147_s4 = smov 8  }
   0x7   :  { %s3228_s29 = sld [smem:[%s4019_s0 + %s3145_s26]]   ;;  %s3148_s10 = smov 9  }
   0x8   :  { %s3233_s3 = sld [smem:[%s4019_s0 + %s3146_s30]]   ;;  %s3149_s15 = smov 10  }
   0x9   :  { %s3238_s8 = sld [smem:[%s4019_s0 + %s3147_s4]]   ;;  %s3150_s20 = smov 11  }
   0xa   :  { %s3243_s14 = sld [smem:[%s4019_s0 + %s3148_s10]]   ;;  %s3151_s26 = smov 12  }
   0xb   :  { %s3248_s19 = sld [smem:[%s4019_s0 + %s3149_s15]]   ;;  %s3152_s1 = smov 13  }
   0xc   :  { %4030 = sst [smem:[#allocation5_spill]] %s3223_s25  ;;  %s3153_s7 = smov 14  }
   0xd   :  { %s3253_s24 = sld [smem:[%s4019_s0 + %s3150_s20]]   ;;  %s3154_s15 = smov 15  }
   0xe   :  { %s3258_s30 = sld [smem:[%s4019_s0 + %s3151_s26]]   ;;  %s3155_s22 = smov 16  }
   0xf   :  { %s3263_s6 = sld [smem:[%s4019_s0 + %s3152_s1]]   ;;  %s3156_s28 = smov 17  }
  0x10   :  { %s3268_s12 = sld [smem:[%s4019_s0 + %s3153_s7]]   ;;  %s3157_s7 = smov 18  }
  0x11   :  { %s3273_s20 = sld [smem:[%s4019_s0 + %s3154_s15]]   ;;  %s3158_s15 = smov 19  }
  0x12   :  { %s3278_s27 = sld [smem:[%s4019_s0 + %s3155_s22]]   ;;  %s3159_s22 = smov 20  }
  0x13   :  { %s3283_s4 = sld [smem:[%s4019_s0 + %s3156_s28]]   ;;  %s3160_s28 = smov 21  }
  0x14   :  { %4031 = sst [smem:[#allocation6_spill]] %s3258_s30 }
  0x15   :  { %4032 = sst [smem:[#allocation7_spill]] %s3263_s6 }
  0x16   :  { %4033 = sst [smem:[#allocation8_spill]] %s3268_s12 }
  0x17   :  { %4034 = sst [smem:[#allocation9_spill]] %s3273_s20 }
  0x18   :  { %4035 = sst [smem:[#allocation10_spill]] %s3278_s27 }
  0x19   :  { %4036 = sst [smem:[#allocation11_spill]] %s3283_s4 }
  0x1a   :  { %s3288_s25 = sld [smem:[%s4019_s0 + %s3157_s7]]   ;;  %s3161_s7 = smov 22  }
  0x1b   :  { %s3293_s20 = sld [smem:[%s4019_s0 + %s3158_s15]]   ;;  %s3162_s15 = smov 23  }
  0x1c   :  { %s3298_s27 = sld [smem:[%s4019_s0 + %s3159_s22]]   ;;  %s3163_s22 = smov 24  }
  0x1d   :  { %s3303_s4 = sld [smem:[%s4019_s0 + %s3160_s28]]   ;;  %s3164_s28 = smov 25  }
  0x1e   :  { %s3318_s6 = sld [smem:[%s4019_s0 + %s3163_s22]]   ;;  %s3167_s22 = smov 28  }
  0x1f   :  { %s3323_s30 = sld [smem:[%s4019_s0 + %s3164_s28]]   ;;  %s3168_s28 = smov 29  }
  0x20   :  { %4037 = sst [smem:[#allocation12_spill]] %s3288_s25 }
  0x21   :  { %4038 = sst [smem:[#allocation13_spill]] %s3293_s20 }
  0x22   :  { %s3308_s25 = sld [smem:[%s4019_s0 + %s3161_s7]]   ;;  %s3165_s7 = smov 26  }
  0x23   :  { %s3313_s20 = sld [smem:[%s4019_s0 + %s3162_s15]]   ;;  %s3166_s15 = smov 27  }
  0x24   :  { %4040 = sst [smem:[#allocation15_spill]] %s3318_s6 }
  0x25   :  { %4041 = sst [smem:[#allocation16_spill]] %s3323_s30 }
  0x26   :  { %s3328_s12 = sld [smem:[%s4019_s0 + %s3165_s7]]   ;;  %s3169_s7 = smov 30  }
  0x27   :  { %s3338_s6 = sld [smem:[%s4019_s0 + %s3167_s22]]   ;;  %s3171_s22 = smov 32  }
  0x28   :  { %s3343_s30 = sld [smem:[%s4019_s0 + %s3168_s28]]   ;;  %s3172_s28 = smov 33  }
  0x29   :  { %4039 = sst [smem:[#allocation14_spill]] %s3313_s20 }
  0x2a   :  { %s3333_s20 = sld [smem:[%s4019_s0 + %s3166_s15]]   ;;  %s3170_s15 = smov 31  }
  0x2c   :  { %4042 = sst [smem:[#allocation17_spill]] %s3328_s12 }
  0x2d   :  { %4044 = sst [smem:[#allocation19_spill]] %s3338_s6 }
  0x2e   :  { %4045 = sst [smem:[#allocation20_spill]] %s3343_s30 }
  0x2f   :  { %s3348_s12 = sld [smem:[%s4019_s0 + %s3169_s7]]   ;;  %s3173_s7 = smov 34  }
  0x30   :  { %4043 = sst [smem:[#allocation18_spill]] %s3333_s20 }
  0x31   :  { %s3353_s20 = sld [smem:[%s4019_s0 + %s3170_s15]]   ;;  %s3174_s15 = smov 35  }
  0x32   :  { %s3358_s6 = sld [smem:[%s4019_s0 + %s3171_s22]]   ;;  %s3175_s22 = smov 36  }
  0x33   :  { %s3363_s30 = sld [smem:[%s4019_s0 + %s3172_s28]]   ;;  %s3176_s28 = smov 37  }
  0x35   :  { %4046 = sst [smem:[#allocation21_spill]] %s3348_s12 }
  0x36   :  { %s3368_s12 = sld [smem:[%s4019_s0 + %s3173_s7]]   ;;  %s3177_s7 = smov 38  }
  0x37   :  { %4047 = sst [smem:[#allocation22_spill]] %s3353_s20 }
  0x38   :  { %4048 = sst [smem:[#allocation23_spill]] %s3358_s6 }
  0x39   :  { %4049 = sst [smem:[#allocation24_spill]] %s3363_s30 }
  0x3a   :  { %s3373_s20 = sld [smem:[%s4019_s0 + %s3174_s15]]   ;;  %s3178_s15 = smov 39  }
  0x3b   :  { %s3378_s6 = sld [smem:[%s4019_s0 + %s3175_s22]]   ;;  %s3179_s22 = smov 40  }
  0x3c   :  { %4050 = sst [smem:[#allocation25_spill]] %s3368_s12 }
  0x3d   :  { %s3383_s30 = sld [smem:[%s4019_s0 + %s3176_s28]]   ;;  %s3180_s28 = smov 41  }
  0x3e   :  { %s3388_s12 = sld [smem:[%s4019_s0 + %s3177_s7]]   ;;  %s3181_s7 = smov 42  }
  0x40   :  { %4051 = sst [smem:[#allocation26_spill]] %s3373_s20 }
  0x41   :  { %4052 = sst [smem:[#allocation27_spill]] %s3378_s6 }
  0x42   :  { %s3393_s20 = sld [smem:[%s4019_s0 + %s3178_s15]]   ;;  %s3182_s15 = smov 43  }
  0x43   :  { %4053 = sst [smem:[#allocation28_spill]] %s3383_s30 }
  0x44   :  { %4054 = sst [smem:[#allocation29_spill]] %s3388_s12 }
  0x45   :  { %s3398_s6 = sld [smem:[%s4019_s0 + %s3179_s22]]   ;;  %s3183_s22 = smov 44  }
  0x46   :  { %s3403_s30 = sld [smem:[%s4019_s0 + %s3180_s28]]  }
  0x47   :  { %s3408_s12 = sld [smem:[%s4019_s0 + %s3181_s7]]  }
  0x48   :  { %4055 = sst [smem:[#allocation30_spill]] %s3393_s20 }
  0x49   :  { %s3413_s20 = sld [smem:[%s4019_s0 + %s3182_s15]]  }
  0x4b   :  { %4056 = sst [smem:[#allocation31_spill]] %s3398_s6 }
  0x4c   :  { %s3418_s6 = sld [smem:[%s4019_s0 + %s3183_s22]]  }
  0x4d   :  { %v216_v0 = vld [vmem:[%s3198_s5] sm:$0xff]  ;;  %vm4029_vm0 = vcmask 261120   ;;  %v217_v1 = vld [vmem:[%s3198_s5 + $0x8] sm:$0xff] }
  0x4e   :  { %v221_v2 = vsel %vm4029_vm0, %v216_v0, 0.0  ;;  %v224_v3 = vsel %vm4029_vm0, %v217_v1, 0.0 }
  0x4f   :  { %222 = vadd.xlane.f32.xlu0 %v221_v2 }
  0x57   :  { %225 = vadd.xlane.f32.xlu0 %v224_v3 }
  0x58   :  { %94 = vsyncpa [#allocation3], 0  ;;  %v3184_v4 = vmov 32.0   ;;  %v2813_v21 = vld [vmem:[%s3238_s8 + $0x8] sm:$0xff]  ;;  %v2812_v23 = vld [vmem:[%s3238_s8] sm:$0xff]  ;;  %v205_v52 = vlaneseq  ;;  %s3185_s0 = smov 64  }
  0x59   :  { %2966 = vrcp.f32 %v3184_v4  ;;  %331 = vmatpush.bf16.msra.mxu0 %v2813_v21  ;;  %v2940_v42 = vld [vmem:[%s3228_s29] ss:$0 sm:$0xff]  ;;  %s4081_s5 = sld [smem:[#allocation8_spill]] }
  0x5a   :  { %v2941_v47 = vld [vmem:[%s3233_s3] ss:$0 sm:$0xff]  ;;  %v3444_v53 = vand.u32 127, %v205_v52  ;;  %s4087_s29 = sld [smem:[#allocation11_spill]] }
  0x5b   :  { %v2942_v54 = vld [vmem:[%s3243_s14] ss:$0 sm:$0xff]  ;;  %s4090_s3 = sld [smem:[#allocation15_spill]] }
  0x5c   :  { %vm416_vm8 = vcmp.ge.s32.totalorder %v3444_v53, 40  ;;  %vm417_vm9 = vcmp.lt.s32.totalorder %v3444_v53, 48  ;;  %vm350_vm10 = vcmp.ge.s32.totalorder %v3444_v53, 32  ;;  %vm351_vm11 = vcmp.lt.s32.totalorder %v3444_v53, 40  ;;  %s4093_s8 = sld [smem:[#allocation21_spill]] }
  0x5d   :  { %332 = vmatpush.bf16.msra.mxu0 %v2812_v23  ;;  %vm521_vm12 = vcmp.ge.s32.totalorder %v3444_v53, 48  ;;  %vm522_vm13 = vcmp.lt.s32.totalorder %v3444_v53, 56  ;;  %vm418_vm14 = vmand %vm416_vm8, %vm417_vm9  ;;  %vm518_vm9 = vcmp.ge.s32.totalorder %v3444_v53, 16  ;;  %s4094_s14 = sld [smem:[#allocation12_spill]] }
  0x5e   :  { %vm352_vm15 = vmand %vm350_vm10, %vm351_vm11  ;;  %vm519_vm10 = vcmp.lt.s32.totalorder %v3444_v53, 24  ;;  %vm348_vm11 = vcmp.lt.s32.totalorder %v3444_v53, 8  ;;  %s4104_s28 = sld [smem:[#allocation17_spill]] }
  0x5f   :  { %v2967_v5 = vpop.eup %2966  ;;  %s4105_s1 = sld [smem:[#allocation18_spill]] }
  0x60   :  { %v228_v6 = vmul.f32 32.0, %v2967_v5  ;;  %vm232_vm1 = vweird.f32 %v2967_v5  ;;  %s4106_s2 = sld [smem:[#allocation20_spill]] }
  0x61   :  { %s4108_s7 = sld [smem:[#allocation23_spill]] }
  0x62   :  { %v229_v7 = vsub.f32 1.0, %v228_v6  ;;  %s4109_s10 = sld [smem:[#allocation24_spill]] }
  0x63   :  { %s4112_s11 = sld [smem:[#allocation27_spill]] }
  0x64   :  { %v230_v8 = vmul.f32 %v2967_v5, %v229_v7  ;;  %s4115_s15 = sld [smem:[#allocation25_spill]] }
  0x65   :  { %s4116_s16 = sld [smem:[#allocation26_spill]] }
  0x66   :  { %v231_v9 = vadd.f32 %v2967_v5, %v230_v8  ;;  %s4117_s18 = sld [smem:[#allocation29_spill]] }
  0x67   :  { %s4118_s22 = sld [smem:[#allocation28_spill]] }
  0x68   :  { %v3424_v10 = vsel %vm232_vm1, %v2967_v5, %v231_v9  ;;  %vm523_vm1 = vmand %vm521_vm12, %vm522_vm13  ;;  %vm602_vm12 = vcmp.ge.s32.totalorder %v3444_v53, 24  ;;  %vm603_vm13 = vcmp.lt.s32.totalorder %v3444_v53, 32  ;;  %s4120_s23 = sld [smem:[#allocation30_spill]] }
  0x69   :  { %s4129_s26 = sld [smem:[#allocation5_spill]] }
  0xc2   :  { %v223_v11 = vpop.xlane.xlu0 %222 }
  0xc3   :  { %v234_v12 = vmul.f32 %v3424_v10, %v223_v11 }
  0xc5   :  { %v236_v13 = vsub.f32 %v216_v0, %v234_v12 }
  0xc7   :  { %v238_v14 = vmul.f32 %v236_v13, %v236_v13 }
  0xc9   :  { %v240_v15 = vsel %vm4029_vm0, %v238_v14, 0.0 }
  0xca   :  { %241 = vadd.xlane.f32.xlu1 %v240_v15  ;;  %v226_v16 = vpop.xlane.xlu0 %225 }
  0xcb   :  { %v235_v17 = vmul.f32 %v3424_v10, %v226_v16 }
  0xcd   :  { %v237_v18 = vsub.f32 %v217_v1, %v235_v17 }
  0xcf   :  { %v239_v19 = vmul.f32 %v237_v18, %v237_v18 }
  0xd1   :  { %v243_v20 = vsel %vm4029_vm0, %v239_v19, 0.0 }
  0xd2   :  { %244 = vadd.xlane.f32.xlu1 %v243_v20 }
 0x13d   :  { %v242_v22 = vpop.xlane.xlu1 %241 }
 0x13e   :  { %v246_v24 = vmul.f32 %v242_v22, %v3424_v10 }
 0x140   :  { %v248_v25 = vadd.f32 1e-05, %v246_v24 }
 0x142   :  { %2968 = vrsqrt.f32 %v248_v25  ;;  %vm256_vm3 = vweird.f32 %v248_v25 }
 0x145   :  { %v245_v26 = vpop.xlane.xlu1 %244 }
 0x146   :  { %v247_v27 = vmul.f32 %v245_v26, %v3424_v10  ;;  %v3186_v26 = vmov 0  }
 0x147   :  { %2928 = vset.pattern.permute.xlu0 %v3186_v26  ;;  %2927 = vset.pattern.permute.xlu2 %v3186_v26 }
 0x148   :  { %v2969_v28 = vpop.eup %2968  ;;  %v249_v29 = vadd.f32 1e-05, %v247_v27  ;;  %2939 = vset.pattern.permute.xlu1 %v3186_v26 }
 0x149   :  { %v251_v30 = vmul.f32 %v2969_v28, %v248_v25  ;;  %vm257_vm2 = vweird.f32 %v2969_v28 }
 0x14a   :  { %2970 = vrsqrt.f32 %v249_v29  ;;  %vm258_vm4 = vmor %vm256_vm3, %vm257_vm2  ;;  %vm266_vm6 = vweird.f32 %v249_v29  ;;  %vm605_vm3 = vcmp.ge.s32.totalorder %v3444_v53, 56 }
 0x14b   :  { %v252_v31 = vmul.f32 %v2969_v28, %v251_v30  ;;  %vm3453_vm2 = vmpackc.low %vm418_vm14, %vm418_vm14 }
 0x14c   :  { %vm520_vm14 = vmand %vm518_vm9, %vm519_vm10 }
 0x14d   :  { %v253_v32 = vmul.f32 0.5, %v252_v31  ;;  %v185_v31 = vld [vmem:[%s3218_s21 + $0x8] sm:$0xff] }
 0x14e   :  { %191 = vperm.xlu0 %2928, %v185_v31  }
 0x14f   :  { %v254_v33 = vsub.f32 1.5, %v253_v32  ;;  %v184_v32 = vld [vmem:[%s3218_s21] sm:$0xff]  ;;  %s4085_s21 = sld [smem:[#allocation14_spill]] }
 0x150   :  { %v2971_v34 = vpop.eup %2970 }
 0x151   :  { %v255_v35 = vmul.f32 %v2969_v28, %v254_v33  ;;  %v261_v36 = vmul.f32 %v2971_v34, %v249_v29  ;;  %vm267_vm5 = vweird.f32 %v2971_v34 }
 0x152   :  { %vm268_vm7 = vmor %vm266_vm6, %vm267_vm5 }
 0x153   :  { %v262_v37 = vmul.f32 %v2971_v34, %v261_v36  ;;  %v259_v38 = vsel %vm258_vm4, %v2969_v28, %v255_v35  ;;  %vm606_vm4 = vcmp.lt.s32.totalorder %v3444_v53, 64  ;;  %vm3459_vm5 = vmpackc.low %vm352_vm15, %vm352_vm15  ;;  %vm413_vm15 = vcmp.ge.s32.totalorder %v3444_v53, 8 }
 0x154   :  { %v270_v41 = vmul.f32 %v259_v38, %v236_v13  ;;  %vm3463_vm6 = vmpackc.low %vm523_vm1, %vm523_vm1  ;;  %vm414_vm1 = vcmp.lt.s32.totalorder %v3444_v53, 16 }
 0x155   :  { %v263_v39 = vmul.f32 0.5, %v262_v37 }
 0x156   :  { %v275_v46 = vmul.f32 %v2940_v42, %v270_v41 }
 0x157   :  { %v264_v40 = vsub.f32 1.5, %v263_v39 }
 0x158   :  { %v3436_v49 = vadd.f32 %v2941_v47, %v275_v46 }
 0x159   :  { %v265_v43 = vmul.f32 %v2971_v34, %v264_v40 }
 0x15b   :  { %v269_v44 = vsel %vm268_vm7, %v2971_v34, %v265_v43  ;;  %vm607_vm7 = vmand %vm605_vm3, %vm606_vm4 }
 0x15c   :  { %v271_v45 = vmul.f32 %v269_v44, %v237_v18  ;;  %vm3473_vm8 = vmpackc.low %vm607_vm7, %vm607_vm7 }
 0x15d   :  { %vm3512_vm3 = vmpackc.low %vm348_vm11, %vm348_vm11 }
 0x15e   :  { %v276_v48 = vmul.f32 %v2940_v42, %v271_v45  ;;  %vm604_vm4 = vmand %vm602_vm12, %vm603_vm13 }
 0x15f   :  { %vm415_vm7 = vmand %vm413_vm15, %vm414_vm1 }
 0x160   :  { %v3438_v50 = vadd.f32 %v2941_v47, %v276_v48  ;;  %vm3522_vm9 = vmpackc.low %vm604_vm4, %vm604_vm4 }
 0x161   :  { %vm3526_vm10 = vmpackc.low %vm415_vm7, %vm415_vm7 }
 0x162   :  { %v306_v51 = vpack.c.bf16 %v3438_v50, %v3436_v49 }
 0x164   :  { %2556 = vmatmul.msk.bf16.vlgmr.msra.gmra.mxu0 %vm4029_vm0, %v306_v51  ;;  %vm3518_vm0 = vmpackc.low %vm520_vm14, %vm520_vm14 }
 0x1e1   :  { %v334_v55 = vpop.f32.mrf.mxu0 }
 0x1e2   :  { %v335_v56 = vadd.f32 %v2942_v54, %v334_v55 }
 0x1e4   :  { %v339_v59 = vpack.c.bf16 %v335_v56, %v335_v56 }
 0x1e6   :  { %v427_v63 = vsel %vm3453_vm2, %v339_v59, 0  ;;  %v361_v0 = vsel %vm3459_vm5, %v339_v59, 0  ;;  %v532_v1 = vsel %vm3463_vm6, %v339_v59, 0  ;;  %v365_v5 = vunpack.c.l.b16 %v339_v59 }
 0x1e7   :  { %v474_v6 = vunpack.c.l.b16 %v427_v63  ;;  %v497_v7 = vunpack.c.l.b16 %v361_v0  ;;  %v3477_v8 = vunpack.c.l.b16 %v532_v1  ;;  %v616_v9 = vsel %vm3473_vm8, %v339_v59, 0 }
 0x1e8   :  { %v3494_v20 = vunpack.c.l.b16 %v616_v9  ;;  %v206_v1 = vshrl.u32 %v205_v52, 7  ;;  %v196_v52 = vld [vmem:[%s3208_s13] sm:$0x1]  ;;  %s4083_s13 = sld [smem:[#allocation7_spill]] }
 0x1e9   :  { %v336_v61 = vpop.f32.mrf.mxu0  ;;  %vm197_vm4 = vcmp.gt.f32.partialorder %v196_v52, 0.5 }
 0x1ea   :  { %v337_v62 = vadd.f32 %v2942_v54, %v336_v61  ;;  %vm210_vm11 = vcmp.ge.s32.totalorder %v206_v1, %v3444_v53 }
 0x1ec   :  { %v340_v3 = vpack.c.bf16 %v337_v62, %v337_v62  ;;  %v2922_v4 = vpack.i.bf16 %v337_v62, %v335_v56 }
 0x1ee   :  { %2923 = vrot.lane.b32.xlu2 %v2922_v4, %s3185_s0  ;;  %v428_v11 = vsel %vm3453_vm2, %v340_v3, 0  ;;  %v362_v12 = vsel %vm3459_vm5, %v340_v3, 0  ;;  %v366_v13 = vunpack.c.l.b16 %v340_v3  ;;  %v533_v14 = vsel %vm3463_vm6, %v340_v3, 0 }
 0x1ef   :  { %v475_v15 = vunpack.c.l.b16 %v428_v11  ;;  %v498_v16 = vunpack.c.l.b16 %v362_v12  ;;  %v3488_v17 = vunpack.c.l.b16 %v533_v14  ;;  %v617_v18 = vsel %vm3473_vm8, %v340_v3, 0  ;;  %v2943_v3 = vld [vmem:[%s3213_s17] ss:$0 sm:$0xff]  ;;  %s4084_s17 = sld [smem:[#allocation10_spill]] }
 0x1f0   :  { %v3492_v19 = vpack.c.b16 %v366_v13, %v365_v5  ;;  %v3496_v21 = vunpack.c.l.b16 %v617_v18  ;;  %v3187_v5 = vmov -1e+09   ;;  %v198_v11 = vsel %vm197_vm4, 1, %v3186_v26 }
 0x1f1   :  { %v476_v22 = vpack.c.b16 %v475_v15, %v474_v6  ;;  %v499_v23 = vpack.c.b16 %v498_v16, %v497_v7  ;;  %v581_v24 = vpack.c.b16 %v3488_v17, %v3477_v8  ;;  %v207_v7 = vadd.s32 8, %v206_v1  ;;  %v192_v8 = vpop.permute.xlu0 %191 }
 0x1f2   :  { %v665_v25 = vpack.c.b16 %v3496_v21, %v3494_v20  ;;  %vm195_vm15 = vcmp.eq.s32.totalorder %v192_v8, %v2943_v3  ;;  %v199_v12 = vperm.slane %v198_v11, 0 }
 0x1f3   :  { %488 = vmatpush.bf16.msra.mxu3 %v476_v22  ;;  %vm211_vm14 = vcmp.ge.s32.totalorder %v207_v7, %v3444_v53 }
 0x1f4   :  { %vm213_vm1 = vmand %vm195_vm15, %vm211_vm14  ;;  %vm200_vm7 = vcmp.eq.s32.totalorder %v199_v12, 1  ;;  %vm4073_vm14 = vcmask 261120  }
 0x1f5   :  { %v3558_v9 = vsel %vm213_vm1, 0.0, %v3187_v5  ;;  %vm4075_vm1 = vmmov %vm4073_vm14 }
 0x1f6   :  { %188 = vperm.xlu2 %2927, %v184_v32   ;;  %vm4076_vm4 = vmmov %vm4075_vm1 }
 0x1f7   :  { %511 = vmatpush.bf16.msrb.mxu3 %v499_v23 }
 0x248   :  { %v2924_v28 = vpop.permute.xlu2 %2923 }
 0x249   :  { %v2926_v29 = vunpack.i.h.bf16 %v2924_v28  ;;  %v2925_v30 = vunpack.i.l.bf16 %v2924_v28 }
 0x24b   :  { %v346_v34 = vpack.c.bf16 %v2926_v29, %v2926_v29  ;;  %v345_v35 = vpack.c.bf16 %v2925_v30, %v2925_v30 }
 0x24d   :  { %v356_v38 = vsel %vm3512_vm3, %v345_v35, 0  ;;  %v357_v39 = vsel %vm3512_vm3, %v346_v34, 0  ;;  %v527_v40 = vsel %vm3518_vm0, %v345_v35, 0  ;;  %v528_v41 = vsel %vm3518_vm0, %v346_v34, 0 }
 0x24e   :  { %v371_v42 = vunpack.c.l.b16 %v356_v38  ;;  %v372_v43 = vunpack.c.l.b16 %v357_v39  ;;  %v536_v44 = vunpack.c.l.b16 %v527_v40  ;;  %v537_v45 = vunpack.c.l.b16 %v528_v41 }
 0x24f   :  { %v611_v46 = vsel %vm3522_vm9, %v345_v35, 0  ;;  %v612_v47 = vsel %vm3522_vm9, %v346_v34, 0  ;;  %v422_v48 = vsel %vm3526_vm10, %v345_v35, 0  ;;  %v423_v51 = vsel %vm3526_vm10, %v346_v34, 0 }
 0x250   :  { %v373_v54 = vpack.c.b16 %v372_v43, %v371_v42  ;;  %v538_v55 = vpack.c.b16 %v537_v45, %v536_v44  ;;  %v620_v56 = vunpack.c.l.b16 %v611_v46  ;;  %v621_v59 = vunpack.c.l.b16 %v612_v47  ;;  %v189_v4 = vpop.permute.xlu2 %188 }
 0x251   :  { %v431_v61 = vunpack.c.l.b16 %v422_v48  ;;  %v432_v62 = vunpack.c.l.b16 %v423_v51  ;;  %vm194_vm12 = vcmp.eq.s32.totalorder %v189_v4, %v2943_v3 }
 0x252   :  { %382 = vmatpush.bf16.xpose.msra.mxu1 %v373_v54  ;;  %547 = vmatpush.bf16.xpose.msrb.mxu0 %v538_v55  ;;  %v622_v63 = vpack.c.b16 %v621_v59, %v620_v56  ;;  %vm212_vm13 = vmand %vm194_vm12, %vm210_vm11 }
 0x253   :  { %v433_v0 = vpack.c.b16 %v432_v62, %v431_v61  ;;  %v3554_v6 = vsel %vm212_vm13, 0.0, %v3187_v5  ;;  %vm201_vm11 = vmand %vm194_vm12, %vm200_vm7  ;;  %vm389_vm13 = vcmask 130048  }
 0x254   :  { %631 = vmatpush.bf16.xpose.msra.mxu2 %v622_v63  ;;  %v3563_v13 = vsel %vm201_vm11, 0.0, %v3187_v5  ;;  %vm202_vm12 = vmand %vm195_vm15, %vm200_vm7 }
 0x255   :  { %v3574_v26 = vsel %vm202_vm12, 0.0, %v3187_v5  ;;  %vm4074_vm15 = vmmov %vm4073_vm14 }
 0x256   :  { %vm4077_vm7 = vmmov %vm4075_vm1 }
 0x257   :  { %vm4078_vm11 = vmmov %vm4075_vm1 }
 0x258   :  { %vm4079_vm12 = vmmov %vm4075_vm1 }
 0x259   :  { %383 = vmatmul.bf16.vlgmr.msra.gmra.mxu1 %v3492_v19  ;;  %548 = vmatmul.bf16.vlgmr.msrb.gmra.mxu0 %v3492_v19 }
 0x25a   :  { %442 = vmatpush.bf16.xpose.msrb.mxu1 %v433_v0 }
 0x25b   :  { %632 = vmatmul.bf16.vlgmr.msra.gmra.mxu2 %v3492_v19 }
 0x262   :  { %593 = vmatpush.bf16.msra.mxu1 %v581_v24 }
 0x269   :  { %443 = vmatmul.bf16.vlgmr.msrb.gmra.mxu1 %v3492_v19 }
 0x2d6   :  { %v384_v14 = vpop.f32.mrf.mxu1  ;;  %v549_v15 = vpop.f32.mrf.mxu0 }
 0x2d7   :  { %v3566_v16 = vadd.f32 %v549_v15, %v3563_v13  ;;  %v385_v24 = vadd.f32 %v384_v14, %v3563_v13 }
 0x2d9   :  { %v554_v17 = vsel %vm389_vm13, %v3566_v16, -inf  ;;  %v390_v31 = vsel %vm389_vm13, %v385_v24, -inf }
 0x2da   :  { %555 = vmax.xlane.f32.xlu0 %v554_v17 }
 0x2de   :  { %v386_v18 = vpop.f32.mrf.mxu1  ;;  %v633_v34 = vpop.f32.mrf.mxu2 }
 0x2df   :  { %v387_v32 = vadd.f32 %v386_v18, %v3574_v26  ;;  %v634_v38 = vadd.f32 %v633_v34, %v3563_v13  ;;  %v551_v43 = vpop.f32.mrf.mxu0 }
 0x2e0   :  { %v552_v44 = vadd.f32 %v551_v43, %v3574_v26 }
 0x2e1   :  { %v393_v35 = vsel %vm389_vm13, %v387_v32, -inf  ;;  %v638_v39 = vsel %vm389_vm13, %v634_v38, -inf }
 0x2e2   :  { %v557_v45 = vsel %vm389_vm13, %v552_v44, -inf }
 0x2e6   :  { %v444_v19 = vpop.f32.mrf.mxu1  ;;  %v635_v40 = vpop.f32.mrf.mxu2 }
 0x2e7   :  { %v445_v22 = vadd.f32 %v444_v19, %v3563_v13  ;;  %v636_v41 = vadd.f32 %v635_v40, %v3574_v26 }
 0x2e9   :  { %v449_v23 = vsel %vm389_vm13, %v445_v22, -inf  ;;  %v641_v42 = vsel %vm389_vm13, %v636_v41, -inf }
 0x2ea   :  { %450 = vmax.xlane.f32.xlu1 %v449_v23 }
 0x2ee   :  { %v446_v28 = vpop.f32.mrf.mxu1 }
 0x2ef   :  { %v447_v29 = vadd.f32 %v446_v28, %v3574_v26 }
 0x2f1   :  { %v452_v30 = vsel %vm389_vm13, %v447_v29, -inf }
 0x2f2   :  { %453 = vmax.xlane.f32.xlu2 %v452_v30  ;;  %391 = vmax.xlane.f32.xlu1 %v390_v31 }
 0x2fa   :  { %394 = vmax.xlane.f32.xlu1 %v393_v35 }
 0x302   :  { %639 = vmax.xlane.f32.xlu1 %v638_v39 }
 0x30a   :  { %642 = vmax.xlane.f32.xlu1 %v641_v42 }
 0x312   :  { %558 = vmax.xlane.f32.xlu1 %v557_v45 }
 0x34d   :  { %v556_v52 = vpop.xlane.xlu0 %555 }
 0x34e   :  { %v560_v15 = vsub.f32 %v3566_v16, %v556_v52 }
 0x350   :  { %v562_v19 = vmul.f32 1.442695, %v560_v15  ;;  %v2821_v15 = vld [vmem:[%s3248_s19 + $0x38] sm:$0xff] }
 0x35d   :  { %v451_v46 = vpop.xlane.xlu1 %450 }
 0x35e   :  { %v455_v47 = vsub.f32 %v445_v22, %v451_v46 }
 0x360   :  { %v457_v48 = vmul.f32 1.442695, %v455_v47 }
 0x362   :  { %2972 = vpow2.f32 %v457_v48 }
 0x365   :  { %v392_v51 = vpop.xlane.xlu1 %391  ;;  %v454_v54 = vpop.xlane.xlu2 %453 }
 0x366   :  { %v396_v55 = vsub.f32 %v385_v24, %v392_v51  ;;  %v456_v56 = vsub.f32 %v447_v29, %v454_v54  ;;  %v977_v54 = vld [vmem:[%s3203_s9] sm:$0xff] }
 0x368   :  { %v2973_v59 = vpop.eup %2972  ;;  %v398_v61 = vmul.f32 1.442695, %v396_v55  ;;  %v459_v62 = vmul.f32 1.442695, %v456_v56  ;;  %v981_v55 = vsel %vm4073_vm14, %v977_v54, 0.0  ;;  %vm4080_vm14 = vmmov %vm4075_vm1 }
 0x369   :  { %v461_v63 = vsel %vm389_vm13, %v2973_v59, 0.0 }
 0x36a   :  { %2974 = vpow2.f32 %v398_v61  ;;  %462 = vadd.xlane.f32.xlu2 %v461_v63 }
 0x36b   :  { %2976 = vpow2.f32 %v459_v62 }
 0x36d   :  { %v395_v0 = vpop.xlane.xlu1 %394 }
 0x36e   :  { %v397_v1 = vsub.f32 %v387_v32, %v395_v0 }
 0x370   :  { %v2975_v3 = vpop.eup %2974  ;;  %v400_v4 = vmul.f32 1.442695, %v397_v1 }
 0x371   :  { %v2977_v5 = vpop.eup %2976  ;;  %v402_v7 = vsel %vm389_vm13, %v2975_v3, 0.0 }
 0x372   :  { %2978 = vpow2.f32 %v400_v4  ;;  %403 = vadd.xlane.f32.xlu2 %v402_v7  ;;  %v464_v8 = vsel %vm389_vm13, %v2977_v5, 0.0 }
 0x373   :  { %465 = vadd.xlane.f32.xlu1 %v464_v8 }
 0x375   :  { %v640_v11 = vpop.xlane.xlu1 %639 }
 0x376   :  { %v644_v12 = vsub.f32 %v634_v38, %v640_v11 }
 0x378   :  { %v2979_v14 = vpop.eup %2978  ;;  %v646_v17 = vmul.f32 1.442695, %v644_v12 }
 0x379   :  { %v405_v18 = vsel %vm389_vm13, %v2979_v14, 0.0 }
 0x37a   :  { %2980 = vpow2.f32 %v646_v17  ;;  %v2820_v17 = vld [vmem:[%s3248_s19 + $0x30] sm:$0xff] }
 0x37b   :  { %406 = vadd.xlane.f32.xlu1 %v405_v18  ;;  %2982 = vpow2.f32 %v562_v19  ;;  %v2819_v18 = vld [vmem:[%s3248_s19 + $0x28] sm:$0xff]  ;;  %v2818_v19 = vld [vmem:[%s3248_s19 + $0x20] sm:$0xff] }
 0x37d   :  { %v643_v22 = vpop.xlane.xlu1 %642 }
 0x37e   :  { %v645_v23 = vsub.f32 %v636_v41, %v643_v22  ;;  %v2817_v22 = vld [vmem:[%s3248_s19 + $0x18] sm:$0xff] }
 0x380   :  { %v2981_v24 = vpop.eup %2980  ;;  %v648_v28 = vmul.f32 1.442695, %v645_v23 }
 0x381   :  { %v650_v29 = vsel %vm389_vm13, %v2981_v24, 0.0  ;;  %v2983_v31 = vpop.eup %2982 }
 0x382   :  { %2984 = vpow2.f32 %v648_v28  ;;  %651 = vadd.xlane.f32.xlu2 %v650_v29  ;;  %v566_v35 = vsel %vm389_vm13, %v2983_v31, 0.0  ;;  %v2815_v28 = vld [vmem:[%s3248_s19 + $0x8] sm:$0xff] }
 0x385   :  { %v559_v30 = vpop.xlane.xlu1 %558 }
 0x386   :  { %v561_v32 = vsub.f32 %v552_v44, %v559_v30  ;;  %v2814_v30 = vld [vmem:[%s3248_s19] sm:$0xff] }
 0x388   :  { %v2985_v34 = vpop.eup %2984  ;;  %v564_v16 = vmul.f32 1.442695, %v561_v32 }
 0x389   :  { %v653_v38 = vsel %vm389_vm13, %v2985_v34, 0.0 }
 0x38a   :  { %2986 = vpow2.f32 %v564_v16  ;;  %567 = vadd.xlane.f32.xlu2 %v566_v35  ;;  %654 = vadd.xlane.f32.xlu1 %v653_v38 }
 0x390   :  { %v2987_v39 = vpop.eup %2986 }
 0x391   :  { %v569_v40 = vsel %vm389_vm13, %v2987_v39, 0.0 }
 0x392   :  { %570 = vadd.xlane.f32.xlu1 %v569_v40  ;;  %982 = vadd.xlane.f32.xlu2 %v981_v55 }
 0x3dd   :  { %v463_v41 = vpop.xlane.xlu2 %462 }
 0x3de   :  { %2988 = vrcp.f32 %v463_v41 }
 0x3e4   :  { %v2989_v43 = vpop.eup %2988 }
 0x3e5   :  { %v469_v45 = vmul.f32 %v2989_v43, %v2973_v59  ;;  %v404_v47 = vpop.xlane.xlu2 %403 }
 0x3e6   :  { %v466_v42 = vpop.xlane.xlu1 %465 }
 0x3e7   :  { %2990 = vrcp.f32 %v466_v42 }
 0x3ed   :  { %v2991_v44 = vpop.eup %2990 }
 0x3ee   :  { %v470_v46 = vmul.f32 %v2991_v44, %v2977_v5  ;;  %v407_v48 = vpop.xlane.xlu1 %406 }
 0x3ef   :  { %2992 = vrcp.f32 %v407_v48 }
 0x3f0   :  { %v471_v51 = vpack.c.bf16 %v470_v46, %v469_v45  ;;  %2994 = vrcp.f32 %v404_v47 }
 0x3f2   :  { %2557 = vmatmul.msk.bf16.vlgmr.msra.gmra.mxu3 %vm389_vm13, %v471_v51 }
 0x3f3   :  { %677 = vmatpush.bf16.msra.mxu3 %v665_v25 }
 0x3f5   :  { %v652_v56 = vpop.xlane.xlu2 %651  ;;  %v2993_v61 = vpop.eup %2992 }
 0x3f6   :  { %v2995_v62 = vpop.eup %2994  ;;  %v411_v59 = vmul.f32 %v2993_v61, %v2979_v14 }
 0x3f7   :  { %v410_v0 = vmul.f32 %v2995_v62, %v2975_v3  ;;  %v2944_v62 = vld [vmem:[%s3253_s24] ss:$0 sm:$0xff]  ;;  %s4096_s24 = sld [smem:[#allocation16_spill]] }
 0x3f9   :  { %v412_v1 = vpack.c.bf16 %v411_v59, %v410_v0 }
 0x3fd   :  { %v655_v63 = vpop.xlane.xlu1 %654  ;;  %v568_v4 = vpop.xlane.xlu2 %567 }
 0x3fe   :  { %2996 = vrcp.f32 %v655_v63 }
 0x3ff   :  { %2998 = vrcp.f32 %v568_v4 }
 0x400   :  { %3000 = vrcp.f32 %v652_v56 }
 0x402   :  { %2558 = vmatmul.msk.bf16.vlgmr.msrb.gmra.mxu3 %vm389_vm13, %v412_v1 }
 0x403   :  { %738 = vmatpush.bf16.msrb.mxu3 %v2821_v15 }
 0x404   :  { %v2997_v21 = vpop.eup %2996 }
 0x405   :  { %v571_v20 = vpop.xlane.xlu1 %570  ;;  %v2999_v25 = vpop.eup %2998  ;;  %v659_v8 = vmul.f32 %v2997_v21, %v2985_v34 }
 0x406   :  { %3002 = vrcp.f32 %v571_v20  ;;  %v3001_v5 = vpop.eup %3000  ;;  %v574_v3 = vmul.f32 %v2999_v25, %v2983_v31  ;;  %v978_v31 = vld [vmem:[%s3203_s9 + $0x8] sm:$0xff]  ;;  %v983_v32 = vpop.xlane.xlu2 %982  ;;  %s4082_s9 = sld [smem:[#allocation6_spill]] }
 0x407   :  { %v658_v11 = vmul.f32 %v3001_v5, %v2981_v24  ;;  %739 = vmatpush.bf16.msrb.mxu3 %v2820_v17  ;;  %v2816_v24 = vld [vmem:[%s3248_s19 + $0x10] sm:$0xff]  ;;  %v984_v34 = vsel %vm4074_vm15, %v978_v31, 0.0  ;;  %v987_v16 = vmul.f32 %v983_v32, %v3424_v10  ;;  %s4095_s19 = sld [smem:[#allocation13_spill]] }
 0x408   :  { %985 = vadd.xlane.f32.xlu1 %v984_v34 }
 0x409   :  { %v660_v14 = vpack.c.bf16 %v659_v8, %v658_v11  ;;  %v3616_v38 = vsub.f32 %v977_v54, %v987_v16 }
 0x40b   :  { %740 = vmatpush.bf16.msrb.mxu3 %v2819_v18 }
 0x40c   :  { %v3003_v7 = vpop.eup %3002 }
 0x40d   :  { %v575_v52 = vmul.f32 %v3003_v7, %v2987_v39  ;;  %v991_v39 = vmul.f32 %v3616_v38, %v3616_v38 }
 0x40f   :  { %v576_v12 = vpack.c.bf16 %v575_v52, %v574_v3  ;;  %741 = vmatpush.bf16.msrb.mxu3 %v2818_v19  ;;  %v993_v40 = vsel %vm4075_vm1, %v991_v39, 0.0 }
 0x410   :  { %994 = vadd.xlane.f32.xlu1 %v993_v40 }
 0x411   :  { %2559 = vmatmul.msk.bf16.vlgmr.msra.gmra.mxu1 %vm389_vm13, %v576_v12 }
 0x412   :  { %2560 = vmatmul.msk.bf16.vlgmr.msra.gmra.mxu3 %vm389_vm13, %v660_v14  ;;  %v2829_v14 = vld [vmem:[%s3308_s25 + $0x8] sm:$0xff] }
 0x413   :  { %742 = vmatpush.bf16.msrb.mxu3 %v2817_v22 }
 0x417   :  { %743 = vmatpush.bf16.msrb.mxu3 %v2816_v24 }
 0x41b   :  { %744 = vmatpush.bf16.msrb.mxu3 %v2815_v28 }
 0x41f   :  { %745 = vmatpush.bf16.msrb.mxu3 %v2814_v30 }
 0x423   :  { %1084 = vmatpush.bf16.msra.mxu3 %v2829_v14 }
 0x475   :  { %v490_v23 = vpop.f32.mrf.mxu3 }
 0x47b   :  { %v986_v61 = vpop.xlane.xlu1 %985 }
 0x47c   :  { %v988_v59 = vmul.f32 %v986_v61, %v3424_v10 }
 0x47d   :  { %v492_v29 = vpop.f32.mrf.mxu3 }
 0x47e   :  { %v990_v1 = vsub.f32 %v978_v31, %v988_v59 }
 0x480   :  { %v992_v21 = vmul.f32 %v990_v1, %v990_v1 }
 0x482   :  { %v996_v8 = vsel %vm4077_vm7, %v992_v21, 0.0  ;;  %v2823_v21 = vld [vmem:[%s4081_s5 + $0x8] sm:$0xff] }
 0x483   :  { %v995_v52 = vpop.xlane.xlu1 %994  ;;  %849 = vmatpush.bf16.msrb.mxu1 %v2823_v21 }
 0x484   :  { %v999_v11 = vmul.f32 %v995_v52, %v3424_v10 }
 0x485   :  { %v513_v35 = vpop.f32.mrf.mxu3 }
 0x486   :  { %v514_v45 = vadd.f32 %v513_v35, %v490_v23 }
 0x48d   :  { %v515_v41 = vpop.f32.mrf.mxu3 }
 0x48e   :  { %v595_v42 = vpop.f32.mrf.mxu1  ;;  %v516_v46 = vadd.f32 %v515_v41, %v492_v29 }
 0x48f   :  { %v600_v47 = vadd.f32 %v595_v42, %v514_v45 }
 0x495   :  { %v679_v43 = vpop.f32.mrf.mxu3 }
 0x496   :  { %v597_v44 = vpop.f32.mrf.mxu1  ;;  %v684_v55 = vadd.f32 %v679_v43, %v600_v47 }
 0x497   :  { %v601_v48 = vadd.f32 %v597_v44, %v516_v46 }
 0x49d   :  { %v681_v51 = vpop.f32.mrf.mxu3 }
 0x49e   :  { %v685_v56 = vadd.f32 %v681_v51, %v601_v48  ;;  %v2945_v48 = vld [vmem:[%s3298_s27] ss:$0 sm:$0xff]  ;;  %s4097_s27 = sld [smem:[#allocation22_spill]] }
 0x4a0   :  { %v686_v54 = vpack.c.bf16 %v685_v56, %v684_v55 }
 0x4a2   :  { %746 = vmatmul.bf16.vlgmr.msrb.gmra.mxu3 %v686_v54  ;;  %v2946_v54 = vld [vmem:[%s3303_s4] ss:$0 sm:$0xff]  ;;  %s4101_s4 = sld [smem:[#allocation19_spill]] }
 0x4a8   :  { %v2839_v2 = vld [vmem:[%s4101_s4 + $0x8] sm:$0xff] }
 0x525   :  { %v747_v63 = vpop.f32.mrf.mxu3 }
 0x526   :  { %v748_v0 = vadd.f32 %v2944_v62, %v747_v63 }
 0x528   :  { %v752_v4 = vadd.f32 %v748_v0, %v3436_v49  ;;  %v1001_v49 = vadd.f32 1e-05, %v999_v11 }
 0x52a   :  { %v754_v20 = vsel %vm4076_vm4, %v752_v4, 0.0  ;;  %3004 = vrsqrt.f32 %v1001_v49  ;;  %vm1009_vm15 = vweird.f32 %v1001_v49 }
 0x52b   :  { %755 = vadd.xlane.f32.xlu2 %v754_v20 }
 0x52d   :  { %v749_v25 = vpop.f32.mrf.mxu3 }
 0x52e   :  { %v750_v5 = vadd.f32 %v2944_v62, %v749_v25 }
 0x530   :  { %v753_v7 = vadd.f32 %v750_v5, %v3438_v50  ;;  %v3005_v15 = vpop.eup %3004  ;;  %v2828_v50 = vld [vmem:[%s3308_s25] sm:$0xff]  ;;  %s4086_s25 = sld [smem:[#allocation9_spill]] }
 0x531   :  { %v1004_v19 = vmul.f32 %v3005_v15, %v1001_v49  ;;  %1085 = vmatpush.bf16.msra.mxu3 %v2828_v50  ;;  %vm1010_vm1 = vweird.f32 %v3005_v15  ;;  %v2822_v5 = vld [vmem:[%s4081_s5] sm:$0xff] }
 0x532   :  { %v757_v3 = vsel %vm4078_vm11, %v753_v7, 0.0  ;;  %vm1011_vm4 = vmor %vm1009_vm15, %vm1010_vm1  ;;  %850 = vmatpush.bf16.msrb.mxu1 %v2822_v5 }
 0x533   :  { %758 = vadd.xlane.f32.xlu0 %v757_v3  ;;  %997 = vadd.xlane.f32.xlu2 %v996_v8  ;;  %v1005_v24 = vmul.f32 %v3005_v15, %v1004_v19 }
 0x535   :  { %v1006_v16 = vmul.f32 0.5, %v1005_v24  ;;  %v2947_v24 = vld [vmem:[%s4082_s9] ss:$0 sm:$0xff] }
 0x537   :  { %v1007_v40 = vsub.f32 1.5, %v1006_v16 }
 0x539   :  { %v1008_v42 = vmul.f32 %v3005_v15, %v1007_v40 }
 0x53b   :  { %v1012_v45 = vsel %vm1011_vm4, %v3005_v15, %v1008_v42 }
 0x53c   :  { %v1023_v51 = vmul.f32 %v1012_v45, %v3616_v38 }
 0x53e   :  { %v1028_v61 = vmul.f32 %v2945_v48, %v1023_v51 }
 0x540   :  { %v3647_v63 = vadd.f32 %v2946_v54, %v1028_v61 }
 0x59e   :  { %v756_v12 = vpop.xlane.xlu2 %755 }
 0x59f   :  { %v760_v17 = vmul.f32 %v756_v12, %v3424_v10 }
 0x5a1   :  { %v3631_v18 = vsub.f32 %v752_v4, %v760_v17 }
 0x5a3   :  { %v764_v22 = vmul.f32 %v3631_v18, %v3631_v18 }
 0x5a5   :  { %v766_v23 = vsel %vm4079_vm12, %v764_v22, 0.0 }
 0x5a6   :  { %v759_v28 = vpop.xlane.xlu0 %758  ;;  %767 = vadd.xlane.f32.xlu0 %v766_v23  ;;  %v998_v29 = vpop.xlane.xlu2 %997 }
 0x5a7   :  { %v761_v30 = vmul.f32 %v759_v28, %v3424_v10  ;;  %v1000_v31 = vmul.f32 %v998_v29, %v3424_v10 }
 0x5a9   :  { %v3639_v32 = vsub.f32 %v753_v7, %v761_v30  ;;  %v1002_v34 = vadd.f32 1e-05, %v1000_v31  ;;  %v2948_v31 = vld [vmem:[%s4083_s13] ss:$0 sm:$0xff]  ;;  %s3130_s13 = scalar_lea.hbm %s3418_s6, 1 }
 0x5ab   :  { %3006 = vrsqrt.f32 %v1002_v34  ;;  %v765_v35 = vmul.f32 %v3639_v32, %v3639_v32  ;;  %vm1019_vm7 = vweird.f32 %v1002_v34 }
 0x5ad   :  { %v769_v39 = vsel %vm4080_vm14, %v765_v35, 0.0 }
 0x5ae   :  { %770 = vadd.xlane.f32.xlu1 %v769_v39  ;;  %v2827_v39 = vld [vmem:[%s4084_s17 + $0x18] sm:$0xff] }
 0x5af   :  { %911 = vmatpush.bf16.msrb.mxu2 %v2827_v39 }
 0x5b1   :  { %v3007_v41 = vpop.eup %3006 }
 0x5b2   :  { %v1014_v43 = vmul.f32 %v3007_v41, %v1002_v34  ;;  %vm1020_vm11 = vweird.f32 %v3007_v41 }
 0x5b3   :  { %vm1021_vm12 = vmor %vm1019_vm7, %vm1020_vm11 }
 0x5b4   :  { %v1015_v44 = vmul.f32 %v3007_v41, %v1014_v43 }
 0x5b6   :  { %v1016_v46 = vmul.f32 0.5, %v1015_v44 }
 0x5b8   :  { %v1017_v47 = vsub.f32 1.5, %v1016_v46 }
 0x5ba   :  { %v1018_v55 = vmul.f32 %v3007_v41, %v1017_v47 }
 0x5bc   :  { %v1022_v56 = vsel %vm1021_vm12, %v3007_v41, %v1018_v55 }
 0x5bd   :  { %v1024_v62 = vmul.f32 %v1022_v56, %v990_v1 }
 0x5bf   :  { %v1029_v59 = vmul.f32 %v2945_v48, %v1024_v62 }
 0x5c1   :  { %v3649_v0 = vadd.f32 %v2946_v54, %v1029_v59 }
 0x5c3   :  { %v1059_v4 = vpack.c.bf16 %v3649_v0, %v3647_v63 }
 0x5c5   :  { %2627 = vmatmul.msk.bf16.vlgmr.msra.gmra.mxu3 %vm4080_vm14, %v1059_v4 }
 0x619   :  { %v768_v20 = vpop.xlane.xlu0 %767 }
 0x61a   :  { %v772_v38 = vmul.f32 %v768_v20, %v3424_v10 }
 0x61c   :  { %v774_v25 = vadd.f32 1e-05, %v772_v38 }
 0x61e   :  { %3008 = vrsqrt.f32 %v774_v25  ;;  %vm782_vm1 = vweird.f32 %v774_v25 }
 0x621   :  { %v771_v1 = vpop.xlane.xlu1 %770 }
 0x622   :  { %v773_v7 = vmul.f32 %v771_v1, %v3424_v10 }
 0x624   :  { %v3009_v8 = vpop.eup %3008  ;;  %v775_v3 = vadd.f32 1e-05, %v773_v7 }
 0x625   :  { %v777_v52 = vmul.f32 %v3009_v8, %v774_v25  ;;  %vm783_vm15 = vweird.f32 %v3009_v8 }
 0x626   :  { %3010 = vrsqrt.f32 %v775_v3  ;;  %vm784_vm4 = vmor %vm782_vm1, %vm783_vm15  ;;  %vm792_vm11 = vweird.f32 %v775_v3  ;;  %vm903_vm15 = vcmask 523264  }
 0x627   :  { %v778_v11 = vmul.f32 %v3009_v8, %v777_v52  ;;  %vm4088_vm1 = vmmov %vm4080_vm14 }
 0x629   :  { %v779_v49 = vmul.f32 0.5, %v778_v11 }
 0x62b   :  { %v780_v12 = vsub.f32 1.5, %v779_v49 }
 0x62c   :  { %v3011_v14 = vpop.eup %3010 }
 0x62d   :  { %v781_v15 = vmul.f32 %v3009_v8, %v780_v12  ;;  %v787_v17 = vmul.f32 %v3011_v14, %v775_v3  ;;  %vm793_vm7 = vweird.f32 %v3011_v14 }
 0x62e   :  { %vm794_vm12 = vmor %vm792_vm11, %vm793_vm7 }
 0x62f   :  { %v788_v50 = vmul.f32 %v3011_v14, %v787_v17  ;;  %v785_v19 = vsel %vm784_vm4, %v3009_v8, %v781_v15  ;;  %v2826_v17 = vld [vmem:[%s4084_s17 + $0x10] sm:$0xff]  ;;  %vm4089_vm4 = vmmov %vm4088_vm1 }
 0x630   :  { %v796_v28 = vmul.f32 %v785_v19, %v3631_v18  ;;  %v2949_v18 = vld [vmem:[%s4085_s21] ss:$0 sm:$0xff]  ;;  %912 = vmatpush.bf16.msrb.mxu2 %v2826_v17  ;;  %vm4091_vm7 = vmmov %vm4088_vm1 }
 0x631   :  { %v789_v22 = vmul.f32 0.5, %v788_v50  ;;  %v2825_v50 = vld [vmem:[%s4084_s17 + $0x8] sm:$0xff]  ;;  %v2824_v19 = vld [vmem:[%s4084_s17] sm:$0xff]  ;;  %vm4092_vm11 = vmmov %vm4088_vm1 }
 0x632   :  { %v801_v34 = vmul.f32 %v2947_v24, %v796_v28 }
 0x633   :  { %v790_v23 = vsub.f32 1.5, %v789_v22 }
 0x634   :  { %v3663_v40 = vadd.f32 %v2948_v31, %v801_v34  ;;  %913 = vmatpush.bf16.msrb.mxu2 %v2825_v50 }
 0x635   :  { %v791_v29 = vmul.f32 %v3011_v14, %v790_v23 }
 0x637   :  { %v795_v30 = vsel %vm794_vm12, %v3011_v14, %v791_v29 }
 0x638   :  { %v797_v16 = vmul.f32 %v795_v30, %v3639_v32  ;;  %914 = vmatpush.bf16.msrb.mxu2 %v2824_v19 }
 0x63a   :  { %v802_v35 = vmul.f32 %v2947_v24, %v797_v16 }
 0x63c   :  { %v3665_v41 = vadd.f32 %v2948_v31, %v802_v35 }
 0x63e   :  { %v824_v42 = vpack.c.bf16 %v3665_v41, %v3663_v40 }
 0x640   :  { %2601 = vmatmul.msk.bf16.vlgmr.msrb.gmra.mxu1 %vm4080_vm14, %v824_v42 }
 0x648   :  { %v1087_v43 = vpop.f32.mrf.mxu3 }
 0x649   :  { %v1088_v44 = vadd.f32 %v2949_v18, %v1087_v43 }
 0x64b   :  { %v1092_v45 = vpack.c.bf16 %v1088_v44, %v1088_v44 }
 0x64d   :  { %v1155_v32 = vsel %vm3453_vm2, %v1092_v45, 0  ;;  %v1102_v48 = vsel %vm3459_vm5, %v1092_v45, 0  ;;  %v1320_v51 = vsel %vm3473_vm8, %v1092_v45, 0  ;;  %v1106_v54 = vunpack.c.l.b16 %v1092_v45 }
 0x64e   :  { %v1202_v61 = vunpack.c.l.b16 %v1155_v32  ;;  %v1225_v62 = vunpack.c.l.b16 %v1102_v48  ;;  %v1367_v59 = vunpack.c.l.b16 %v1320_v51  ;;  %v1248_v4 = vsel %vm3463_vm6, %v1092_v45, 0 }
 0x64f   :  { %v3690_v52 = vunpack.c.l.b16 %v1248_v4 }
 0x650   :  { %v1089_v46 = vpop.f32.mrf.mxu3 }
 0x651   :  { %v1090_v47 = vadd.f32 %v2949_v18, %v1089_v46 }
 0x653   :  { %v1093_v55 = vpack.c.bf16 %v1090_v47, %v1090_v47  ;;  %v2929_v56 = vpack.i.bf16 %v1090_v47, %v1088_v44 }
 0x655   :  { %2930 = vrot.lane.b32.xlu2 %v2929_v56, %s3185_s0  ;;  %v1156_v20 = vsel %vm3453_vm2, %v1093_v55, 0  ;;  %v1103_v21 = vsel %vm3459_vm5, %v1093_v55, 0  ;;  %v1321_v38 = vsel %vm3473_vm8, %v1093_v55, 0  ;;  %v1107_v25 = vunpack.c.l.b16 %v1093_v55 }
 0x656   :  { %v1203_v5 = vunpack.c.l.b16 %v1156_v20  ;;  %v1226_v1 = vunpack.c.l.b16 %v1103_v21  ;;  %v1368_v7 = vunpack.c.l.b16 %v1321_v38  ;;  %v1249_v8 = vsel %vm3463_vm6, %v1093_v55, 0 }
 0x657   :  { %v3688_v3 = vpack.c.b16 %v1107_v25, %v1106_v54  ;;  %v3692_v11 = vunpack.c.l.b16 %v1249_v8 }
 0x658   :  { %v1204_v49 = vpack.c.b16 %v1203_v5, %v1202_v61  ;;  %v1227_v12 = vpack.c.b16 %v1226_v1, %v1225_v62  ;;  %v1369_v14 = vpack.c.b16 %v1368_v7, %v1367_v59  ;;  %v2950_v62 = vld [vmem:[%s4086_s25] ss:$0 sm:$0xff] }
 0x659   :  { %v1297_v15 = vpack.c.b16 %v3692_v11, %v3690_v52 }
 0x65a   :  { %1216 = vmatpush.bf16.msrb.mxu3 %v1204_v49  ;;  %1239 = vmatpush.bf16.msra.mxu0 %v1227_v12 }
 0x65e   :  { %1381 = vmatpush.bf16.msrb.mxu0 %v1369_v14 }
 0x6af   :  { %v2931_v22 = vpop.permute.xlu2 %2930 }
 0x6b0   :  { %v2933_v23 = vunpack.i.h.bf16 %v2931_v22  ;;  %v2932_v24 = vunpack.i.l.bf16 %v2931_v22 }
 0x6b2   :  { %v1099_v28 = vpack.c.bf16 %v2933_v23, %v2933_v23  ;;  %v1098_v29 = vpack.c.bf16 %v2932_v24, %v2932_v24 }
 0x6b4   :  { %v1100_v30 = vsel %vm3512_vm3, %v1098_v29, 0  ;;  %v1101_v31 = vsel %vm3512_vm3, %v1099_v28, 0  ;;  %v1153_v34 = vsel %vm3526_vm10, %v1098_v29, 0  ;;  %v1154_v16 = vsel %vm3526_vm10, %v1099_v28, 0 }
 0x6b5   :  { %v1112_v35 = vunpack.c.l.b16 %v1100_v30  ;;  %v1113_v39 = vunpack.c.l.b16 %v1101_v31  ;;  %v1159_v42 = vunpack.c.l.b16 %v1153_v34  ;;  %v1160_v18 = vunpack.c.l.b16 %v1154_v16 }
 0x6b6   :  { %v1318_v43 = vsel %vm3522_vm9, %v1098_v29, 0  ;;  %v1319_v44 = vsel %vm3522_vm9, %v1099_v28, 0  ;;  %v1246_v45 = vsel %vm3518_vm0, %v1098_v29, 0  ;;  %v1247_v46 = vsel %vm3518_vm0, %v1099_v28, 0 }
 0x6b7   :  { %v1114_v47 = vpack.c.b16 %v1113_v39, %v1112_v35  ;;  %v1161_v32 = vpack.c.b16 %v1160_v18, %v1159_v42  ;;  %v1324_v48 = vunpack.c.l.b16 %v1318_v43  ;;  %v1325_v51 = vunpack.c.l.b16 %v1319_v44 }
 0x6b8   :  { %v1252_v55 = vunpack.c.l.b16 %v1246_v45  ;;  %v1253_v56 = vunpack.c.l.b16 %v1247_v46 }
 0x6b9   :  { %1123 = vmatpush.bf16.xpose.msra.mxu1 %v1114_v47  ;;  %1170 = vmatpush.bf16.xpose.msra.mxu2 %v1161_v32  ;;  %v1326_v54 = vpack.c.b16 %v1325_v51, %v1324_v48 }
 0x6ba   :  { %v1254_v61 = vpack.c.b16 %v1253_v56, %v1252_v55 }
 0x6bb   :  { %1335 = vmatpush.bf16.xpose.msra.mxu3 %v1326_v54 }
 0x6bd   :  { %v852_v59 = vpop.f32.mrf.mxu1 }
 0x6be   :  { %v853_v4 = vadd.f32 %v2950_v62, %v852_v59 }
 0x6c0   :  { %v857_v20 = vmul.f32 %v853_v4, %v853_v4  ;;  %1124 = vmatmul.bf16.vlgmr.msra.gmra.mxu1 %v3688_v3 }
 0x6c1   :  { %1263 = vmatpush.bf16.xpose.msrb.mxu1 %v1254_v61 }
 0x6c2   :  { %v859_v21 = vmul.f32 %v857_v20, %v853_v4 }
 0x6c4   :  { %v861_v38 = vmul.f32 0.044715, %v859_v21 }
 0x6c5   :  { %v854_v25 = vpop.f32.mrf.mxu1 }
 0x6c6   :  { %v863_v5 = vadd.f32 %v861_v38, %v853_v4  ;;  %v855_v1 = vadd.f32 %v2950_v62, %v854_v25 }
 0x6c8   :  { %v865_v7 = vmul.f32 0.7978846, %v863_v5  ;;  %v858_v8 = vmul.f32 %v855_v1, %v855_v1 }
 0x6ca   :  { %v860_v49 = vmul.f32 %v858_v8, %v855_v1  ;;  %3012 = vtanh.f32 %v865_v7 }
 0x6cc   :  { %v862_v12 = vmul.f32 0.044715, %v860_v49 }
 0x6ce   :  { %v864_v14 = vadd.f32 %v862_v12, %v855_v1 }
 0x6d0   :  { %v866_v17 = vmul.f32 0.7978846, %v864_v14  ;;  %1264 = vmatmul.bf16.vlgmr.msrb.gmra.mxu1 %v3688_v3  ;;  %v3013_v50 = vpop.eup %3012 }
 0x6d1   :  { %v869_v19 = vadd.f32 1.0, %v3013_v50 }
 0x6d2   :  { %3014 = vtanh.f32 %v866_v17 }
 0x6d3   :  { %v871_v23 = vmul.f32 0.5, %v869_v19 }
 0x6d5   :  { %v873_v29 = vmul.f32 %v871_v23, %v853_v4 }
 0x6d8   :  { %v3015_v22 = vpop.eup %3014 }
 0x6d9   :  { %v870_v24 = vadd.f32 1.0, %v3015_v22 }
 0x6db   :  { %v872_v28 = vmul.f32 0.5, %v870_v24 }
 0x6dd   :  { %v874_v30 = vmul.f32 %v872_v28, %v855_v1 }
 0x6df   :  { %v875_v31 = vpack.c.bf16 %v874_v30, %v873_v29 }
 0x6e1   :  { %2618 = vmatmul.msk.bf16.vlgmr.msrb.gmra.mxu2 %vm903_vm15, %v875_v31 }
 0x6e2   :  { %1309 = vmatpush.bf16.msrb.mxu2 %v1297_v15 }
 0x6f1   :  { %1171 = vmatmul.bf16.vlgmr.msra.gmra.mxu2 %v3688_v3 }
 0x6f2   :  { %1566 = vmatpush.bf16.msra.mxu2 %v2839_v2 }
 0x73d   :  { %v1125_v34 = vpop.f32.mrf.mxu1 }
 0x73e   :  { %v1126_v62 = vadd.f32 %v1125_v34, %v3554_v6 }
 0x740   :  { %v1130_v20 = vsel %vm389_vm13, %v1126_v62, -inf }
 0x745   :  { %v1127_v16 = vpop.f32.mrf.mxu1 }
 0x746   :  { %v1128_v38 = vadd.f32 %v1127_v16, %v3558_v9 }
 0x748   :  { %v1133_v5 = vsel %vm389_vm13, %v1128_v38, -inf }
 0x74d   :  { %v1265_v35 = vpop.f32.mrf.mxu1 }
 0x74e   :  { %v1266_v39 = vadd.f32 %v1265_v35, %v3554_v6 }
 0x750   :  { %v1270_v42 = vsel %vm389_vm13, %v1266_v39, -inf }
 0x751   :  { %1271 = vmax.xlane.f32.xlu2 %v1270_v42 }
 0x755   :  { %v1267_v21 = vpop.f32.mrf.mxu1 }
 0x756   :  { %v1268_v25 = vadd.f32 %v1267_v21, %v3558_v9 }
 0x758   :  { %v1273_v1 = vsel %vm389_vm13, %v1268_v25, -inf }
 0x764   :  { %v3725_v18 = vpop.f32.mrf.mxu2 }
 0x76c   :  { %v3727_v43 = vpop.f32.mrf.mxu2 }
 0x774   :  { %v1172_v44 = vpop.f32.mrf.mxu2 }
 0x775   :  { %v1173_v45 = vadd.f32 %v1172_v44, %v3554_v6 }
 0x777   :  { %v1177_v52 = vsel %vm389_vm13, %v1173_v45, -inf }
 0x778   :  { %1178 = vmax.xlane.f32.xlu0 %v1177_v52 }
 0x77c   :  { %v1174_v11 = vpop.f32.mrf.mxu2 }
 0x77d   :  { %v1175_v15 = vadd.f32 %v1174_v11, %v3558_v9 }
 0x77f   :  { %v1180_v46 = vsel %vm389_vm13, %v1175_v15, -inf }
 0x780   :  { %1181 = vmax.xlane.f32.xlu1 %v1180_v46 }
 0x7c4   :  { %v1272_v28 = vpop.xlane.xlu2 %1271 }
 0x7c5   :  { %v1276_v34 = vsub.f32 %v1266_v39, %v1272_v28 }
 0x7c7   :  { %v1278_v44 = vmul.f32 1.442695, %v1276_v34 }
 0x7eb   :  { %v1179_v47 = vpop.xlane.xlu0 %1178 }
 0x7ec   :  { %v1183_v32 = vsub.f32 %v1173_v45, %v1179_v47 }
 0x7ee   :  { %v1185_v48 = vmul.f32 1.442695, %v1183_v32 }
 0x7f0   :  { %3016 = vpow2.f32 %v1185_v48 }
 0x7f3   :  { %v1182_v51 = vpop.xlane.xlu1 %1181 }
 0x7f4   :  { %v1184_v55 = vsub.f32 %v1175_v15, %v1182_v51 }
 0x7f6   :  { %v3017_v56 = vpop.eup %3016  ;;  %v1187_v54 = vmul.f32 1.442695, %v1184_v55 }
 0x7f7   :  { %v1189_v61 = vsel %vm389_vm13, %v3017_v56, 0.0 }
 0x7f8   :  { %3018 = vpow2.f32 %v1187_v54  ;;  %1190 = vadd.xlane.f32.xlu0 %v1189_v61 }
 0x7fe   :  { %v3019_v59 = vpop.eup %3018 }
 0x7ff   :  { %v1192_v4 = vsel %vm389_vm13, %v3019_v59, 0.0 }
 0x800   :  { %1193 = vadd.xlane.f32.xlu1 %v1192_v4  ;;  %1131 = vmax.xlane.f32.xlu0 %v1130_v20 }
 0x808   :  { %1134 = vmax.xlane.f32.xlu1 %v1133_v5  ;;  %1274 = vmax.xlane.f32.xlu0 %v1273_v1 }
 0x86b   :  { %v1191_v7 = vpop.xlane.xlu0 %1190 }
 0x86c   :  { %3020 = vrcp.f32 %v1191_v7 }
 0x872   :  { %v3021_v49 = vpop.eup %3020 }
 0x873   :  { %v1194_v8 = vpop.xlane.xlu1 %1193  ;;  %v1197_v14 = vmul.f32 %v3021_v49, %v3017_v56  ;;  %v1132_v22 = vpop.xlane.xlu0 %1131 }
 0x874   :  { %3022 = vrcp.f32 %v1194_v8  ;;  %v1136_v24 = vsub.f32 %v1126_v62, %v1132_v22 }
 0x876   :  { %v1138_v29 = vmul.f32 1.442695, %v1136_v24 }
 0x878   :  { %3024 = vpow2.f32 %v1138_v29 }
 0x879   :  { %3026 = vpow2.f32 %v1278_v44 }
 0x87a   :  { %v3023_v12 = vpop.eup %3022 }
 0x87b   :  { %v1198_v17 = vmul.f32 %v3023_v12, %v3019_v59  ;;  %v1135_v30 = vpop.xlane.xlu1 %1134  ;;  %v1275_v45 = vpop.xlane.xlu0 %1274  ;;  %v2951_v59 = vld [vmem:[%s4087_s29] ss:$0 sm:$0xff] }
 0x87c   :  { %v1137_v35 = vsub.f32 %v1128_v38, %v1135_v30  ;;  %v1277_v46 = vsub.f32 %v1268_v25, %v1275_v45  ;;  %v917_v5 = vadd.f32 %v2951_v59, %v3725_v18  ;;  %v919_v12 = vadd.f32 %v2951_v59, %v3727_v43  ;;  %v2834_v59 = vld [vmem:[%s4090_s3 + $0x20] sm:$0xff] }
 0x87d   :  { %v1199_v50 = vpack.c.bf16 %v1198_v17, %v1197_v14 }
 0x87e   :  { %v3025_v52 = vpop.eup %3024  ;;  %v921_v8 = vadd.f32 %v917_v5, %v3663_v40  ;;  %v922_v28 = vadd.f32 %v919_v12, %v3665_v41 }
 0x87f   :  { %2628 = vmatmul.msk.bf16.vlgmr.msrb.gmra.mxu3 %vm389_vm13, %v1199_v50  ;;  %v1142_v39 = vsel %vm389_vm13, %v3025_v52, 0.0  ;;  %v3027_v32 = vpop.eup %3026 }
 0x880   :  { %v1282_v55 = vsel %vm389_vm13, %v3027_v32, 0.0  ;;  %v923_v17 = vsel %vm4088_vm1, %v921_v8, 0.0 }
 0x88f   :  { %1336 = vmatmul.bf16.vlgmr.msra.gmra.mxu3 %v3688_v3  ;;  %v1140_v3 = vmul.f32 1.442695, %v1137_v35 }
 0x891   :  { %3028 = vpow2.f32 %v1140_v3 }
 0x897   :  { %v3029_v48 = vpop.eup %3028 }
 0x898   :  { %v1145_v51 = vsel %vm389_vm13, %v3029_v48, 0.0 }
 0x902   :  { %v3743_v19 = vpop.f32.mrf.mxu3 }
 0x90a   :  { %v3745_v23 = vpop.f32.mrf.mxu3 }
 0x912   :  { %v1337_v31 = vpop.f32.mrf.mxu3 }
 0x913   :  { %v1338_v16 = vadd.f32 %v1337_v31, %v3554_v6  ;;  %v1280_v6 = vmul.f32 1.442695, %v1277_v46  ;;  %v926_v31 = vsel %vm4089_vm4, %v922_v28, 0.0 }
 0x915   :  { %v1342_v42 = vsel %vm389_vm13, %v1338_v16, -inf  ;;  %3030 = vpow2.f32 %v1280_v6 }
 0x916   :  { %1343 = vmax.xlane.f32.xlu1 %v1342_v42 }
 0x91a   :  { %v1339_v11 = vpop.f32.mrf.mxu3 }
 0x91b   :  { %v1340_v15 = vadd.f32 %v1339_v11, %v3558_v9  ;;  %v3031_v9 = vpop.eup %3030 }
 0x91c   :  { %v1285_v56 = vsel %vm389_vm13, %v3031_v9, 0.0 }
 0x91d   :  { %v1345_v47 = vsel %vm389_vm13, %v1340_v15, -inf }
 0x91e   :  { %1346 = vmax.xlane.f32.xlu0 %v1345_v47  ;;  %1143 = vadd.xlane.f32.xlu1 %v1142_v39 }
 0x926   :  { %1146 = vadd.xlane.f32.xlu0 %v1145_v51  ;;  %1283 = vadd.xlane.f32.xlu1 %v1282_v55 }
 0x92e   :  { %1286 = vadd.xlane.f32.xlu0 %v1285_v56 }
 0x989   :  { %v1344_v54 = vpop.xlane.xlu1 %1343 }
 0x98a   :  { %v1348_v61 = vsub.f32 %v1338_v16, %v1344_v54 }
 0x98c   :  { %v1350_v62 = vmul.f32 1.442695, %v1348_v61 }
 0x98e   :  { %3032 = vpow2.f32 %v1350_v62  ;;  %v2835_v62 = vld [vmem:[%s4090_s3 + $0x28] sm:$0xff] }
 0x991   :  { %v1347_v4 = vpop.xlane.xlu0 %1346  ;;  %v1144_v21 = vpop.xlane.xlu1 %1143 }
 0x992   :  { %v1349_v20 = vsub.f32 %v1340_v15, %v1347_v4  ;;  %v2833_v4 = vld [vmem:[%s4090_s3 + $0x18] sm:$0xff] }
 0x994   :  { %v3033_v38 = vpop.eup %3032  ;;  %v1352_v25 = vmul.f32 1.442695, %v1349_v20  ;;  %v2832_v20 = vld [vmem:[%s4090_s3 + $0x10] sm:$0xff] }
 0x995   :  { %v1354_v1 = vsel %vm389_vm13, %v3033_v38, 0.0 }
 0x996   :  { %3034 = vpow2.f32 %v1352_v25  ;;  %1355 = vadd.xlane.f32.xlu1 %v1354_v1 }
 0x997   :  { %3036 = vrcp.f32 %v1144_v21  ;;  %v2831_v21 = vld [vmem:[%s4090_s3 + $0x8] sm:$0xff] }
 0x999   :  { %v1147_v7 = vpop.xlane.xlu0 %1146  ;;  %v1284_v14 = vpop.xlane.xlu1 %1283 }
 0x99a   :  { %3038 = vrcp.f32 %v1147_v7  ;;  %v2841_v7 = vld [vmem:[%s4093_s8 + $0x8] sm:$0xff] }
 0x99b   :  { %3040 = vrcp.f32 %v1284_v14  ;;  %1599 = vmatpush.bf16.msrb.mxu3 %v2841_v7  ;;  %v2955_v7 = vld [vmem:[%s4097_s27] ss:$0 sm:$0xff] }
 0x99c   :  { %v3035_v49 = vpop.eup %3034 }
 0x99d   :  { %v1357_v50 = vsel %vm389_vm13, %v3035_v49, 0.0  ;;  %v3037_v18 = vpop.eup %3036 }
 0x99e   :  { %924 = vadd.xlane.f32.xlu1 %v923_v17  ;;  %1358 = vadd.xlane.f32.xlu0 %v1357_v50  ;;  %v1150_v29 = vmul.f32 %v3037_v18, %v3025_v52 }
 0x9a0   :  { %v3039_v22 = vpop.eup %3038 }
 0x9a1   :  { %v1287_v24 = vpop.xlane.xlu0 %1286  ;;  %v1151_v30 = vmul.f32 %v3039_v22, %v3029_v48  ;;  %v3041_v43 = vpop.eup %3040  ;;  %v2837_v48 = vld [vmem:[%s4090_s3 + $0x38] sm:$0xff] }
 0x9a2   :  { %3042 = vrcp.f32 %v1287_v24  ;;  %v1290_v16 = vmul.f32 %v3041_v43, %v3027_v32  ;;  %1442 = vmatpush.bf16.msra.mxu1 %v2837_v48 }
 0x9a3   :  { %v1152_v40 = vpack.c.bf16 %v1151_v30, %v1150_v29 }
 0x9a5   :  { %2629 = vmatmul.msk.bf16.vlgmr.msra.gmra.mxu0 %vm389_vm13, %v1152_v40 }
 0x9a6   :  { %927 = vadd.xlane.f32.xlu0 %v926_v31 }
 0x9a8   :  { %v3043_v34 = vpop.eup %3042 }
 0x9a9   :  { %v1291_v35 = vmul.f32 %v3043_v34, %v3031_v9  ;;  %v2836_v9 = vld [vmem:[%s4090_s3 + $0x30] sm:$0xff] }
 0x9aa   :  { %1443 = vmatpush.bf16.msra.mxu1 %v2836_v9 }
 0x9ab   :  { %v1292_v42 = vpack.c.bf16 %v1291_v35, %v1290_v16 }
 0x9ad   :  { %2630 = vmatmul.msk.bf16.vlgmr.msrb.gmra.mxu2 %vm389_vm13, %v1292_v42 }
 0x9ae   :  { %1444 = vmatpush.bf16.msra.mxu1 %v2835_v62 }
 0x9b2   :  { %1445 = vmatpush.bf16.msra.mxu1 %v2834_v59 }
 0x9b6   :  { %1446 = vmatpush.bf16.msra.mxu1 %v2833_v4  ;;  %v2954_v4 = vld [vmem:[%s4096_s24] ss:$0 sm:$0xff] }
 0x9ba   :  { %1447 = vmatpush.bf16.msra.mxu1 %v2832_v20 }
 0x9be   :  { %1448 = vmatpush.bf16.msra.mxu1 %v2831_v21 }
 0xa09   :  { %v1356_v44 = vpop.xlane.xlu1 %1355 }
 0xa0a   :  { %3044 = vrcp.f32 %v1356_v44 }
 0xa10   :  { %v3045_v11 = vpop.eup %3044 }
 0xa11   :  { %v925_v41 = vpop.xlane.xlu1 %924  ;;  %v1359_v3 = vpop.xlane.xlu0 %1358  ;;  %v1362_v39 = vmul.f32 %v3045_v11, %v3033_v38  ;;  %v2830_v38 = vld [vmem:[%s4090_s3] sm:$0xff] }
 0xa12   :  { %v929_v45 = vmul.f32 %v925_v41, %v3424_v10  ;;  %3046 = vrcp.f32 %v1359_v3  ;;  %1449 = vmatpush.bf16.msra.mxu1 %v2830_v38 }
 0xa14   :  { %v3767_v52 = vsub.f32 %v921_v8, %v929_v45 }
 0xa16   :  { %v933_v15 = vmul.f32 %v3767_v52, %v3767_v52 }
 0xa18   :  { %v3047_v46 = vpop.eup %3046  ;;  %v935_v47 = vsel %vm4091_vm7, %v933_v15, 0.0 }
 0xa19   :  { %v1363_v6 = vmul.f32 %v3047_v46, %v3035_v49  ;;  %936 = vadd.xlane.f32.xlu2 %v935_v47  ;;  %v928_v32 = vpop.xlane.xlu0 %927  ;;  %v2840_v49 = vld [vmem:[%s4093_s8] sm:$0xff] }
 0xa1a   :  { %v930_v51 = vmul.f32 %v928_v32, %v3424_v10  ;;  %1600 = vmatpush.bf16.msrb.mxu3 %v2840_v49 }
 0xa1b   :  { %v1364_v55 = vpack.c.bf16 %v1363_v6, %v1362_v39 }
 0xa1c   :  { %v3775_v56 = vsub.f32 %v922_v28, %v930_v51  ;;  %v2953_v51 = vld [vmem:[%s4095_s19] ss:$0 sm:$0xff] }
 0xa1d   :  { %2631 = vmatmul.msk.bf16.vlgmr.msrb.gmra.mxu0 %vm389_vm13, %v1364_v55 }
 0xa1e   :  { %v934_v54 = vmul.f32 %v3775_v56, %v3775_v56 }
 0xa20   :  { %v938_v61 = vsel %vm4092_vm11, %v934_v54, 0.0 }
 0xa21   :  { %939 = vadd.xlane.f32.xlu1 %v938_v61 }
 0xa22   :  { %v1241_v25 = vpop.f32.mrf.mxu0 }
 0xa23   :  { %v1242_v34 = vadd.f32 %v1241_v25, %v3743_v19  ;;  %v2952_v19 = vld [vmem:[%s4094_s14] ss:$0 sm:$0xff] }
 0xa2a   :  { %v1243_v12 = vpop.f32.mrf.mxu0 }
 0xa2b   :  { %v1244_v16 = vadd.f32 %v1243_v12, %v3745_v23 }
 0xa30   :  { %v1311_v14 = vpop.f32.mrf.mxu2 }
 0xa31   :  { %v1316_v44 = vadd.f32 %v1311_v14, %v1242_v34 }
 0xa38   :  { %v1313_v40 = vpop.f32.mrf.mxu2 }
 0xa39   :  { %v1317_v41 = vadd.f32 %v1313_v40, %v1244_v16 }
 0xa8c   :  { %v937_v5 = vpop.xlane.xlu2 %936 }
 0xa8d   :  { %v941_v1 = vmul.f32 %v937_v5, %v3424_v10 }
 0xa8f   :  { %v943_v8 = vadd.f32 1e-05, %v941_v1 }
 0xa91   :  { %3048 = vrsqrt.f32 %v943_v8  ;;  %vm951_vm14 = vweird.f32 %v943_v8 }
 0xa94   :  { %v940_v17 = vpop.xlane.xlu1 %939 }
 0xa95   :  { %v942_v50 = vmul.f32 %v940_v17, %v3424_v10 }
 0xa97   :  { %v3049_v18 = vpop.eup %3048  ;;  %v944_v22 = vadd.f32 1e-05, %v942_v50 }
 0xa98   :  { %v946_v24 = vmul.f32 %v3049_v18, %v943_v8  ;;  %vm952_vm12 = vweird.f32 %v3049_v18 }
 0xa99   :  { %3050 = vrsqrt.f32 %v944_v22  ;;  %vm953_vm1 = vmor %vm951_vm14, %vm952_vm12  ;;  %vm961_vm7 = vweird.f32 %v944_v22  ;;  %vm4098_vm12 = vcmask 261120  }
 0xa9a   :  { %v947_v28 = vmul.f32 %v3049_v18, %v946_v24  ;;  %v1383_v29 = vpop.f32.mrf.mxu0  ;;  %vm4099_vm14 = vmmov %vm4098_vm12 }
 0xa9b   :  { %v1388_v11 = vadd.f32 %v1383_v29, %v1316_v44 }
 0xa9c   :  { %v948_v30 = vmul.f32 0.5, %v947_v28 }
 0xa9e   :  { %v949_v31 = vsub.f32 1.5, %v948_v30 }
 0xa9f   :  { %v3051_v43 = vpop.eup %3050 }
 0xaa0   :  { %v950_v35 = vmul.f32 %v3049_v18, %v949_v31  ;;  %v956_v42 = vmul.f32 %v3051_v43, %v944_v22  ;;  %vm962_vm4 = vweird.f32 %v3051_v43 }
 0xaa1   :  { %vm963_vm11 = vmor %vm961_vm7, %vm962_vm4 }
 0xaa2   :  { %v957_v3 = vmul.f32 %v3051_v43, %v956_v42  ;;  %v1385_v45 = vpop.f32.mrf.mxu0  ;;  %v954_v46 = vsel %vm953_vm1, %v3049_v18, %v950_v35  ;;  %vm4100_vm1 = vmmov %vm4098_vm12 }
 0xaa3   :  { %v1389_v15 = vadd.f32 %v1385_v45, %v1317_v41  ;;  %v965_v23 = vmul.f32 %v954_v46, %v3767_v52  ;;  %v2838_v45 = vld [vmem:[%s4101_s4] sm:$0xff]  ;;  %vm4107_vm4 = vmmov %vm4100_vm1 }
 0xaa4   :  { %v958_v47 = vmul.f32 0.5, %v957_v3  ;;  %1567 = vmatpush.bf16.msra.mxu2 %v2838_v45  ;;  %v2956_v45 = vld [vmem:[%s4104_s28] ss:$0 sm:$0xff]  ;;  %vm4111_vm7 = vmmov %vm4100_vm1 }
 0xaa5   :  { %v1390_v39 = vpack.c.bf16 %v1389_v15, %v1388_v11  ;;  %v970_v55 = vmul.f32 %v2952_v19, %v965_v23 }
 0xaa6   :  { %v959_v6 = vsub.f32 1.5, %v958_v47 }
 0xaa7   :  { %1450 = vmatmul.bf16.vlgmr.msra.gmra.mxu1 %v1390_v39  ;;  %v975_v61 = vadd.f32 %v2953_v51, %v970_v55 }
 0xaa8   :  { %v960_v32 = vmul.f32 %v3051_v43, %v959_v6 }
 0xaaa   :  { %v964_v48 = vsel %vm963_vm11, %v3051_v43, %v960_v32  ;;  %vm4113_vm11 = vmmov %vm4100_vm1 }
 0xaab   :  { %v966_v9 = vmul.f32 %v964_v48, %v3775_v56 }
 0xaad   :  { %v971_v54 = vmul.f32 %v2952_v19, %v966_v9 }
 0xaaf   :  { %v976_v62 = vadd.f32 %v2953_v51, %v971_v54 }
 0xab1   :  { %v1574_v59 = vpack.c.bf16 %v976_v62, %v975_v61 }
 0xab3   :  { %2681 = vmatmul.msk.bf16.vlgmr.msrb.gmra.mxu3 %vm4098_vm12, %v1574_v59  ;;  %vm4114_vm12 = vmmov %vm4100_vm1 }
 0xb24   :  { %v1451_v20 = vpop.f32.mrf.mxu1 }
 0xb25   :  { %v1452_v21 = vadd.f32 %v2954_v4, %v1451_v20 }
 0xb27   :  { %v1456_v52 = vadd.f32 %v1452_v21, %v3647_v63 }
 0xb29   :  { %v1458_v38 = vsel %vm4099_vm14, %v1456_v52, 0.0 }
 0xb2a   :  { %1459 = vadd.xlane.f32.xlu0 %v1458_v38 }
 0xb2c   :  { %v1453_v25 = vpop.f32.mrf.mxu1 }
 0xb2d   :  { %v1454_v5 = vadd.f32 %v2954_v4, %v1453_v25 }
 0xb2f   :  { %v1457_v1 = vadd.f32 %v1454_v5, %v3649_v0 }
 0xb31   :  { %v1461_v56 = vsel %vm4100_vm1, %v1457_v1, 0.0 }
 0xb32   :  { %1462 = vadd.xlane.f32.xlu2 %v1461_v56 }
 0xb36   :  { %v1602_v8 = vpop.f32.mrf.mxu3 }
 0xb37   :  { %v1603_v49 = vadd.f32 %v2955_v7, %v1602_v8 }
 0xb39   :  { %v1607_v12 = vpack.c.bf16 %v1603_v49, %v1603_v49 }
 0xb3b   :  { %v1665_v17 = vsel %vm3453_vm2, %v1607_v12, 0  ;;  %v1618_v63 = vsel %vm3459_vm5, %v1607_v12, 0  ;;  %v1758_v18 = vsel %vm3463_vm6, %v1607_v12, 0  ;;  %v1830_v0 = vsel %vm3473_vm8, %v1607_v12, 0 }
 0xb3c   :  { %v1712_v24 = vunpack.c.l.b16 %v1665_v17  ;;  %v1735_v28 = vunpack.c.l.b16 %v1618_v63  ;;  %v3812_v29 = vunpack.c.l.b16 %v1758_v18  ;;  %v3814_v30 = vunpack.c.l.b16 %v1830_v0 }
 0xb3e   :  { %v1604_v14 = vpop.f32.mrf.mxu3 }
 0xb3f   :  { %v1605_v50 = vadd.f32 %v2955_v7, %v1604_v14 }
 0xb41   :  { %v1608_v22 = vpack.c.bf16 %v1605_v50, %v1605_v50  ;;  %v2934_v60 = vpack.i.bf16 %v1605_v50, %v1603_v49 }
 0xb43   :  { %v1666_v40 = vsel %vm3453_vm2, %v1608_v22, 0  ;;  %v1619_v31 = vsel %vm3459_vm5, %v1608_v22, 0  ;;  %v1759_v43 = vsel %vm3463_vm6, %v1608_v22, 0  ;;  %v1831_v34 = vsel %vm3473_vm8, %v1608_v22, 0  ;;  %vm4102_vm2 = vmmov %vm4100_vm1 }
 0xb44   :  { %v1713_v16 = vunpack.c.l.b16 %v1666_v40  ;;  %v1736_v35 = vunpack.c.l.b16 %v1619_v31  ;;  %v3824_v42 = vunpack.c.l.b16 %v1759_v43  ;;  %v3826_v44 = vunpack.c.l.b16 %v1831_v34  ;;  %vm4103_vm5 = vmmov %vm4100_vm1 }
 0xb46   :  { %v1714_v41 = vpack.c.b16 %v1713_v16, %v1712_v24  ;;  %v1737_v57 = vpack.c.b16 %v1736_v35, %v1735_v28  ;;  %v1807_v3 = vpack.c.b16 %v3824_v42, %v3812_v29  ;;  %v1879_v58 = vpack.c.b16 %v3826_v44, %v3814_v30 }
 0xb48   :  { %1726 = vmatpush.bf16.msra.mxu3 %v1714_v41 }
 0xb4a   :  { %2935 = vrot.lane.b32.xlu2 %v2934_v60, %s3185_s0  ;;  %s4142_s0 = sld [smem:[#allocation31_spill]] }
 0xb9d   :  { %v1460_v11 = vpop.xlane.xlu0 %1459 }
 0xb9e   :  { %v1464_v15 = vmul.f32 %v1460_v11, %v3424_v10 }
 0xba0   :  { %v3836_v46 = vsub.f32 %v1456_v52, %v1464_v15 }
 0xba2   :  { %v1468_v47 = vmul.f32 %v3836_v46, %v3836_v46 }
 0xba4   :  { %v1470_v39 = vsel %vm4102_vm2, %v1468_v47, 0.0 }
 0xba5   :  { %v1463_v6 = vpop.xlane.xlu2 %1462  ;;  %1471 = vadd.xlane.f32.xlu1 %v1470_v39  ;;  %v2957_v39 = vld [vmem:[%s4105_s1] ss:$0 sm:$0xff] }
 0xba6   :  { %v1465_v19 = vmul.f32 %v1463_v6, %v3424_v10 }
 0xba8   :  { %v3842_v23 = vsub.f32 %v1457_v1, %v1465_v19 }
 0xbaa   :  { %v1469_v32 = vmul.f32 %v3842_v23, %v3842_v23 }
 0xbac   :  { %v1473_v48 = vsel %vm4103_vm5, %v1469_v32, 0.0 }
 0xbad   :  { %v2936_v51 = vpop.permute.xlu2 %2935  ;;  %1474 = vadd.xlane.f32.xlu0 %v1473_v48 }
 0xbae   :  { %v2938_v55 = vunpack.i.h.bf16 %v2936_v51  ;;  %v2937_v9 = vunpack.i.l.bf16 %v2936_v51 }
 0xbb0   :  { %v1615_v54 = vpack.c.bf16 %v2938_v55, %v2938_v55  ;;  %v1614_v61 = vpack.c.bf16 %v2937_v9, %v2937_v9  ;;  %v2958_v9 = vld [vmem:[%s4106_s2] ss:$0 sm:$0xff] }
 0xbb2   :  { %v1616_v62 = vsel %vm3512_vm3, %v1614_v61, 0  ;;  %v1617_v59 = vsel %vm3512_vm3, %v1615_v54, 0  ;;  %v1663_v4 = vsel %vm3526_vm10, %v1614_v61, 0  ;;  %v1664_v20 = vsel %vm3526_vm10, %v1615_v54, 0 }
 0xbb3   :  { %v1622_v21 = vunpack.c.l.b16 %v1616_v62  ;;  %v1623_v52 = vunpack.c.l.b16 %v1617_v59  ;;  %v1669_v38 = vunpack.c.l.b16 %v1663_v4  ;;  %v1670_v25 = vunpack.c.l.b16 %v1664_v20 }
 0xbb4   :  { %v1756_v5 = vsel %vm3518_vm0, %v1614_v61, 0  ;;  %v1757_v1 = vsel %vm3518_vm0, %v1615_v54, 0  ;;  %v1828_v27 = vsel %vm3522_vm9, %v1614_v61, 0  ;;  %v1829_v56 = vsel %vm3522_vm9, %v1615_v54, 0 }
 0xbb5   :  { %v1624_v7 = vpack.c.b16 %v1623_v52, %v1622_v21  ;;  %v1671_v8 = vpack.c.b16 %v1670_v25, %v1669_v38  ;;  %v1762_v37 = vunpack.c.l.b16 %v1756_v5  ;;  %v1763_v49 = vunpack.c.l.b16 %v1757_v1 }
 0xbb6   :  { %v1834_v12 = vunpack.c.l.b16 %v1828_v27  ;;  %v1835_v14 = vunpack.c.l.b16 %v1829_v56 }
 0xbb7   :  { %1633 = vmatpush.bf16.xpose.msra.mxu0 %v1624_v7  ;;  %1680 = vmatpush.bf16.xpose.msrb.mxu2 %v1671_v8  ;;  %v1764_v17 = vpack.c.b16 %v1763_v49, %v1762_v37 }
 0xbb8   :  { %v1836_v50 = vpack.c.b16 %v1835_v14, %v1834_v12 }
 0xbb9   :  { %1773 = vmatpush.bf16.xpose.msrb.mxu1 %v1764_v17 }
 0xbba   :  { %1845 = vmatpush.bf16.xpose.msrb.mxu3 %v1836_v50 }
 0xbbf   :  { %1749 = vmatpush.bf16.msrb.mxu0 %v1737_v57 }
 0xc18   :  { %v1472_v33 = vpop.xlane.xlu1 %1471 }
 0xc19   :  { %v1476_v63 = vmul.f32 %v1472_v33, %v3424_v10 }
 0xc1b   :  { %v1478_v18 = vadd.f32 1e-05, %v1476_v63 }
 0xc1d   :  { %3052 = vrsqrt.f32 %v1478_v18  ;;  %vm1486_vm6 = vweird.f32 %v1478_v18 }
 0xc20   :  { %v1475_v36 = vpop.xlane.xlu0 %1474 }
 0xc21   :  { %v1477_v0 = vmul.f32 %v1475_v36, %v3424_v10 }
 0xc23   :  { %v3053_v22 = vpop.eup %3052  ;;  %v1479_v24 = vadd.f32 1e-05, %v1477_v0 }
 0xc24   :  { %v1481_v28 = vmul.f32 %v3053_v22, %v1478_v18  ;;  %vm1487_vm0 = vweird.f32 %v3053_v22 }
 0xc25   :  { %3054 = vrsqrt.f32 %v1479_v24  ;;  %vm1488_vm8 = vmor %vm1486_vm6, %vm1487_vm0  ;;  %vm1496_vm9 = vweird.f32 %v1479_v24 }
 0xc26   :  { %v1482_v40 = vmul.f32 %v3053_v22, %v1481_v28 }
 0xc28   :  { %v1483_v31 = vmul.f32 0.5, %v1482_v40 }
 0xc2a   :  { %v1484_v43 = vsub.f32 1.5, %v1483_v31 }
 0xc2b   :  { %v3055_v34 = vpop.eup %3054 }
 0xc2c   :  { %v1485_v16 = vmul.f32 %v3053_v22, %v1484_v43  ;;  %v1491_v35 = vmul.f32 %v3055_v34, %v1479_v24  ;;  %vm1497_vm3 = vweird.f32 %v3055_v34 }
 0xc2d   :  { %vm1498_vm10 = vmor %vm1496_vm9, %vm1497_vm3 }
 0xc2e   :  { %v1492_v41 = vmul.f32 %v3055_v34, %v1491_v35  ;;  %v1489_v57 = vsel %vm1488_vm8, %v3053_v22, %v1485_v16  ;;  %vm4119_vm8 = vmmov %vm4107_vm4 }
 0xc2f   :  { %v1500_v11 = vmul.f32 %v1489_v57, %v3836_v46  ;;  %vm4121_vm3 = vmmov %vm4107_vm4 }
 0xc30   :  { %v1493_v60 = vmul.f32 0.5, %v1492_v41  ;;  %vm4122_vm9 = vmmov %vm4121_vm3 }
 0xc31   :  { %v1505_v6 = vmul.f32 %v2956_v45, %v1500_v11 }
 0xc32   :  { %v1494_v2 = vsub.f32 1.5, %v1493_v60 }
 0xc33   :  { %v3869_v48 = vadd.f32 %v2957_v39, %v1505_v6 }
 0xc34   :  { %v1495_v15 = vmul.f32 %v3055_v34, %v1494_v2 }
 0xc36   :  { %v1499_v47 = vsel %vm1498_vm10, %v3055_v34, %v1495_v15  ;;  %vm4124_vm10 = vmmov %vm4121_vm3 }
 0xc37   :  { %v1501_v19 = vmul.f32 %v1499_v47, %v3842_v23 }
 0xc39   :  { %v1506_v32 = vmul.f32 %v2956_v45, %v1501_v19 }
 0xc3b   :  { %v3871_v51 = vadd.f32 %v2957_v39, %v1506_v32 }
 0xc3d   :  { %v1541_v55 = vpack.c.bf16 %v3871_v51, %v3869_v48 }
 0xc3f   :  { %2672 = vmatmul.msk.bf16.vlgmr.msra.gmra.mxu2 %vm4107_vm4, %v1541_v55  ;;  %vm4125_vm4 = vmmov %vm4121_vm3 }
 0xc40   :  { %1819 = vmatpush.bf16.msra.mxu2 %v1807_v3 }
 0xcc2   :  { %v1569_v46 = vpop.f32.mrf.mxu2 }
 0xcc3   :  { %v1570_v61 = vadd.f32 %v2958_v9, %v1569_v46 }
 0xcca   :  { %v1571_v54 = vpop.f32.mrf.mxu2 }
 0xccb   :  { %v1572_v62 = vadd.f32 %v2958_v9, %v1571_v54 }
 0xccd   :  { %v1609_v23 = vpack.c.bf16 %v1572_v62, %v1570_v61 }
 0xccf   :  { %1634 = vmatmul.bf16.vlgmr.msra.gmra.mxu0 %v1609_v23  ;;  %1681 = vmatmul.bf16.vlgmr.msrb.gmra.mxu2 %v1609_v23 }
 0xcd0   :  { %1774 = vmatmul.bf16.vlgmr.msrb.gmra.mxu1 %v1609_v23  ;;  %1891 = vmatpush.bf16.msra.mxu0 %v1879_v58 }
 0xd4c   :  { %v1635_v27 = vpop.f32.mrf.mxu0 }
 0xd4d   :  { %v1775_v59 = vpop.f32.mrf.mxu1  ;;  %v1636_v8 = vadd.f32 %v1635_v27, %v3563_v13 }
 0xd4e   :  { %v1776_v4 = vadd.f32 %v1775_v59, %v3563_v13 }
 0xd4f   :  { %v1640_v12 = vsel %vm389_vm13, %v1636_v8, -inf }
 0xd50   :  { %v1780_v20 = vsel %vm389_vm13, %v1776_v4, -inf }
 0xd51   :  { %1781 = vmax.xlane.f32.xlu2 %v1780_v20 }
 0xd52   :  { %v1682_v29 = vpop.f32.mrf.mxu2 }
 0xd53   :  { %v1683_v42 = vadd.f32 %v1682_v29, %v3563_v13 }
 0xd54   :  { %v1637_v14 = vpop.f32.mrf.mxu0 }
 0xd55   :  { %v1687_v3 = vsel %vm389_vm13, %v1683_v42, -inf  ;;  %v1777_v17 = vpop.f32.mrf.mxu1  ;;  %v1638_v50 = vadd.f32 %v1637_v14, %v3574_v26 }
 0xd56   :  { %1688 = vmax.xlane.f32.xlu1 %v1687_v3  ;;  %v1778_v33 = vadd.f32 %v1777_v17, %v3574_v26 }
 0xd57   :  { %v1643_v63 = vsel %vm389_vm13, %v1638_v50, -inf }
 0xd58   :  { %v1783_v18 = vsel %vm389_vm13, %v1778_v33, -inf }
 0xd5a   :  { %v1684_v21 = vpop.f32.mrf.mxu2 }
 0xd5b   :  { %v1685_v52 = vadd.f32 %v1684_v21, %v3574_v26 }
 0xd5d   :  { %v1690_v38 = vsel %vm389_vm13, %v1685_v52, -inf }
 0xd5e   :  { %1691 = vmax.xlane.f32.xlu0 %v1690_v38 }
 0xdc4   :  { %v1782_v41 = vpop.xlane.xlu2 %1781 }
 0xdc5   :  { %v1786_v45 = vsub.f32 %v1776_v4, %v1782_v41  ;;  %v2846_v41 = vld [vmem:[%s4108_s7 + $0x20] sm:$0xff] }
 0xdc7   :  { %v1788_v39 = vmul.f32 1.442695, %v1786_v45  ;;  %v2842_v45 = vld [vmem:[%s4108_s7] sm:$0xff] }
 0xdc9   :  { %v1689_v30 = vpop.xlane.xlu1 %1688 }
 0xdca   :  { %v1693_v44 = vsub.f32 %v1683_v42, %v1689_v30 }
 0xdcc   :  { %v1695_v58 = vmul.f32 1.442695, %v1693_v44 }
 0xdce   :  { %3056 = vpow2.f32 %v1695_v58 }
 0xdd1   :  { %v1692_v25 = vpop.xlane.xlu0 %1691 }
 0xdd2   :  { %v1694_v5 = vsub.f32 %v1685_v52, %v1692_v25 }
 0xdd4   :  { %v3057_v1 = vpop.eup %3056  ;;  %v1697_v56 = vmul.f32 1.442695, %v1694_v5 }
 0xdd5   :  { %v1699_v7 = vsel %vm389_vm13, %v3057_v1, 0.0 }
 0xdd6   :  { %3058 = vpow2.f32 %v1697_v56  ;;  %1700 = vadd.xlane.f32.xlu1 %v1699_v7 }
 0xddc   :  { %v3059_v37 = vpop.eup %3058 }
 0xddd   :  { %v1702_v49 = vsel %vm389_vm13, %v3059_v37, 0.0 }
 0xdde   :  { %1703 = vadd.xlane.f32.xlu0 %v1702_v49  ;;  %1641 = vmax.xlane.f32.xlu1 %v1640_v12 }
 0xde6   :  { %1644 = vmax.xlane.f32.xlu0 %v1643_v63  ;;  %1784 = vmax.xlane.f32.xlu1 %v1783_v18 }
 0xe49   :  { %v1701_v36 = vpop.xlane.xlu1 %1700 }
 0xe4a   :  { %3060 = vrcp.f32 %v1701_v36 }
 0xe50   :  { %v3061_v22 = vpop.eup %3060 }
 0xe51   :  { %v1704_v0 = vpop.xlane.xlu0 %1703  ;;  %v1707_v28 = vmul.f32 %v3061_v22, %v3057_v1  ;;  %v1642_v34 = vpop.xlane.xlu1 %1641 }
 0xe52   :  { %3062 = vrcp.f32 %v1704_v0  ;;  %v1646_v35 = vsub.f32 %v1636_v8, %v1642_v34  ;;  %v2848_v34 = vld [vmem:[%s4108_s7 + $0x30] sm:$0xff] }
 0xe54   :  { %v1648_v57 = vmul.f32 1.442695, %v1646_v35  ;;  %v2847_v35 = vld [vmem:[%s4108_s7 + $0x28] sm:$0xff] }
 0xe56   :  { %3064 = vpow2.f32 %v1648_v57  ;;  %v2845_v57 = vld [vmem:[%s4108_s7 + $0x18] sm:$0xff] }
 0xe57   :  { %3066 = vpow2.f32 %v1788_v39 }
 0xe58   :  { %v3063_v24 = vpop.eup %3062 }
 0xe59   :  { %v1708_v40 = vmul.f32 %v3063_v24, %v3059_v37  ;;  %v1645_v60 = vpop.xlane.xlu0 %1644  ;;  %v1785_v19 = vpop.xlane.xlu1 %1784 }
 0xe5a   :  { %v1647_v15 = vsub.f32 %v1638_v50, %v1645_v60  ;;  %v1787_v9 = vsub.f32 %v1778_v33, %v1785_v19  ;;  %v2844_v60 = vld [vmem:[%s4108_s7 + $0x10] sm:$0xff] }
 0xe5b   :  { %v1709_v31 = vpack.c.bf16 %v1708_v40, %v1707_v28  ;;  %v2849_v40 = vld [vmem:[%s4108_s7 + $0x38] sm:$0xff] }
 0xe5c   :  { %v1650_v6 = vmul.f32 1.442695, %v1647_v15  ;;  %v3065_v32 = vpop.eup %3064  ;;  %1952 = vmatpush.bf16.msra.mxu1 %v2849_v40 }
 0xe5d   :  { %2682 = vmatmul.msk.bf16.vlgmr.msra.gmra.mxu3 %vm389_vm13, %v1709_v31  ;;  %v1652_v61 = vsel %vm389_vm13, %v3065_v32, 0.0  ;;  %v3067_v62 = vpop.eup %3066 }
 0xe5e   :  { %3068 = vpow2.f32 %v1650_v6  ;;  %v1792_v4 = vsel %vm389_vm13, %v3067_v62, 0.0 }
 0xe60   :  { %1953 = vmatpush.bf16.msra.mxu1 %v2848_v34 }
 0xe64   :  { %1954 = vmatpush.bf16.msra.mxu1 %v2847_v35  ;;  %v2961_v35 = vld [vmem:[%s4116_s16] ss:$0 sm:$0xff] }
 0xe68   :  { %1955 = vmatpush.bf16.msra.mxu1 %v2846_v41 }
 0xe6c   :  { %1956 = vmatpush.bf16.msra.mxu1 %v2845_v57 }
 0xe6d   :  { %1846 = vmatmul.bf16.vlgmr.msrb.gmra.mxu3 %v1609_v23  ;;  %v3069_v23 = vpop.eup %3068 }
 0xe6e   :  { %v1655_v59 = vsel %vm389_vm13, %v3069_v23, 0.0 }
 0xe70   :  { %1957 = vmatpush.bf16.msra.mxu1 %v2844_v60 }
 0xee0   :  { %v3898_v43 = vpop.f32.mrf.mxu3 }
 0xee8   :  { %v3900_v16 = vpop.f32.mrf.mxu3 }
 0xef0   :  { %v1847_v2 = vpop.f32.mrf.mxu3 }
 0xef1   :  { %v1848_v11 = vadd.f32 %v1847_v2, %v3563_v13  ;;  %v1790_v13 = vmul.f32 1.442695, %v1787_v9  ;;  %v2843_v2 = vld [vmem:[%s4108_s7 + $0x8] sm:$0xff] }
 0xef2   :  { %1958 = vmatpush.bf16.msra.mxu1 %v2843_v2 }
 0xef3   :  { %v1852_v47 = vsel %vm389_vm13, %v1848_v11, -inf  ;;  %3070 = vpow2.f32 %v1790_v13 }
 0xef4   :  { %1853 = vmax.xlane.f32.xlu0 %v1852_v47 }
 0xef6   :  { %1959 = vmatpush.bf16.msra.mxu1 %v2842_v45 }
 0xef8   :  { %v1849_v55 = vpop.f32.mrf.mxu3 }
 0xef9   :  { %v1850_v46 = vadd.f32 %v1849_v55, %v3574_v26  ;;  %v3071_v20 = vpop.eup %3070 }
 0xefa   :  { %v1795_v26 = vsel %vm389_vm13, %v3071_v20, 0.0 }
 0xefb   :  { %v1855_v54 = vsel %vm389_vm13, %v1850_v46, -inf }
 0xefc   :  { %1856 = vmax.xlane.f32.xlu1 %v1855_v54  ;;  %1653 = vadd.xlane.f32.xlu0 %v1652_v61 }
 0xf04   :  { %1656 = vadd.xlane.f32.xlu1 %v1655_v59  ;;  %1793 = vadd.xlane.f32.xlu0 %v1792_v4 }
 0xf0c   :  { %1796 = vadd.xlane.f32.xlu1 %v1795_v26 }
 0xf67   :  { %v1854_v29 = vpop.xlane.xlu0 %1853 }
 0xf68   :  { %v1858_v42 = vsub.f32 %v1848_v11, %v1854_v29 }
 0xf6a   :  { %v1860_v3 = vmul.f32 1.442695, %v1858_v42 }
 0xf6c   :  { %3072 = vpow2.f32 %v1860_v3 }
 0xf6f   :  { %v1857_v21 = vpop.xlane.xlu1 %1856  ;;  %v1654_v38 = vpop.xlane.xlu0 %1653 }
 0xf70   :  { %v1859_v52 = vsub.f32 %v1850_v46, %v1857_v21 }
 0xf72   :  { %v3073_v30 = vpop.eup %3072  ;;  %v1862_v44 = vmul.f32 1.442695, %v1859_v52 }
 0xf73   :  { %v1864_v58 = vsel %vm389_vm13, %v3073_v30, 0.0 }
 0xf74   :  { %3074 = vpow2.f32 %v1862_v44  ;;  %1865 = vadd.xlane.f32.xlu0 %v1864_v58 }
 0xf75   :  { %3076 = vrcp.f32 %v1654_v38 }
 0xf77   :  { %v1657_v25 = vpop.xlane.xlu1 %1656  ;;  %v1794_v1 = vpop.xlane.xlu0 %1793 }
 0xf78   :  { %3078 = vrcp.f32 %v1657_v25 }
 0xf79   :  { %3080 = vrcp.f32 %v1794_v1  ;;  %v2851_v1 = vld [vmem:[%s4112_s11 + $0x8] sm:$0xff] }
 0xf7a   :  { %v3075_v5 = vpop.eup %3074  ;;  %2063 = vmatpush.bf16.msrb.mxu2 %v2851_v1 }
 0xf7b   :  { %v1867_v27 = vsel %vm389_vm13, %v3075_v5, 0.0  ;;  %v3077_v56 = vpop.eup %3076 }
 0xf7c   :  { %1868 = vadd.xlane.f32.xlu1 %v1867_v27  ;;  %v1660_v37 = vmul.f32 %v3077_v56, %v3065_v32  ;;  %v2850_v56 = vld [vmem:[%s4112_s11] sm:$0xff] }
 0xf7e   :  { %v3079_v7 = vpop.eup %3078  ;;  %2064 = vmatpush.bf16.msrb.mxu2 %v2850_v56 }
 0xf7f   :  { %v1797_v8 = vpop.xlane.xlu1 %1796  ;;  %v1661_v49 = vmul.f32 %v3079_v7, %v3069_v23  ;;  %v3081_v14 = vpop.eup %3080 }
 0xf80   :  { %3082 = vrcp.f32 %v1797_v8  ;;  %v1800_v50 = vmul.f32 %v3081_v14, %v3067_v62  ;;  %v2959_v62 = vld [vmem:[%s4109_s10] ss:$0 sm:$0xff] }
 0xf81   :  { %v1662_v12 = vpack.c.bf16 %v1661_v49, %v1660_v37 }
 0xf83   :  { %2683 = vmatmul.msk.bf16.vlgmr.msrb.gmra.mxu0 %vm389_vm13, %v1662_v12 }
 0xf86   :  { %v3083_v17 = vpop.eup %3082 }
 0xf87   :  { %v1801_v33 = vmul.f32 %v3083_v17, %v3071_v20 }
 0xf89   :  { %v1802_v63 = vpack.c.bf16 %v1801_v33, %v1800_v50 }
 0xf8b   :  { %2684 = vmatmul.msk.bf16.vlgmr.msra.gmra.mxu2 %vm389_vm13, %v1802_v63 }
 0xfe7   :  { %v1866_v18 = vpop.xlane.xlu0 %1865 }
 0xfe8   :  { %3084 = vrcp.f32 %v1866_v18 }
 0xfee   :  { %v3085_v0 = vpop.eup %3084 }
 0xfef   :  { %v1869_v36 = vpop.xlane.xlu1 %1868  ;;  %v1872_v24 = vmul.f32 %v3085_v0, %v3073_v30 }
 0xff0   :  { %3086 = vrcp.f32 %v1869_v36 }
 0xff6   :  { %v3087_v22 = vpop.eup %3086 }
 0xff7   :  { %v1873_v28 = vmul.f32 %v3087_v22, %v3075_v5 }
 0xff9   :  { %v1874_v31 = vpack.c.bf16 %v1873_v28, %v1872_v24  ;;  %v2960_v28 = vld [vmem:[%s4115_s15] ss:$0 sm:$0xff] }
 0xffb   :  { %2685 = vmatmul.msk.bf16.vlgmr.msra.gmra.mxu0 %vm389_vm13, %v1874_v31  ;;  %vm4110_vm13 = vmmov %vm4100_vm1 }
0x1000   :  { %v1751_v11 = vpop.f32.mrf.mxu0 }
0x1001   :  { %v1752_v19 = vadd.f32 %v1751_v11, %v3898_v43 }
0x1008   :  { %v1753_v15 = vpop.f32.mrf.mxu0 }
0x1009   :  { %v1754_v32 = vadd.f32 %v1753_v15, %v3900_v16  ;;  %v2855_v15 = vld [vmem:[%s4117_s18 + $0x18] sm:$0xff] }
0x100a   :  { %2124 = vmatpush.bf16.msra.mxu3 %v2855_v15 }
0x100e   :  { %v1821_v47 = vpop.f32.mrf.mxu2 }
0x100f   :  { %v1826_v55 = vadd.f32 %v1821_v47, %v1752_v19  ;;  %v2854_v47 = vld [vmem:[%s4117_s18 + $0x10] sm:$0xff] }
0x1010   :  { %2125 = vmatpush.bf16.msra.mxu3 %v2854_v47  ;;  %v3979_v47 = vld [vmem:[%s4129_s26] sm:$0xff] }
0x1016   :  { %v1823_v6 = vpop.f32.mrf.mxu2 }
0x1017   :  { %v1827_v46 = vadd.f32 %v1823_v6, %v1754_v32  ;;  %v2853_v6 = vld [vmem:[%s4117_s18 + $0x8] sm:$0xff] }
0x1018   :  { %2126 = vmatpush.bf16.msra.mxu3 %v2853_v6  ;;  %v2867_v6 = vld [vmem:[%s3408_s12 + $0x58] sm:$0xff] }
0x1078   :  { %v1893_v39 = vpop.f32.mrf.mxu0 }
0x1079   :  { %v1898_v54 = vadd.f32 %v1893_v39, %v1826_v55  ;;  %v2962_v39 = vld [vmem:[%s4118_s22] ss:$0 sm:$0xff] }
0x107a   :  { %v2852_v55 = vld [vmem:[%s4117_s18] sm:$0xff] }
0x107b   :  { %2127 = vmatpush.bf16.msra.mxu3 %v2852_v55  ;;  %v2858_v55 = vld [vmem:[%s3408_s12 + $0x10] sm:$0xff] }
0x1080   :  { %v1895_v9 = vpop.f32.mrf.mxu0 }
0x1081   :  { %v1899_v61 = vadd.f32 %v1895_v9, %v1827_v46 }
0x1083   :  { %v1900_v13 = vpack.c.bf16 %v1899_v61, %v1898_v54 }
0x1085   :  { %1960 = vmatmul.bf16.vlgmr.msra.gmra.mxu1 %v1900_v13 }
0x1102   :  { %v1961_v23 = vpop.f32.mrf.mxu1 }
0x1103   :  { %v1962_v59 = vadd.f32 %v2959_v62, %v1961_v23 }
0x1105   :  { %v1966_v4 = vadd.f32 %v1962_v59, %v3869_v48 }
0x1107   :  { %v1968_v20 = vsel %vm4110_vm13, %v1966_v4, 0.0  ;;  %vm4126_vm13 = vmmov %vm4121_vm3 }
0x1108   :  { %1969 = vadd.xlane.f32.xlu0 %v1968_v20 }
0x110a   :  { %v1963_v26 = vpop.f32.mrf.mxu1 }
0x110b   :  { %v1964_v29 = vadd.f32 %v2959_v62, %v1963_v26 }
0x110d   :  { %v1967_v43 = vadd.f32 %v1964_v29, %v3871_v51 }
0x110f   :  { %v1971_v16 = vsel %vm4111_vm7, %v1967_v43, 0.0  ;;  %vm4127_vm7 = vmmov %vm4121_vm3 }
0x1110   :  { %1972 = vadd.xlane.f32.xlu2 %v1971_v16 }
0x117b   :  { %v1970_v42 = vpop.xlane.xlu0 %1969 }
0x117c   :  { %v1974_v3 = vmul.f32 %v1970_v42, %v3424_v10 }
0x117e   :  { %v1976_v21 = vsub.f32 %v1966_v4, %v1974_v3 }
0x1180   :  { %v1978_v52 = vmul.f32 %v1976_v21, %v1976_v21 }
0x1182   :  { %v1980_v38 = vsel %vm4113_vm11, %v1978_v52, 0.0  ;;  %vm4128_vm11 = vmmov %vm4121_vm3 }
0x1183   :  { %v1973_v48 = vpop.xlane.xlu2 %1972  ;;  %1981 = vadd.xlane.f32.xlu1 %v1980_v38 }
0x1184   :  { %v1975_v30 = vmul.f32 %v1973_v48, %v3424_v10 }
0x1186   :  { %v1977_v44 = vsub.f32 %v1967_v43, %v1975_v30 }
0x1188   :  { %v1979_v58 = vmul.f32 %v1977_v44, %v1977_v44 }
0x118a   :  { %v1983_v51 = vsel %vm4114_vm12, %v1979_v58, 0.0  ;;  %vm4130_vm12 = vmmov %vm4121_vm3 }
0x118b   :  { %1984 = vadd.xlane.f32.xlu0 %v1983_v51 }
0x11f6   :  { %v1982_v25 = vpop.xlane.xlu1 %1981 }
0x11f7   :  { %v1986_v5 = vmul.f32 %v1982_v25, %v3424_v10 }
0x11f9   :  { %v1988_v27 = vadd.f32 1e-05, %v1986_v5 }
0x11fb   :  { %3088 = vrsqrt.f32 %v1988_v27  ;;  %vm1996_vm1 = vweird.f32 %v1988_v27 }
0x11fe   :  { %v1985_v7 = vpop.xlane.xlu0 %1984 }
0x11ff   :  { %v1987_v8 = vmul.f32 %v1985_v7, %v3424_v10 }
0x1201   :  { %v3089_v37 = vpop.eup %3088  ;;  %v1989_v49 = vadd.f32 1e-05, %v1987_v8 }
0x1202   :  { %v1991_v12 = vmul.f32 %v3089_v37, %v1988_v27  ;;  %vm1997_vm14 = vweird.f32 %v3089_v37 }
0x1203   :  { %3090 = vrsqrt.f32 %v1989_v49  ;;  %vm1998_vm2 = vmor %vm1996_vm1, %vm1997_vm14  ;;  %vm2006_vm0 = vweird.f32 %v1989_v49 }
0x1204   :  { %v1992_v14 = vmul.f32 %v3089_v37, %v1991_v12  ;;  %vm4131_vm14 = vmmov %vm4121_vm3 }
0x1205   :  { %vm4132_vm1 = vmmov %vm4121_vm3 }
0x1206   :  { %v1993_v17 = vmul.f32 0.5, %v1992_v14 }
0x1208   :  { %v1994_v50 = vsub.f32 1.5, %v1993_v17 }
0x1209   :  { %v3091_v33 = vpop.eup %3090 }
0x120a   :  { %v1995_v63 = vmul.f32 %v3089_v37, %v1994_v50  ;;  %v2001_v18 = vmul.f32 %v3091_v33, %v1989_v49  ;;  %vm2007_vm5 = vweird.f32 %v3091_v33  ;;  %v2863_v50 = vld [vmem:[%s3408_s12 + $0x38] sm:$0xff] }
0x120b   :  { %vm2008_vm6 = vmor %vm2006_vm0, %vm2007_vm5 }
0x120c   :  { %v2002_v36 = vmul.f32 %v3091_v33, %v2001_v18  ;;  %v1999_v0 = vsel %vm1998_vm2, %v3089_v37, %v1995_v63  ;;  %v2334_v18 = vsel %vm4124_vm10, %v2863_v50, 0  ;;  %vm4133_vm2 = vmmov %vm4132_vm1 }
0x120d   :  { %v2010_v40 = vmul.f32 %v1999_v0, %v1976_v21  ;;  %2360 = vmatpush.bf16.xpose.msrb.mxu0 %v2334_v18  ;;  %vm4134_vm5 = vmmov %vm4132_vm1 }
0x120e   :  { %v2003_v22 = vmul.f32 0.5, %v2002_v36  ;;  %vm4135_vm0 = vmmov %vm4132_vm1 }
0x120f   :  { %v2015_v41 = vmul.f32 %v2960_v28, %v2010_v40  ;;  %vm4141_vm10 = vmmov %vm4135_vm0 }
0x1210   :  { %v2004_v24 = vsub.f32 1.5, %v2003_v22  ;;  %v2862_v22 = vld [vmem:[%s3408_s12 + $0x30] sm:$0xff] }
0x1211   :  { %v2020_v2 = vadd.f32 %v2961_v35, %v2015_v41  ;;  %v2869_v41 = vld [vmem:[%s3408_s12 + $0x68] sm:$0xff] }
0x1212   :  { %v2005_v31 = vmul.f32 %v3091_v33, %v2004_v24  ;;  %v2870_v24 = vld [vmem:[%s3408_s12 + $0x70] sm:$0xff] }
0x1214   :  { %v2009_v34 = vsel %vm2008_vm6, %v3091_v33, %v2005_v31  ;;  %v2871_v33 = vld [vmem:[%s3408_s12 + $0x78] sm:$0xff]  ;;  %v2331_v31 = vsel %vm4127_vm7, %v2862_v22, 0  ;;  %vm4136_vm6 = vmmov %vm4135_vm0 }
0x1215   :  { %v2011_v57 = vmul.f32 %v2009_v34, %v1977_v44  ;;  %v2963_v44 = vld [vmem:[%s4120_s23] ss:$0 sm:$0xff]  ;;  %v2358_v36 = vsel %vm4125_vm4, %v2871_v33, 0  ;;  %v2355_v34 = vsel %vm4128_vm11, %v2870_v24, 0  ;;  %2361 = vmatpush.bf16.xpose.msrb.mxu0 %v2331_v31 }
0x1216   :  { %2374 = vmatpush.bf16.xpose.msra.mxu2 %v2358_v36  ;;  %v2223_v36 = vld [vmem:[%s3413_s20] sm:$0x3]  ;;  %s2495_s20 = sshll.u32 %s3418_s6, 4  ;;  %s2496_s20 = int_to_ptr.hbm [resolvable:$true] %s2495_s20 }
0x1217   :  { %v2016_v60 = vmul.f32 %v2960_v28, %v2011_v57  ;;  %v2226_v24 = vperm.slane %v2223_v36, 1  ;;  %s3126_s5 = sshra.s32 %s2496_s20, 4  ;;  %s3127_s5 = int_to_ptr.hbm [resolvable:$true] %s3126_s5 }
0x1218   :  { %s3128_s9 = scalar_lea.hbm %s3127_s5, 1  ;;  %p3131_p1 = scmp.lt.s32.totalorder %s3127_s5, %s3418_s6 }
0x1219   :  { %v2021_v45 = vadd.f32 %v2961_v35, %v2016_v60  ;;  %v2861_v35 = vld [vmem:[%s3408_s12 + $0x28] sm:$0xff]  ;;  %v2352_v60 = vsel %vm4131_vm14, %v2869_v41, 0  ;;  %p3129_p0 = scmp.ne.s32.totalorder %s3127_s5, %s3128_s9  ;;  %p3132_p2 = scmp.lt.s32.totalorder %s3130_s13, %s3128_s9 }
0x121a   :  { %v2328_v57 = vsel %vm4130_vm12, %v2861_v35, 0 }
0x121b   :  { %v2038_v11 = vpack.c.bf16 %v2021_v45, %v2020_v2  ;;  %p3133_p3 = por %p3132_p2, %p3131_p1 }
0x121d   :  { %2726 = vmatmul.msk.bf16.vlgmr.msrb.gmra.mxu2 %vm4119_vm8, %v2038_v11  ;;  %2362 = vmatpush.bf16.xpose.msrb.mxu0 %v2328_v57  ;;  %vm4137_vm8 = vmmov %vm4135_vm0  ;;  %p3134_p4 = pnand %p3133_p3, %p3129_p0 }
0x121e   :  { %2375 = vmatpush.bf16.xpose.msra.mxu2 %v2355_v34 }
0x1226   :  { %2376 = vmatpush.bf16.xpose.msra.mxu2 %v2352_v60 }
0x12a0   :  { %v2066_v19 = vpop.f32.mrf.mxu2 }
0x12a1   :  { %v2067_v32 = vadd.f32 %v2962_v39, %v2066_v19 }
0x12a3   :  { %v2071_v46 = vmul.f32 %v2067_v32, %v2067_v32 }
0x12a5   :  { %v2073_v9 = vmul.f32 %v2071_v46, %v2067_v32  ;;  %v2866_v46 = vld [vmem:[%s3408_s12 + $0x50] sm:$0xff] }
0x12a7   :  { %v2075_v54 = vmul.f32 0.044715, %v2073_v9  ;;  %v2319_v9 = vsel %vm4136_vm6, %v2858_v55, 0 }
0x12a8   :  { %v2068_v61 = vpop.f32.mrf.mxu2 }
0x12a9   :  { %v2077_v13 = vadd.f32 %v2075_v54, %v2067_v32  ;;  %v2069_v62 = vadd.f32 %v2962_v39, %v2068_v61  ;;  %v2859_v39 = vld [vmem:[%s3408_s12 + $0x18] sm:$0xff]  ;;  %v2343_v54 = vsel %vm4137_vm8, %v2866_v46, 0  ;;  %v2857_v61 = vld [vmem:[%s3408_s12 + $0x8] sm:$0xff] }
0x12aa   :  { %v2322_v19 = vsel %vm4134_vm5, %v2859_v39, 0 }
0x12ab   :  { %v2079_v23 = vmul.f32 0.7978846, %v2077_v13  ;;  %v2072_v59 = vmul.f32 %v2069_v62, %v2069_v62  ;;  %v2865_v13 = vld [vmem:[%s3408_s12 + $0x48] sm:$0xff] }
0x12ad   :  { %v2074_v4 = vmul.f32 %v2072_v59, %v2069_v62  ;;  %3092 = vtanh.f32 %v2079_v23 }
0x12af   :  { %v2076_v20 = vmul.f32 0.044715, %v2074_v4  ;;  %v2856_v4 = vld [vmem:[%s3408_s12] sm:$0xff] }
0x12b1   :  { %v2078_v26 = vadd.f32 %v2076_v20, %v2069_v62  ;;  %v2864_v20 = vld [vmem:[%s3408_s12 + $0x40] sm:$0xff] }
0x12b3   :  { %v2080_v29 = vmul.f32 0.7978846, %v2078_v26  ;;  %v3093_v43 = vpop.eup %3092 }
0x12b4   :  { %v2083_v16 = vadd.f32 1.0, %v3093_v43  ;;  %v2337_v43 = vsel %vm4141_vm10, %v2864_v20, 0 }
0x12b5   :  { %3094 = vtanh.f32 %v2080_v29 }
0x12b6   :  { %v2085_v3 = vmul.f32 0.5, %v2083_v16 }
0x12b8   :  { %v2087_v38 = vmul.f32 %v2085_v3, %v2067_v32  ;;  %v2346_v32 = vsel %vm4135_vm0, %v2867_v6, 0 }
0x12bb   :  { %v3095_v42 = vpop.eup %3094 }
0x12bc   :  { %v2084_v21 = vadd.f32 1.0, %v3095_v42 }
0x12be   :  { %v2086_v52 = vmul.f32 0.5, %v2084_v21 }
0x12c0   :  { %v2088_v48 = vmul.f32 %v2086_v52, %v2069_v62 }
0x12c2   :  { %v2089_v30 = vpack.c.bf16 %v2088_v48, %v2087_v38 }
0x12c4   :  { %2743 = vmatmul.msk.bf16.vlgmr.msra.gmra.mxu3 %vm903_vm15, %v2089_v30  ;;  %vm4123_vm15 = vmmov %vm4121_vm3 }
0x1347   :  { %v2129_v58 = vpop.f32.mrf.mxu3 }
0x1348   :  { %v2130_v51 = vadd.f32 %v2963_v44, %v2129_v58 }
0x134a   :  { %v2134_v25 = vadd.f32 %v2130_v51, %v2020_v2  ;;  %v2860_v2 = vld [vmem:[%s3408_s12 + $0x20] sm:$0xff] }
0x134b   :  { %v2325_v11 = vsel %vm4132_vm1, %v2860_v2, 0  ;;  %vm4143_vm1 = vmmov %vm4135_vm0  ;;  %v2419_v2 = vld [vmem:[%s4129_s26 + $0x8] sm:$0xff] }
0x134c   :  { %v2136_v5 = vsel %vm4121_vm3, %v2134_v25, 0.0  ;;  %2363 = vmatpush.bf16.xpose.msrb.mxu0 %v2325_v11  ;;  %vm4138_vm3 = vmmov %vm4135_vm0 }
0x134d   :  { %2137 = vadd.xlane.f32.xlu2 %v2136_v5  ;;  %v2316_v62 = vsel %vm4138_vm3, %v2857_v61, 0  ;;  %vm2441_vm3 = vcmp.ne.s32.totalorder %v3979_v47, 4294967196 }
0x134f   :  { %v2131_v1 = vpop.f32.mrf.mxu3 }
0x1350   :  { %v2132_v27 = vadd.f32 %v2963_v44, %v2131_v1 }
0x1352   :  { %v2135_v56 = vadd.f32 %v2132_v27, %v2021_v45  ;;  %v2868_v45 = vld [vmem:[%s3408_s12 + $0x60] sm:$0xff] }
0x1353   :  { %v2349_v15 = vsel %vm4133_vm2, %v2868_v45, 0  ;;  %vm4144_vm2 = vmmov %vm4135_vm0 }
0x1354   :  { %v2139_v7 = vsel %vm4122_vm9, %v2135_v56, 0.0  ;;  %2377 = vmatpush.bf16.xpose.msra.mxu2 %v2349_v15  ;;  %2364 = vmatpush.bf16.xpose.msrb.mxu0 %v2322_v19  ;;  %vm4139_vm9 = vmmov %vm4135_vm0 }
0x1355   :  { %2140 = vadd.xlane.f32.xlu1 %v2139_v7  ;;  %v2340_v23 = vsel %vm4139_vm9, %v2865_v13, 0  ;;  %vm2442_vm9 = vcmp.ne.s32.totalorder %v2419_v2, 4294967196 }
0x135c   :  { %2378 = vmatpush.bf16.xpose.msra.mxu2 %v2346_v32  ;;  %2365 = vmatpush.bf16.xpose.msrb.mxu0 %v2319_v9 }
0x1364   :  { %2379 = vmatpush.bf16.xpose.msra.mxu2 %v2343_v54  ;;  %2366 = vmatpush.bf16.xpose.msrb.mxu0 %v2316_v62 }
0x136c   :  { %2380 = vmatpush.bf16.xpose.msra.mxu2 %v2340_v23 }
0x1374   :  { %2381 = vmatpush.bf16.xpose.msra.mxu2 %v2337_v43 }
0x13c0   :  { %v2138_v8 = vpop.xlane.xlu2 %2137 }
0x13c1   :  { %v2142_v37 = vmul.f32 %v2138_v8, %v3424_v10 }
0x13c3   :  { %v3951_v49 = vsub.f32 %v2134_v25, %v2142_v37 }
0x13c5   :  { %v2146_v12 = vmul.f32 %v3951_v49, %v3951_v49 }
0x13c7   :  { %v2148_v14 = vsel %vm4123_vm15, %v2146_v12, 0.0  ;;  %vm4140_vm15 = vmmov %vm4135_vm0  ;;  %v2965_v12 = vld [vmem:[%s3403_s30] ss:$0 sm:$0xff]  ;;  %s3189_s30 = smov [#allocation2]  }
0x13c8   :  { %v2141_v17 = vpop.xlane.xlu1 %2140  ;;  %2149 = vadd.xlane.f32.xlu0 %v2148_v14  ;;  %v2313_v29 = vsel %vm4140_vm15, %v2856_v4, 0  ;;  %vm2451_vm15 = vcmask 7168   ;;  %s2493_s12 = sshll.u32 %s3189_s30, 4  ;;  %s2494_s12 = int_to_ptr.vmem [resolvable:$true] %s2493_s12 }
0x13c9   :  { %v2143_v63 = vmul.f32 %v2141_v17, %v3424_v10  ;;  %2367 = vmatpush.bf16.xpose.msrb.mxu0 %v2313_v29 }
0x13cb   :  { %v3961_v0 = vsub.f32 %v2135_v56, %v2143_v63 }
0x13cd   :  { %v2147_v28 = vmul.f32 %v3961_v0, %v3961_v0 }
0x13cf   :  { %v2151_v40 = vsel %vm4126_vm13, %v2147_v28, 0.0 }
0x13d0   :  { %2152 = vadd.xlane.f32.xlu2 %v2151_v40 }
0x13e8   :  { %2422 = vperm.xlu2 %2927, %v3979_v47  }
0x143b   :  { %v2150_v59 = vpop.xlane.xlu0 %2149 }
0x143c   :  { %v2154_v26 = vmul.f32 %v2150_v59, %v3424_v10  ;;  %v2420_v59 = vadd.s32 128, %v3444_v53 }
0x143e   :  { %v2156_v16 = vadd.f32 1e-05, %v2154_v26 }
0x1440   :  { %3096 = vrsqrt.f32 %v2156_v16  ;;  %vm2164_vm13 = vweird.f32 %v2156_v16 }
0x1443   :  { %v2153_v42 = vpop.xlane.xlu2 %2152 }
0x1444   :  { %v2155_v3 = vmul.f32 %v2153_v42, %v3424_v10  ;;  %v2964_v10 = vld [vmem:[%s4142_s0] ss:$0 sm:$0xff] }
0x1446   :  { %v3097_v21 = vpop.eup %3096  ;;  %v2157_v52 = vadd.f32 1e-05, %v2155_v3 }
0x1447   :  { %v2159_v38 = vmul.f32 %v3097_v21, %v2156_v16  ;;  %vm2165_vm4 = vweird.f32 %v3097_v21 }
0x1448   :  { %3098 = vrsqrt.f32 %v2157_v52  ;;  %vm2166_vm7 = vmor %vm2164_vm13, %vm2165_vm4  ;;  %vm2174_vm12 = vweird.f32 %v2157_v52 }
0x1449   :  { %v2160_v48 = vmul.f32 %v3097_v21, %v2159_v38 }
0x144b   :  { %v2161_v30 = vmul.f32 0.5, %v2160_v48  ;;  %v2423_v20 = vpop.permute.xlu2 %2422 }
0x144c   :  { %vm2428_vm5 = vcmp.eq.s32.totalorder %v2420_v59, %v2423_v20  ;;  %vm2427_vm8 = vcmp.eq.s32.totalorder %v3444_v53, %v2423_v20 }
0x144d   :  { %v2162_v44 = vsub.f32 1.5, %v2161_v30 }
0x144e   :  { %v3099_v58 = vpop.eup %3098 }
0x144f   :  { %v2163_v51 = vmul.f32 %v3097_v21, %v2162_v44  ;;  %v2169_v25 = vmul.f32 %v3099_v58, %v2157_v52  ;;  %vm2175_vm11 = vweird.f32 %v3099_v58  ;;  %v3188_v52 = vmov 0.0  }
0x1450   :  { %vm2176_vm14 = vmor %vm2174_vm12, %vm2175_vm11  ;;  %v2811_v38 = vsel %vm2442_vm9, 1.0, %v3188_v52  ;;  %v2810_v48 = vsel %vm2441_vm3, 1.0, %v3188_v52  ;;  %vm2486_vm11 = vcmask 0  }
0x1451   :  { %v2170_v5 = vmul.f32 %v3099_v58, %v2169_v25  ;;  %v2167_v1 = vsel %vm2166_vm7, %v3097_v21, %v2163_v51  ;;  %v2462_v30 = vsel %vm2451_vm15, %v2811_v38, 0.0  ;;  %v2461_v44 = vsel %vm2451_vm15, %v2810_v48, 0.0 }
0x1452   :  { %v2178_v7 = vmul.f32 %v2167_v1, %v3951_v49  ;;  %v2225_v49 = vperm.slane %v2223_v36, 0 }
0x1453   :  { %v2171_v27 = vmul.f32 0.5, %v2170_v5 }
0x1454   :  { %v2183_v14 = vmul.f32 %v2964_v10, %v2178_v7 }
0x1455   :  { %v2172_v56 = vsub.f32 1.5, %v2171_v27 }
0x1456   :  { %v2188_v33 = vadd.f32 %v2965_v12, %v2183_v14 }
0x1457   :  { %v2173_v8 = vmul.f32 %v3099_v58, %v2172_v56 }
0x1459   :  { %v2177_v37 = vsel %vm2176_vm14, %v3099_v58, %v2173_v8  ;;  %v2463_v58 = vadd.f32 %v2462_v30, %v2461_v44 }
0x145a   :  { %v2179_v17 = vmul.f32 %v2177_v37, %v3961_v0 }
0x145b   :  { %v2464_v51 = vrot.slane %v2463_v58, 4 }
0x145c   :  { %v2184_v50 = vmul.f32 %v2964_v10, %v2179_v17 }
0x145d   :  { %v2465_v25 = vadd.f32 %v2464_v51, %v2463_v58 }
0x145e   :  { %v2189_v63 = vadd.f32 %v2965_v12, %v2184_v50 }
0x1460   :  { %v2190_v18 = vpack.c.bf16 %v2189_v63, %v2188_v33 }
0x1462   :  { %2808 = vmatmul.msk.bf16.vlgmr.msrb.gmra.mxu0 %vm4143_vm1, %v2190_v18  ;;  %2809 = vmatmul.msk.bf16.vlgmr.msra.gmra.mxu2 %vm4144_vm2, %v2190_v18 }
0x14df   :  { %v2369_v22 = vpop.f32.mrf.mxu0 }
0x14e0   :  { %v2370_v40 = vadd.f32 %v2369_v22, %v2225_v49 }
0x14e2   :  { %v2431_v3 = vsel %vm2427_vm8, %v2370_v40, 0.0 }
0x14e5   :  { %v2383_v28 = vpop.f32.mrf.mxu2 }
0x14e6   :  { %v2384_v31 = vadd.f32 %v2383_v28, %v2226_v24 }
0x14e7   :  { %v2371_v35 = vpop.f32.mrf.mxu0 }
0x14e8   :  { %v2388_v34 = vmax.f32 %v2370_v40, %v2384_v31  ;;  %v2372_v41 = vadd.f32 %v2371_v35, %v2225_v49  ;;  %v2432_v16 = vsel %vm2428_vm5, %v2384_v31, 0.0 }
0x14e9   :  { %v2435_v21 = vadd.f32 %v2432_v16, %v2431_v3 }
0x14ea   :  { %2389 = vmax.xlane.f32.xlu1 %v2388_v34 }
0x14ed   :  { %v2385_v0 = vpop.f32.mrf.mxu2 }
0x14ee   :  { %v2386_v57 = vadd.f32 %v2385_v0, %v2226_v24 }
0x14f0   :  { %v2391_v60 = vmax.f32 %v2372_v41, %v2386_v57 }
0x14f2   :  { %2392 = vmax.xlane.f32.xlu0 %v2391_v60 }
0x1503   :  { %2425 = vperm.xlu1 %2939, %v2419_v2  }
0x155d   :  { %v2390_v45 = vpop.xlane.xlu1 %2389 }
0x155e   :  { %v2394_v11 = vsub.f32 %v2370_v40, %v2390_v45  ;;  %v2395_v15 = vsub.f32 %v2384_v31, %v2390_v45 }
0x1560   :  { %v2398_v39 = vmul.f32 1.442695, %v2394_v11  ;;  %v2400_v6 = vmul.f32 1.442695, %v2395_v15 }
0x1562   :  { %3100 = vpow2.f32 %v2398_v39 }
0x1563   :  { %3102 = vpow2.f32 %v2400_v6 }
0x1565   :  { %v2393_v19 = vpop.xlane.xlu0 %2392 }
0x1566   :  { %v2396_v32 = vsub.f32 %v2372_v41, %v2393_v19  ;;  %v2397_v55 = vsub.f32 %v2386_v57, %v2393_v19 }
0x1568   :  { %v3101_v46 = vpop.eup %3100  ;;  %v2402_v9 = vmul.f32 1.442695, %v2396_v32  ;;  %v2404_v54 = vmul.f32 1.442695, %v2397_v55 }
0x1569   :  { %v3103_v61 = vpop.eup %3102 }
0x156a   :  { %3104 = vpow2.f32 %v2402_v9  ;;  %v2406_v13 = vadd.f32 %v3103_v61, %v3101_v46 }
0x156b   :  { %3106 = vpow2.f32 %v2404_v54 }
0x156c   :  { %2407 = vadd.xlane.f32.xlu0 %v2406_v13 }
0x1570   :  { %v3105_v62 = vpop.eup %3104 }
0x1571   :  { %v3107_v23 = vpop.eup %3106 }
0x1572   :  { %v2409_v4 = vadd.f32 %v3107_v23, %v3105_v62 }
0x1574   :  { %2410 = vadd.xlane.f32.xlu0 %v2409_v4 }
0x1575   :  { %v2426_v26 = vpop.permute.xlu1 %2425 }
0x1576   :  { %vm2429_vm0 = vcmp.eq.s32.totalorder %v3444_v53, %v2426_v26  ;;  %vm2430_vm6 = vcmp.eq.s32.totalorder %v2420_v59, %v2426_v26  ;;  %v2466_v53 = vrot.slane %v2465_v25, 2 }
0x1577   :  { %v2433_v29 = vsel %vm2429_vm0, %v2372_v41, 0.0  ;;  %v2434_v43 = vsel %vm2430_vm6, %v2386_v57, 0.0 }
0x1578   :  { %v2438_v42 = vadd.f32 %v2434_v43, %v2433_v29  ;;  %v2467_v5 = vadd.f32 %v2466_v53, %v2465_v25 }
0x157a   :  { %2439 = vadd.xlane.f32.xlu2 %v2438_v42  ;;  %v2468_v1 = vrot.slane %v2467_v5, 1 }
0x157c   :  { %2436 = vadd.xlane.f32.xlu0 %v2435_v21  ;;  %v2469_v56 = vadd.f32 %v2468_v1, %v2467_v5 }
0x157e   :  { %v2470_v10 = vmax.f32 %v2469_v56, 1.0 }
0x1580   :  { %vm2476_vm10 = vweird.f32 %v2470_v10  ;;  %v2482_v41 = vand.u32 2147483648, %v2470_v10  ;;  %v2480_v2 = vand.u32 2147483647, %v2470_v10 }
0x1582   :  { %v2483_v11 = vor.u32 1.1754944e-38, %v2482_v41  ;;  %vm2481_vm7 = vcmp.eq.f32.partialorder %v2480_v2, 8.507059e+37 }
0x15df   :  { %v2408_v27 = vpop.xlane.xlu0 %2407 }
0x15e0   :  { %3108 = vlog2.f32 %v2408_v27 }
0x15e1   :  { %3110 = vrcp.f32 %v2470_v10 }
0x15e6   :  { %v3109_v47 = vpop.eup %3108 }
0x15e7   :  { %v2411_v7 = vpop.xlane.xlu0 %2410  ;;  %v2413_v8 = vmul.f32 0.6931472, %v3109_v47  ;;  %v3111_v37 = vpop.eup %3110 }
0x15e8   :  { %3112 = vlog2.f32 %v2411_v7  ;;  %v2472_v63 = vmul.f32 %v3111_v37, %v2470_v10  ;;  %vm2477_vm4 = vweird.f32 %v3111_v37 }
0x15e9   :  { %v2416_v14 = vadd.f32 %v2413_v8, %v2390_v45  ;;  %vm2478_vm13 = vmor %vm2476_vm10, %vm2477_vm4 }
0x15ea   :  { %v2473_v24 = vsub.f32 1.0, %v2472_v63 }
0x15ec   :  { %v2474_v35 = vmul.f32 %v3111_v37, %v2473_v24 }
0x15ed   :  { %v2440_v36 = vpop.xlane.xlu2 %2439 }
0x15ee   :  { %v3113_v12 = vpop.eup %3112  ;;  %v2475_v60 = vadd.f32 %v3111_v37, %v2474_v35 }
0x15ef   :  { %v2415_v17 = vmul.f32 0.6931472, %v3113_v12  ;;  %v2437_v50 = vpop.xlane.xlu0 %2436 }
0x15f0   :  { %v2447_v33 = vsub.f32 %v2416_v14, %v2437_v50  ;;  %v2479_v39 = vsel %vm2478_vm13, %v3111_v37, %v2475_v60 }
0x15f1   :  { %v2417_v18 = vadd.f32 %v2415_v17, %v2393_v19  ;;  %v2484_v19 = vsel %vm2481_vm7, %v2483_v11, %v2479_v39 }
0x15f2   :  { %v2449_v49 = vmul.f32 %v2810_v48, %v2447_v33 }
0x15f3   :  { %v2448_v22 = vsub.f32 %v2417_v18, %v2440_v36 }
0x15f4   :  { %v2452_v31 = vsel %vm2451_vm15, %v2449_v49, 0.0 }
0x15f5   :  { %v2450_v28 = vmul.f32 %v2811_v38, %v2448_v22 }
0x15f7   :  { %v2453_v40 = vsel %vm2451_vm15, %v2450_v28, 0.0 }
0x15f8   :  { %v2454_v34 = vadd.f32 %v2453_v40, %v2452_v31 }
0x15fa   :  { %v2455_v0 = vrot.slane %v2454_v34, 4 }
0x15fc   :  { %v2456_v57 = vadd.f32 %v2455_v0, %v2454_v34 }
0x15fe   :  { %v2457_v45 = vrot.slane %v2456_v57, 2 }
0x1600   :  { %v2458_v15 = vadd.f32 %v2457_v45, %v2456_v57 }
0x1602   :  { %v2459_v6 = vrot.slane %v2458_v15, 1 }
0x1604   :  { %v2460_v32 = vadd.f32 %v2459_v6, %v2458_v15 }
0x1606   :  { %v2485_v55 = vmul.f32 %v2484_v19, %v2460_v32 }
0x1608   :  { %2487 = vst.msk [vmem:[#allocation2] sm:$0x1] %vm2486_vm11, %v2485_v55 }
0x1609   :  { %3137 = shalt.err (!%p3134_p4)
}
0x160a   :  { %2498 = dma.vmem_to_hbm [thread:$0]  %s2494_s12, 16, %s2496_s20, [#allocation3]  }
0x160b   :  { %3138 = dma.done.wait [#allocation3], 16  }
0x160c   :  { %3139 = vsyncadd [#allocation3], 4294967280 }
0x160d   :  { %2503 = vsyncpa [#allocation3], 1 }

</bundles_post_ra>
